<compile_context>
chip_gen: v6e
topology: v6e:2x2x1
jax: 0.10.0
libtpu: 0.0.40
codegen_flags: <defaults>
</compile_context>

<pallas_src>
import jax
import jax.numpy as jnp
from jax.experimental import pallas as pl
from jax.experimental.pallas import tpu as pltpu

D_MODEL = 512
D_FF = 2048
LN_EPS = 1e-5
_VMEM_LIMIT_BYTES = 48 * 1024 * 1024  # > v5e 16 MiB default, < v7x 64 MiB physical


# ---------------------------------------------------------------------------
# Fused kernel: y = LayerNorm(x + relu(x @ W1 + b1) @ W2 + b2)
# ---------------------------------------------------------------------------
def _ffn_kernel(x_ref, w1_ref, b1_ref, w2_ref, b2_ref, g_ref, beta_ref, o_ref):
    x = x_ref[...]                                                  # [tm, 512] f32
    # Matmul 1 in bf16 (MXU), accumulate f32; bias + ReLU in f32.
    h = jnp.dot(x.astype(jnp.bfloat16), w1_ref[...],
                preferred_element_type=jnp.float32)                 # [tm, 2048]
    h = jnp.maximum(h + b1_ref[...], jnp.float32(0.0))
    # Matmul 2 in bf16 (halves the live [tm, 2048] intermediate too).
    y = jnp.dot(h.astype(jnp.bfloat16), w2_ref[...],
                preferred_element_type=jnp.float32) + b2_ref[...]   # [tm, 512]
    z = x + y                                                       # residual, f32
    # Single-pass LayerNorm statistics: var = E[z^2] - mu^2 (biased, like nn.LayerNorm).
    mu = jnp.mean(z, axis=-1, keepdims=True)
    ex2 = jnp.mean(z * z, axis=-1, keepdims=True)
    var = jnp.maximum(ex2 - mu * mu, jnp.float32(0.0))
    z_hat = (z - mu) * jax.lax.rsqrt(var + jnp.float32(LN_EPS))
    o_ref[...] = z_hat * g_ref[...] + beta_ref[...]


def _pick_tm(M: int) -> int:
    # Sublane dim must be a multiple of 8 (or equal the full dim).  Aim for
    # >= 2 grid steps so ("parallel",) can shard across v7x's 2 TensorCores.
    if M <= 8:
        return M          # full-dim exception for tiny inputs
    if M >= 1024:
        return 512
    half = -(-M // 2)     # ceil(M / 2)
    return min(((half + 7) // 8) * 8, 512)


@jax.jit
def poswise_ffn(x, params):
    B, S, _ = x.shape
    M = B * S
    x2 = x.reshape(M, D_MODEL).astype(jnp.float32)

    # Weights go to the MXU in bf16; small vectors stay f32.
    w1 = params["w1"].astype(jnp.bfloat16)
    w2 = params["w2"].astype(jnp.bfloat16)
    b1 = params["b1"].astype(jnp.float32)
    b2 = params["b2"].astype(jnp.float32)
    gamma = params["gamma"].astype(jnp.float32)
    beta = params["beta"].astype(jnp.float32)

    tm = _pick_tm(M)
    grid = (pl.cdiv(M, tm),)

    resident = dict(pipeline_mode=pl.Buffered(buffer_count=1))  # constant index_map

    cost = pl.CostEstimate(
        flops=4 * M * D_MODEL * D_FF,                     # two matmuls, 2 flops/MAC
        transcendentals=M,                                # one rsqrt per row
        bytes_accessed=(2 * M * D_MODEL * 4               # x in + out (f32)
                        + 2 * D_MODEL * D_FF * 2          # bf16 W1 + W2
                        + (D_FF + 3 * D_MODEL) * 4),      # biases / gamma / beta
    )

    out = pl.pallas_call(
        _ffn_kernel,
        out_shape=jax.ShapeDtypeStruct((M, D_MODEL), jnp.float32),
        grid=grid,
        in_specs=[
            pl.BlockSpec((tm, D_MODEL), lambda i: (i, 0)),                 # x (pipelined)
            pl.BlockSpec((D_MODEL, D_FF), lambda i: (0, 0), **resident),   # W1 (bf16, resident)
            pl.BlockSpec((1, D_FF), lambda i: (0, 0), **resident),         # b1
            pl.BlockSpec((D_FF, D_MODEL), lambda i: (0, 0), **resident),   # W2 (bf16, resident)
            pl.BlockSpec((1, D_MODEL), lambda i: (0, 0), **resident),      # b2
            pl.BlockSpec((1, D_MODEL), lambda i: (0, 0), **resident),      # gamma
            pl.BlockSpec((1, D_MODEL), lambda i: (0, 0), **resident),      # beta
        ],
        out_specs=pl.BlockSpec((tm, D_MODEL), lambda i: (i, 0)),
        compiler_params=pltpu.CompilerParams(
            dimension_semantics=("parallel",),
            vmem_limit_bytes=_VMEM_LIMIT_BYTES,
        ),
        cost_estimate=cost,
    )(x2, w1, b1, w2, b2, gamma, beta)
    return out.reshape(B, S, D_MODEL)


# ---------------------------------------------------------------------------
# Pure-JAX f32 reference for sanity checking
# ---------------------------------------------------------------------------
def reference(x, params):
    h = jnp.maximum(x @ params["w1"] + params["b1"], 0.0)
    y = h @ params["w2"] + params["b2"]
    z = x + y
    mu = jnp.mean(z, axis=-1, keepdims=True)
    var = jnp.mean((z - mu) ** 2, axis=-1, keepdims=True)
    z_hat = (z - mu) / jnp.sqrt(var + LN_EPS)
    return z_hat * params["gamma"] + params["beta"]


if __name__ == "__main__":
    key = jax.random.PRNGKey(0)
    B, S = 2, 8

    keys = jax.random.split(key, 5)
    scale = 0.02
    params = {
        # conv1 (kernel_size=1) == linear [d_model -> d_ff]; stored as [512, 2048]
        "w1": scale * jax.random.normal(keys[0], (D_MODEL, D_FF), jnp.float32),
        "b1": scale * jax.random.normal(keys[1], (1, D_FF), jnp.float32),
        # conv2 (kernel_size=1) == linear [d_ff -> d_model]; stored as [2048, 512]
        "w2": scale * jax.random.normal(keys[2], (D_FF, D_MODEL), jnp.float32),
        "b2": scale * jax.random.normal(keys[3], (1, D_MODEL), jnp.float32),
        # LayerNorm(d_model) is constructed inside forward(): default gamma/beta
        "gamma": jnp.ones((1, D_MODEL), jnp.float32),
        "beta": jnp.zeros((1, D_MODEL), jnp.float32),
    }

    x = jax.random.normal(keys[4], (B, S, D_MODEL), jnp.float32)

    out = poswise_ffn(x, params)
    out = jax.block_until_ready(out)

    ref = reference(x, params)
    assert out.shape == (B, S, D_MODEL)
    # bf16 matmul path -> relaxed tolerance vs. the f32 reference.
    assert jnp.allclose(out, ref, atol=2e-2, rtol=2e-2), (
        float(jnp.max(jnp.abs(out - ref))))

    print("KERNEL_OK")
</pallas_src>

<mosaic_0001>
module attributes {stable_mosaic.version = 11 : i64} {
  func.func @_ffn_kernel(%arg0: i32, %arg1: memref<8x512xf32, #tpu.memory_space<vmem>>, %arg2: memref<512x2048xbf16, #tpu.memory_space<vmem>>, %arg3: memref<1x2048xf32, #tpu.memory_space<vmem>>, %arg4: memref<2048x512xbf16, #tpu.memory_space<vmem>>, %arg5: memref<1x512xf32, #tpu.memory_space<vmem>>, %arg6: memref<1x512xf32, #tpu.memory_space<vmem>>, %arg7: memref<1x512xf32, #tpu.memory_space<vmem>>, %arg8: memref<8x512xf32, #tpu.memory_space<vmem>>) attributes {dimension_semantics = [#tpu.dimension_semantics<parallel>], iteration_bounds = array<i64: 2>, scalar_prefetch = 0 : i64, scratch_operands = 0 : i64, tpu.core_type = #tpu.core_type<tc>, window_params = [{transform_indices = @transform_0, window_bounds = array<i64: 8, 512>}, {pipeline_mode = #tpu.pipeline_mode<synchronous>, transform_indices = @transform_1, window_bounds = array<i64: 512, 2048>}, {pipeline_mode = #tpu.pipeline_mode<synchronous>, transform_indices = @transform_2, window_bounds = array<i64: 1, 2048>}, {pipeline_mode = #tpu.pipeline_mode<synchronous>, transform_indices = @transform_3, window_bounds = array<i64: 2048, 512>}, {pipeline_mode = #tpu.pipeline_mode<synchronous>, transform_indices = @transform_4, window_bounds = array<i64: 1, 512>}, {pipeline_mode = #tpu.pipeline_mode<synchronous>, transform_indices = @transform_5, window_bounds = array<i64: 1, 512>}, {pipeline_mode = #tpu.pipeline_mode<synchronous>, transform_indices = @transform_6, window_bounds = array<i64: 1, 512>}, {transform_indices = @transform_7, window_bounds = array<i64: 8, 512>}]} {
    %c0 = arith.constant 0 : index
    %c0_0 = arith.constant 0 : index
    %0 = vector.load %arg1[%c0, %c0_0] : memref<8x512xf32, #tpu.memory_space<vmem>>, vector<8x512xf32>
    %1 = arith.truncf %0 : vector<8x512xf32> to vector<8x512xbf16>
    %c0_1 = arith.constant 0 : index
    %c0_2 = arith.constant 0 : index
    %2 = vector.load %arg2[%c0_1, %c0_2] : memref<512x2048xbf16, #tpu.memory_space<vmem>>, vector<512x2048xbf16>
    %cst = arith.constant dense<0.000000e+00> : vector<8x2048xf32>
    %3 = tpu.matmul %1, %2, %cst {dimension_numbers = #tpu.dot_dimension_numbers<[1], [0], [0], [1], [0, 0, 1, 1], [], []>} : vector<8x512xbf16>, vector<512x2048xbf16>, vector<8x2048xf32> -> vector<8x2048xf32>
    %c0_3 = arith.constant 0 : index
    %c0_4 = arith.constant 0 : index
    %4 = vector.load %arg3[%c0_3, %c0_4] : memref<1x2048xf32, #tpu.memory_space<vmem>>, vector<1x2048xf32>
    %5 = vector.broadcast %4 : vector<1x2048xf32> to vector<8x2048xf32>
    %6 = arith.addf %3, %5 : vector<8x2048xf32>
    %cst_5 = arith.constant 0.000000e+00 : f32
    %7 = vector.broadcast %cst_5 : f32 to vector<8x2048xf32>
    %8 = arith.maximumf %6, %7 : vector<8x2048xf32>
    %9 = arith.truncf %8 : vector<8x2048xf32> to vector<8x2048xbf16>
    %c0_6 = arith.constant 0 : index
    %c0_7 = arith.constant 0 : index
    %10 = vector.load %arg4[%c0_6, %c0_7] : memref<2048x512xbf16, #tpu.memory_space<vmem>>, vector<2048x512xbf16>
    %cst_8 = arith.constant dense<0.000000e+00> : vector<8x512xf32>
    %11 = tpu.matmul %9, %10, %cst_8 {dimension_numbers = #tpu.dot_dimension_numbers<[1], [0], [0], [1], [0, 0, 1, 1], [], []>} : vector<8x2048xbf16>, vector<2048x512xbf16>, vector<8x512xf32> -> vector<8x512xf32>
    %c0_9 = arith.constant 0 : index
    %c0_10 = arith.constant 0 : index
    %12 = vector.load %arg5[%c0_9, %c0_10] : memref<1x512xf32, #tpu.memory_space<vmem>>, vector<1x512xf32>
    %13 = vector.broadcast %12 : vector<1x512xf32> to vector<8x512xf32>
    %14 = arith.addf %11, %13 : vector<8x512xf32>
    %15 = arith.addf %0, %14 : vector<8x512xf32>
    %cst_11 = arith.constant dense<0.000000e+00> : vector<8xf32>
    %16 = vector.multi_reduction <add>, %15, %cst_11 [1] : vector<8x512xf32> to vector<8xf32>
    %17 = vector.shape_cast %16 : vector<8xf32> to vector<8x1xf32>
    %cst_12 = arith.constant 5.120000e+02 : f32
    %18 = vector.broadcast %cst_12 : f32 to vector<8x1xf32>
    %19 = arith.divf %17, %18 : vector<8x1xf32>
    %20 = arith.mulf %15, %15 : vector<8x512xf32>
    %cst_13 = arith.constant dense<0.000000e+00> : vector<8xf32>
    %21 = vector.multi_reduction <add>, %20, %cst_13 [1] : vector<8x512xf32> to vector<8xf32>
    %22 = vector.shape_cast %21 : vector<8xf32> to vector<8x1xf32>
    %cst_14 = arith.constant 5.120000e+02 : f32
    %23 = vector.broadcast %cst_14 : f32 to vector<8x1xf32>
    %24 = arith.divf %22, %23 : vector<8x1xf32>
    %25 = arith.mulf %19, %19 : vector<8x1xf32>
    %26 = arith.subf %24, %25 : vector<8x1xf32>
    %cst_15 = arith.constant 0.000000e+00 : f32
    %27 = vector.broadcast %cst_15 : f32 to vector<8x1xf32>
    %28 = arith.maximumf %26, %27 : vector<8x1xf32>
    %29 = vector.broadcast %19 : vector<8x1xf32> to vector<8x512xf32>
    %30 = arith.subf %15, %29 : vector<8x512xf32>
    %cst_16 = arith.constant 9.99999974E-6 : f32
    %31 = vector.broadcast %cst_16 : f32 to vector<8x1xf32>
    %32 = arith.addf %28, %31 : vector<8x1xf32>
    %33 = math.rsqrt %32 : vector<8x1xf32>
    %34 = vector.broadcast %33 : vector<8x1xf32> to vector<8x512xf32>
    %35 = arith.mulf %30, %34 : vector<8x512xf32>
    %c0_17 = arith.constant 0 : index
    %c0_18 = arith.constant 0 : index
    %36 = vector.load %arg6[%c0_17, %c0_18] : memref<1x512xf32, #tpu.memory_space<vmem>>, vector<1x512xf32>
    %37 = vector.broadcast %36 : vector<1x512xf32> to vector<8x512xf32>
    %38 = arith.mulf %35, %37 : vector<8x512xf32>
    %c0_19 = arith.constant 0 : index
    %c0_20 = arith.constant 0 : index
    %39 = vector.load %arg7[%c0_19, %c0_20] : memref<1x512xf32, #tpu.memory_space<vmem>>, vector<1x512xf32>
    %40 = vector.broadcast %39 : vector<1x512xf32> to vector<8x512xf32>
    %41 = arith.addf %38, %40 : vector<8x512xf32>
    %c0_21 = arith.constant 0 : index
    %c0_22 = arith.constant 0 : index
    %42 = vector.load %arg8[%c0_21, %c0_22] : memref<8x512xf32, #tpu.memory_space<vmem>>, vector<8x512xf32>
    tpu.vector_store %arg8[%c0_21, %c0_22], %41 {strides = array<i32>} : memref<8x512xf32, #tpu.memory_space<vmem>>, vector<8x512xf32>,
    return
  }
  func.func @transform_0(%arg0: i32) -> (i32, i32) {
    %c0_i32 = arith.constant 0 : i32
    %c0_i32_0 = arith.constant 0 : i32
    return %arg0, %c0_i32 : i32, i32
  }
  func.func @transform_1(%arg0: i32) -> (i32, i32) {
    %c0_i32 = arith.constant 0 : i32
    %c0_i32_0 = arith.constant 0 : i32
    %c0_i32_1 = arith.constant 0 : i32
    return %c0_i32, %c0_i32_0 : i32, i32
  }
  func.func @transform_2(%arg0: i32) -> (i32, i32) {
    %c0_i32 = arith.constant 0 : i32
    %c0_i32_0 = arith.constant 0 : i32
    %c0_i32_1 = arith.constant 0 : i32
    return %c0_i32, %c0_i32_0 : i32, i32
  }
  func.func @transform_3(%arg0: i32) -> (i32, i32) {
    %c0_i32 = arith.constant 0 : i32
    %c0_i32_0 = arith.constant 0 : i32
    %c0_i32_1 = arith.constant 0 : i32
    return %c0_i32, %c0_i32_0 : i32, i32
  }
  func.func @transform_4(%arg0: i32) -> (i32, i32) {
    %c0_i32 = arith.constant 0 : i32
    %c0_i32_0 = arith.constant 0 : i32
    %c0_i32_1 = arith.constant 0 : i32
    return %c0_i32, %c0_i32_0 : i32, i32
  }
  func.func @transform_5(%arg0: i32) -> (i32, i32) {
    %c0_i32 = arith.constant 0 : i32
    %c0_i32_0 = arith.constant 0 : i32
    %c0_i32_1 = arith.constant 0 : i32
    return %c0_i32, %c0_i32_0 : i32, i32
  }
  func.func @transform_6(%arg0: i32) -> (i32, i32) {
    %c0_i32 = arith.constant 0 : i32
    %c0_i32_0 = arith.constant 0 : i32
    %c0_i32_1 = arith.constant 0 : i32
    return %c0_i32, %c0_i32_0 : i32, i32
  }
  func.func @transform_7(%arg0: i32) -> (i32, i32) {
    %c0_i32 = arith.constant 0 : i32
    %c0_i32_0 = arith.constant 0 : i32
    return %arg0, %c0_i32 : i32, i32
  }
}

</mosaic_0001>

<bundles_post_ra>
// kernel: poswise_ffn.1
= control target key start
LH: loop header
LB: loop body
LE: loop exit
PB: predicated region body
PF: predicated region fallthrough
CT: control target
= control target key end

     0   :  { %12 = vsyncpa [#allocation3], 0  ;;  %s13466_s0 = inlined_call_operand.vmem [shape: f32[16,512], index: 0, kind: input, shape index: {}]   ;;  %s13467_s1 = inlined_call_operand.vmem [shape: bf16[512,2048], index: 1, kind: input, shape index: {}]   ;;  %s13468_s2 = inlined_call_operand.vmem [shape: f32[1,2048], index: 2, kind: input, shape index: {}]   ;;  %s13469_s3 = inlined_call_operand.vmem [shape: bf16[2048,512], index: 3, kind: input, shape index: {}]   ;;  %s13470_s4 = inlined_call_operand.vmem [shape: f32[1,512], index: 4, kind: input, shape index: {}]   ;;  %s13471_s5 = inlined_call_operand.vmem [shape: f32[1,512], index: 5, kind: input, shape index: {}]   ;;  %s13472_s6 = inlined_call_operand.vmem [shape: f32[1,512], index: 6, kind: input, shape index: {}]   ;;  %s13473_s7 = inlined_call_operand.hbm [shape: f32[16,512], index: 7, kind: output, shape index: {}]  }
   0x1   :  { %14 = vsyncpa [#allocation3 + $0x1], 0  ;;  %s10000_s24 = smov 0   ;;  %s10002_s25 = smov 0  }
   0x2   :  { %s10004_s26 = smov 0   ;;  %s10006_s27 = smov 0  }
   0x3 LB: > { %s10021_s28 = sadd.s32 4294967295, %s9957_s27   ;;  %s8043_s29 = sadd.s32 4294967294, %s9957_s27   ;;  %s9957_s27 = sphi %s10006_s27, %s13479_s27   ;;  %s9953_s26 = sphi %s10004_s26, %s13478_s26   ;;  %s9949_s25 = sphi %s10002_s25, %s13477_s25   ;;  %s9945_s24 = sphi %s10000_s24, %s13476_s24  }
   0x4   : > { %s10025_s30 = sadd.s32 1, %s9957_s27   ;;  %s179_s8 = sadd.s32 1, %s9953_s26 }
   0x5   : > { %s176_s9 = ssub.s32 %s9957_s27, %s10025_s30  ;;  %p189_p0 = scmp.ne.s32.totalorder %s9953_s26, %s9949_s25 }
   0x6   : > { %p177_p1 = scmp.eq.s32.totalorder %s176_s9, 0  ;;  %p190_p2 = scmp.eq.s32.totalorder %s10021_s28, 1 }
   0x7   : > { %p195_p3 = scmp.ne.s32.totalorder %s9949_s25, %s9945_s24  ;;  %p196_p4 = scmp.eq.s32.totalorder %s8043_s29, 1 }
   0x8   : > { %s10036_s10 = scalar_select %p177_p1, %s9953_s26, %s179_s8  }
   0x9   : > { %p10038_p5 = por %p190_p2, %p189_p0  ;;  %p10042_p6 = por %p196_p4, %p195_p3 }
   0xa   : > { %p8046_p7 = scmp.ge.s32.totalorder %s9957_s27, 1  ;;  %p240_p8 = scmp.lt.s32.totalorder %s9957_s27, 3 }
   0xc   : > { %p241_p9 = pnand %p8046_p7, %p240_p8 }
   0xd   : > { %p272_p10 = scmp.lt.s32.totalorder (!%p241_p9), %s10021_s28, 1  ;;  %s9080_s9 = sshll.u32 (!%p241_p9), %s10021_s28, 9 }
   0xe   : > { %244 = sbr.rel (%p241_p9) target bundleno = 1434 (0x59a), region = 48  ;;  %s13423_s17 = scalar_lea.hbm (!%p241_p9), %s13473_s7, %s9080_s9 }
   0xf   : > { %s9959_s19 = smov (!%p241_p9), [#allocation2]  }
  0x13   : > { %v397_v0 = vld [vmem:[%s13467_s1 + $0x380] sm:$0xff]  ;;  %s273_s8 = scalar_select %p272_p10, %s10021_s28, 1 }
  0x14   : > { %v405_v1 = vld [vmem:[%s13467_s1 + $0x3c0] sm:$0xff] }
  0x15   : > { %v653_v2 = vld [vmem:[%s13467_s1 + $0xb80] sm:$0xff]  ;;  %v8163_v3 = vcombine.high %v397_v0, %v405_v1  ;;  %v8162_v5 = vcombine.low %v397_v0, %v405_v1  ;;  %s9079_s20 = sshll.u32 %s273_s8, 5 }
  0x16   : > { %v661_v4 = vld [vmem:[%s13467_s1 + $0xbc0] sm:$0xff]  ;;  %s10131_s8 = scalar_lea.vmem %s13466_s0, %s9079_s20  ;;  %s9901_s20 = sshll.u32 %s9959_s19, 4  ;;  %s9902_s20 = int_to_ptr.vmem [resolvable:$false] %s9901_s20 }
  0x17   : > { %v381_v6 = vld [vmem:[%s13467_s1 + $0x300] sm:$0xff]  ;;  %v8419_v8 = vcombine.high %v653_v2, %v661_v4  ;;  %v8418_v9 = vcombine.low %v653_v2, %v661_v4  ;;  %3441 = vmatprep.subr.bf16.mxu0 %v8163_v3  ;;  %v278_v53 = vld [vmem:[%s10131_s8 + $0x8] sm:$0xff]  ;;  %v280_v54 = vld [vmem:[%s10131_s8 + $0x18] sm:$0xff]  ;;  %s9903_s21 = scalar_lea.vmem %s9902_s20, 1024 }
  0x18   : > { %v389_v7 = vld [vmem:[%s13467_s1 + $0x340] sm:$0xff]  ;;  %3442 = vmatpush1.bf16.msra.mxu0 %v8162_v5  ;;  %v10147_v58 = vpack.c.bf16 %v278_v53, %v278_v53  ;;  %v10149_v59 = vpack.c.bf16 %v280_v54, %v280_v54 }
  0x19   : > { %v8147_v10 = vcombine.high %v381_v6, %v389_v7  ;;  %v637_v11 = vld [vmem:[%s13467_s1 + $0xb00] sm:$0xff]  ;;  %3482 = vmatprep.subr.bf16.mxu1 %v8419_v8  ;;  %v8146_v18 = vcombine.low %v381_v6, %v389_v7 }
  0x1a   : > { %v645_v12 = vld [vmem:[%s13467_s1 + $0xb40] sm:$0xff]  ;;  %3483 = vmatpush1.bf16.msra.mxu1 %v8418_v9  ;;  %3473 = vmatprep.mubr.bf16.mxu0 %v10147_v58 }
  0x1b   : > { %v365_v13 = vld [vmem:[%s13467_s1 + $0x280] sm:$0xff]  ;;  %v8403_v14 = vcombine.high %v637_v11, %v645_v12  ;;  %3443 = vmatprep.subr.bf16.mxu0 %v8147_v10  ;;  %v8402_v19 = vcombine.low %v637_v11, %v645_v12  ;;  %3514 = vmatprep.mubr.bf16.mxu1 %v10149_v59 }
  0x1c   : > { %v373_v15 = vld [vmem:[%s13467_s1 + $0x2c0] sm:$0xff]  ;;  %3444 = vmatpush1.bf16.msra.mxu0 %v8146_v18 }
  0x1d   : > { %v621_v16 = vld [vmem:[%s13467_s1 + $0xa80] sm:$0xff]  ;;  %v8131_v20 = vcombine.high %v365_v13, %v373_v15  ;;  %3484 = vmatprep.subr.bf16.mxu1 %v8403_v14  ;;  %v8130_v26 = vcombine.low %v365_v13, %v373_v15 }
  0x1e   : > { %v629_v17 = vld [vmem:[%s13467_s1 + $0xac0] sm:$0xff]  ;;  %3485 = vmatpush1.bf16.msra.mxu1 %v8402_v19 }
  0x1f   : > { %v8387_v21 = vcombine.high %v621_v16, %v629_v17  ;;  %v349_v22 = vld [vmem:[%s13467_s1 + $0x200] sm:$0xff]  ;;  %3445 = vmatprep.subr.bf16.mxu0 %v8131_v20  ;;  %v8386_v27 = vcombine.low %v621_v16, %v629_v17 }
  0x20   : > { %v357_v23 = vld [vmem:[%s13467_s1 + $0x240] sm:$0xff]  ;;  %3446 = vmatpush1.bf16.msra.mxu0 %v8130_v26 }
  0x21   : > { %v605_v24 = vld [vmem:[%s13467_s1 + $0xa00] sm:$0xff]  ;;  %v8115_v28 = vcombine.high %v349_v22, %v357_v23  ;;  %3486 = vmatprep.subr.bf16.mxu1 %v8387_v21  ;;  %v8114_v34 = vcombine.low %v349_v22, %v357_v23 }
  0x22   : > { %v613_v25 = vld [vmem:[%s13467_s1 + $0xa40] sm:$0xff]  ;;  %3487 = vmatpush1.bf16.msra.mxu1 %v8386_v27 }
  0x23   : > { %v8371_v29 = vcombine.high %v605_v24, %v613_v25  ;;  %v333_v30 = vld [vmem:[%s13467_s1 + $0x180] sm:$0xff]  ;;  %3447 = vmatprep.subr.bf16.mxu0 %v8115_v28  ;;  %v8370_v35 = vcombine.low %v605_v24, %v613_v25 }
  0x24   : > { %v341_v31 = vld [vmem:[%s13467_s1 + $0x1c0] sm:$0xff]  ;;  %3448 = vmatpush1.bf16.msra.mxu0 %v8114_v34 }
  0x25   : > { %v589_v32 = vld [vmem:[%s13467_s1 + $0x980] sm:$0xff]  ;;  %v8099_v36 = vcombine.high %v333_v30, %v341_v31  ;;  %3488 = vmatprep.subr.bf16.mxu1 %v8371_v29  ;;  %v8098_v42 = vcombine.low %v333_v30, %v341_v31 }
  0x26   : > { %v597_v33 = vld [vmem:[%s13467_s1 + $0x9c0] sm:$0xff]  ;;  %3489 = vmatpush1.bf16.msra.mxu1 %v8370_v35 }
  0x27   : > { %v8355_v37 = vcombine.high %v589_v32, %v597_v33  ;;  %v317_v38 = vld [vmem:[%s13467_s1 + $0x100] sm:$0xff]  ;;  %3449 = vmatprep.subr.bf16.mxu0 %v8099_v36  ;;  %v8354_v43 = vcombine.low %v589_v32, %v597_v33 }
  0x28   : > { %v325_v39 = vld [vmem:[%s13467_s1 + $0x140] sm:$0xff]  ;;  %3450 = vmatpush1.bf16.msra.mxu0 %v8098_v42 }
  0x29   : > { %v573_v40 = vld [vmem:[%s13467_s1 + $0x900] sm:$0xff]  ;;  %v8083_v44 = vcombine.high %v317_v38, %v325_v39  ;;  %3490 = vmatprep.subr.bf16.mxu1 %v8355_v37  ;;  %v8082_v50 = vcombine.low %v317_v38, %v325_v39 }
  0x2a   : > { %v581_v41 = vld [vmem:[%s13467_s1 + $0x940] sm:$0xff]  ;;  %3491 = vmatpush1.bf16.msra.mxu1 %v8354_v43 }
  0x2b   : > { %v8339_v45 = vcombine.high %v573_v40, %v581_v41  ;;  %v301_v46 = vld [vmem:[%s13467_s1 + $0x80] sm:$0xff]  ;;  %3451 = vmatprep.subr.bf16.mxu0 %v8083_v44  ;;  %v8338_v51 = vcombine.low %v573_v40, %v581_v41 }
  0x2c   : > { %v309_v47 = vld [vmem:[%s13467_s1 + $0xc0] sm:$0xff]  ;;  %3452 = vmatpush1.bf16.msra.mxu0 %v8082_v50 }
  0x2d   : > { %v557_v48 = vld [vmem:[%s13467_s1 + $0x880] sm:$0xff]  ;;  %v8067_v52 = vcombine.high %v301_v46, %v309_v47  ;;  %3492 = vmatprep.subr.bf16.mxu1 %v8339_v45  ;;  %v8066_v62 = vcombine.low %v301_v46, %v309_v47 }
  0x2e   : > { %v565_v49 = vld [vmem:[%s13467_s1 + $0x8c0] sm:$0xff]  ;;  %3493 = vmatpush1.bf16.msra.mxu1 %v8338_v51 }
  0x2f   : > { %v8323_v55 = vcombine.high %v557_v48, %v565_v49  ;;  %v285_v56 = vld [vmem:[%s13467_s1] sm:$0xff]  ;;  %3453 = vmatprep.subr.bf16.mxu0 %v8067_v52  ;;  %v8322_v63 = vcombine.low %v557_v48, %v565_v49 }
  0x30   : > { %v293_v57 = vld [vmem:[%s13467_s1 + $0x40] sm:$0xff]  ;;  %3454 = vmatpush1.bf16.msra.mxu0 %v8066_v62 }
  0x31   : > { %v541_v60 = vld [vmem:[%s13467_s1 + $0x800] sm:$0xff]  ;;  %v8051_v0 = vcombine.high %v285_v56, %v293_v57  ;;  %3494 = vmatprep.subr.bf16.mxu1 %v8323_v55  ;;  %v8050_v6 = vcombine.low %v285_v56, %v293_v57 }
  0x32   : > { %v549_v61 = vld [vmem:[%s13467_s1 + $0x840] sm:$0xff]  ;;  %3495 = vmatpush1.bf16.msra.mxu1 %v8322_v63 }
  0x33   : > { %v8307_v1 = vcombine.high %v541_v60, %v549_v61  ;;  %v525_v2 = vld [vmem:[%s13467_s1 + $0x780] sm:$0xff]  ;;  %3455 = vmatprep.subr.bf16.mxu0 %v8051_v0  ;;  %v8306_v7 = vcombine.low %v541_v60, %v549_v61 }
  0x34   : > { %v533_v3 = vld [vmem:[%s13467_s1 + $0x7c0] sm:$0xff]  ;;  %3456 = vmatpush1.bf16.msra.mxu0 %v8050_v6  ;;  %v654_v6 = vld [vmem:[%s13467_s1 + $0xb88] sm:$0xff] }
  0x35   : > { %v781_v4 = vld [vmem:[%s13467_s1 + $0xf80] sm:$0xff]  ;;  %v8291_v8 = vcombine.high %v525_v2, %v533_v3  ;;  %3496 = vmatprep.subr.bf16.mxu1 %v8307_v1  ;;  %v8290_v14 = vcombine.low %v525_v2, %v533_v3 }
  0x36   : > { %v789_v5 = vld [vmem:[%s13467_s1 + $0xfc0] sm:$0xff]  ;;  %3497 = vmatpush1.bf16.msra.mxu1 %v8306_v7  ;;  %v662_v7 = vld [vmem:[%s13467_s1 + $0xbc8] sm:$0xff] }
  0x37   : > { %v8547_v9 = vcombine.high %v781_v4, %v789_v5  ;;  %v509_v10 = vld [vmem:[%s13467_s1 + $0x700] sm:$0xff]  ;;  %3457 = vmatprep.subr.bf16.mxu0 %v8291_v8  ;;  %v8546_v15 = vcombine.low %v781_v4, %v789_v5  ;;  %v398_v4 = vld [vmem:[%s13467_s1 + $0x388] sm:$0xff] }
  0x38   : > { %v517_v11 = vld [vmem:[%s13467_s1 + $0x740] sm:$0xff]  ;;  %3458 = vmatpush2.bf16.msra.mxu0 %v8290_v14  ;;  %v406_v5 = vld [vmem:[%s13467_s1 + $0x3c8] sm:$0xff] }
  0x39   : > { %v765_v12 = vld [vmem:[%s13467_s1 + $0xf00] sm:$0xff]  ;;  %v8275_v16 = vcombine.high %v509_v10, %v517_v11  ;;  %3498 = vmatprep.subr.bf16.mxu1 %v8547_v9  ;;  %v8274_v22 = vcombine.low %v509_v10, %v517_v11  ;;  %v279_v11 = vld [vmem:[%s10131_s8 + $0x10] sm:$0xff]  ;;  %v382_v14 = vld [vmem:[%s13467_s1 + $0x308] sm:$0xff] }
  0x3a   : > { %v773_v13 = vld [vmem:[%s13467_s1 + $0xf40] sm:$0xff]  ;;  %3499 = vmatpush2.bf16.msra.mxu1 %v8546_v15  ;;  %v390_v15 = vld [vmem:[%s13467_s1 + $0x348] sm:$0xff] }
  0x3b   : > { %v8531_v17 = vcombine.high %v765_v12, %v773_v13  ;;  %v493_v18 = vld [vmem:[%s13467_s1 + $0x680] sm:$0xff]  ;;  %3459 = vmatprep.subr.bf16.mxu0 %v8275_v16  ;;  %v8530_v23 = vcombine.low %v765_v12, %v773_v13  ;;  %v8165_v12 = vcombine.high %v398_v4, %v406_v5  ;;  %v8421_v13 = vcombine.high %v654_v6, %v662_v7 }
  0x3c   : > { %v501_v19 = vld [vmem:[%s13467_s1 + $0x6c0] sm:$0xff]  ;;  %3460 = vmatpush2.bf16.msra.mxu0 %v8274_v22  ;;  %v8149_v22 = vcombine.high %v382_v14, %v390_v15 }
  0x3d   : > { %v749_v20 = vld [vmem:[%s13467_s1 + $0xe80] sm:$0xff]  ;;  %v8259_v24 = vcombine.high %v493_v18, %v501_v19  ;;  %3500 = vmatprep.subr.bf16.mxu1 %v8531_v17  ;;  %v8258_v30 = vcombine.low %v493_v18, %v501_v19  ;;  %v638_v17 = vld [vmem:[%s13467_s1 + $0xb08] sm:$0xff]  ;;  %v10283_v19 = vpack.c.bf16 %v279_v11, %v279_v11 }
  0x3e   : > { %v757_v21 = vld [vmem:[%s13467_s1 + $0xec0] sm:$0xff]  ;;  %3501 = vmatpush2.bf16.msra.mxu1 %v8530_v23  ;;  %v646_v18 = vld [vmem:[%s13467_s1 + $0xb48] sm:$0xff] }
  0x3f   : > { %v8515_v25 = vcombine.high %v749_v20, %v757_v21  ;;  %v477_v26 = vld [vmem:[%s13467_s1 + $0x600] sm:$0xff]  ;;  %3461 = vmatprep.subr.bf16.mxu0 %v8259_v24  ;;  %v8514_v31 = vcombine.low %v749_v20, %v757_v21  ;;  %v8164_v20 = vcombine.low %v398_v4, %v406_v5  ;;  %v8420_v21 = vcombine.low %v654_v6, %v662_v7  ;;  %v366_v23 = vld [vmem:[%s13467_s1 + $0x288] sm:$0xff] }
  0x40   : > { %v485_v27 = vld [vmem:[%s13467_s1 + $0x640] sm:$0xff]  ;;  %3462 = vmatpush2.bf16.msra.mxu0 %v8258_v30  ;;  %v374_v24 = vld [vmem:[%s13467_s1 + $0x2c8] sm:$0xff] }
  0x41   : > { %v733_v28 = vld [vmem:[%s13467_s1 + $0xe00] sm:$0xff]  ;;  %v8243_v32 = vcombine.high %v477_v26, %v485_v27  ;;  %3502 = vmatprep.subr.bf16.mxu1 %v8515_v25  ;;  %v8242_v38 = vcombine.low %v477_v26, %v485_v27  ;;  %v8405_v25 = vcombine.high %v638_v17, %v646_v18  ;;  %v622_v26 = vld [vmem:[%s13467_s1 + $0xa88] sm:$0xff]  ;;  %v8133_v30 = vcombine.high %v366_v23, %v374_v24 }
  0x42   : > { %v741_v29 = vld [vmem:[%s13467_s1 + $0xe40] sm:$0xff]  ;;  %3503 = vmatpush2.bf16.msra.mxu1 %v8514_v31  ;;  %v630_v27 = vld [vmem:[%s13467_s1 + $0xac8] sm:$0xff] }
  0x43   : > { %v8499_v33 = vcombine.high %v733_v28, %v741_v29  ;;  %v461_v34 = vld [vmem:[%s13467_s1 + $0x580] sm:$0xff]  ;;  %3463 = vmatprep.subr.bf16.mxu0 %v8243_v32  ;;  %v8498_v39 = vcombine.low %v733_v28, %v741_v29  ;;  %v8148_v28 = vcombine.low %v382_v14, %v390_v15  ;;  %v8404_v29 = vcombine.low %v638_v17, %v646_v18  ;;  %v350_v31 = vld [vmem:[%s13467_s1 + $0x208] sm:$0xff] }
  0x44   : > { %v469_v35 = vld [vmem:[%s13467_s1 + $0x5c0] sm:$0xff]  ;;  %3464 = vmatpush2.bf16.msra.mxu0 %v8242_v38  ;;  %v358_v32 = vld [vmem:[%s13467_s1 + $0x248] sm:$0xff] }
  0x45   : > { %v717_v36 = vld [vmem:[%s13467_s1 + $0xd80] sm:$0xff]  ;;  %v8227_v40 = vcombine.high %v461_v34, %v469_v35  ;;  %3504 = vmatprep.subr.bf16.mxu1 %v8499_v33  ;;  %v8226_v46 = vcombine.low %v461_v34, %v469_v35  ;;  %v606_v33 = vld [vmem:[%s13467_s1 + $0xa08] sm:$0xff]  ;;  %v8389_v34 = vcombine.high %v622_v26, %v630_v27  ;;  %v8117_v38 = vcombine.high %v350_v31, %v358_v32 }
  0x46   : > { %v725_v37 = vld [vmem:[%s13467_s1 + $0xdc0] sm:$0xff]  ;;  %3505 = vmatpush2.bf16.msra.mxu1 %v8498_v39  ;;  %v614_v35 = vld [vmem:[%s13467_s1 + $0xa48] sm:$0xff] }
  0x47   : > { %v8483_v41 = vcombine.high %v717_v36, %v725_v37  ;;  %v445_v42 = vld [vmem:[%s13467_s1 + $0x500] sm:$0xff]  ;;  %3465 = vmatprep.subr.bf16.mxu0 %v8227_v40  ;;  %v8482_v47 = vcombine.low %v717_v36, %v725_v37  ;;  %v8132_v36 = vcombine.low %v366_v23, %v374_v24  ;;  %v8388_v37 = vcombine.low %v622_v26, %v630_v27  ;;  %v334_v39 = vld [vmem:[%s13467_s1 + $0x188] sm:$0xff] }
  0x48   : > { %v453_v43 = vld [vmem:[%s13467_s1 + $0x540] sm:$0xff]  ;;  %3466 = vmatpush2.bf16.msra.mxu0 %v8226_v46  ;;  %v342_v40 = vld [vmem:[%s13467_s1 + $0x1c8] sm:$0xff] }
  0x49   : > { %v701_v44 = vld [vmem:[%s13467_s1 + $0xd00] sm:$0xff]  ;;  %v8211_v48 = vcombine.high %v445_v42, %v453_v43  ;;  %3506 = vmatprep.subr.bf16.mxu1 %v8483_v41  ;;  %v8210_v54 = vcombine.low %v445_v42, %v453_v43  ;;  %v590_v41 = vld [vmem:[%s13467_s1 + $0x988] sm:$0xff]  ;;  %v8373_v42 = vcombine.high %v606_v33, %v614_v35  ;;  %v8101_v46 = vcombine.high %v334_v39, %v342_v40 }
  0x4a   : > { %v709_v45 = vld [vmem:[%s13467_s1 + $0xd40] sm:$0xff]  ;;  %3507 = vmatpush2.bf16.msra.mxu1 %v8482_v47  ;;  %v598_v43 = vld [vmem:[%s13467_s1 + $0x9c8] sm:$0xff] }
  0x4b   : > { %v8467_v49 = vcombine.high %v701_v44, %v709_v45  ;;  %v429_v50 = vld [vmem:[%s13467_s1 + $0x480] sm:$0xff]  ;;  %3467 = vmatprep.subr.bf16.mxu0 %v8211_v48  ;;  %v8466_v55 = vcombine.low %v701_v44, %v709_v45  ;;  %v8116_v44 = vcombine.low %v350_v31, %v358_v32  ;;  %v8372_v45 = vcombine.low %v606_v33, %v614_v35  ;;  %v318_v47 = vld [vmem:[%s13467_s1 + $0x108] sm:$0xff] }
  0x4c   : > { %v437_v51 = vld [vmem:[%s13467_s1 + $0x4c0] sm:$0xff]  ;;  %3468 = vmatpush2.bf16.msra.mxu0 %v8210_v54  ;;  %v326_v48 = vld [vmem:[%s13467_s1 + $0x148] sm:$0xff] }
  0x4d   : > { %v685_v52 = vld [vmem:[%s13467_s1 + $0xc80] sm:$0xff]  ;;  %v8195_v56 = vcombine.high %v429_v50, %v437_v51  ;;  %3508 = vmatprep.subr.bf16.mxu1 %v8467_v49  ;;  %v8194_v0 = vcombine.low %v429_v50, %v437_v51  ;;  %v574_v49 = vld [vmem:[%s13467_s1 + $0x908] sm:$0xff]  ;;  %v8357_v50 = vcombine.high %v590_v41, %v598_v43  ;;  %v8085_v54 = vcombine.high %v318_v47, %v326_v48 }
  0x4e   : > { %v693_v53 = vld [vmem:[%s13467_s1 + $0xcc0] sm:$0xff]  ;;  %3509 = vmatpush2.bf16.msra.mxu1 %v8466_v55  ;;  %v582_v51 = vld [vmem:[%s13467_s1 + $0x948] sm:$0xff] }
  0x4f   : > { %v8451_v57 = vcombine.high %v685_v52, %v693_v53  ;;  %v413_v60 = vld [vmem:[%s13467_s1 + $0x400] sm:$0xff]  ;;  %3469 = vmatprep.subr.bf16.mxu0 %v8195_v56  ;;  %v8450_v1 = vcombine.low %v685_v52, %v693_v53  ;;  %v8100_v52 = vcombine.low %v334_v39, %v342_v40  ;;  %v8356_v53 = vcombine.low %v590_v41, %v598_v43  ;;  %v302_v55 = vld [vmem:[%s13467_s1 + $0x88] sm:$0xff] }
  0x50   : > { %v421_v61 = vld [vmem:[%s13467_s1 + $0x440] sm:$0xff]  ;;  %3470 = vmatpush2.bf16.msra.mxu0 %v8194_v0  ;;  %v310_v56 = vld [vmem:[%s13467_s1 + $0xc8] sm:$0xff] }
  0x51   : > { %v669_v62 = vld [vmem:[%s13467_s1 + $0xc00] sm:$0xff]  ;;  %v8179_v2 = vcombine.high %v413_v60, %v421_v61  ;;  %3510 = vmatprep.subr.bf16.mxu1 %v8451_v57  ;;  %v8178_v8 = vcombine.low %v413_v60, %v421_v61  ;;  %v558_v57 = vld [vmem:[%s13467_s1 + $0x888] sm:$0xff]  ;;  %v8341_v60 = vcombine.high %v574_v49, %v582_v51  ;;  %v8069_v0 = vcombine.high %v302_v55, %v310_v56 }
  0x52   : > { %v677_v63 = vld [vmem:[%s13467_s1 + $0xc40] sm:$0xff]  ;;  %3511 = vmatpush2.bf16.msra.mxu1 %v8450_v1  ;;  %v566_v61 = vld [vmem:[%s13467_s1 + $0x8c8] sm:$0xff]  ;;  %v8068_v6 = vcombine.low %v302_v55, %v310_v56 }
  0x53   : > { %v8435_v3 = vcombine.high %v669_v62, %v677_v63  ;;  %v277_v9 = vld [vmem:[%s10131_s8] sm:$0xff]  ;;  %3471 = vmatprep.subr.bf16.mxu0 %v8179_v2  ;;  %v8434_v10 = vcombine.low %v669_v62, %v677_v63  ;;  %v8084_v62 = vcombine.low %v318_v47, %v326_v48  ;;  %v8340_v63 = vcombine.low %v574_v49, %v582_v51  ;;  %v286_v1 = vld [vmem:[%s13467_s1 + $0x8] sm:$0xff] }
  0x54   : > { %v10275_v16 = vpack.c.bf16 %v277_v9, %v277_v9  ;;  %3472 = vmatpush2.bf16.msra.mxu0 %v8178_v8  ;;  %v294_v2 = vld [vmem:[%s13467_s1 + $0x48] sm:$0xff]  ;;  %v8325_v4 = vcombine.high %v558_v57, %v566_v61  ;;  %v8324_v7 = vcombine.low %v558_v57, %v566_v61 }
  0x55   : > { %3512 = vmatprep.subr.bf16.mxu1 %v8435_v3  ;;  %3523 = vmatprep.subr.bf16.mxu0 %v8165_v12  ;;  %v542_v3 = vld [vmem:[%s13467_s1 + $0x808] sm:$0xff]  ;;  %v8053_v8 = vcombine.high %v286_v1, %v294_v2  ;;  %v8052_v14 = vcombine.low %v286_v1, %v294_v2 }
  0x56   : > { %3513 = vmatpush2.bf16.msra.mxu1 %v8434_v10  ;;  %v550_v5 = vld [vmem:[%s13467_s1 + $0x848] sm:$0xff] }
  0x57   : > { %3564 = vmatprep.subr.bf16.mxu1 %v8421_v13  ;;  %3474 = vmatmul.mubr.bf16.vlgmr.msra.gmra.mxu0 %v10275_v16  ;;  %v526_v9 = vld [vmem:[%s13467_s1 + $0x788] sm:$0xff]  ;;  %v8309_v12 = vcombine.high %v542_v3, %v550_v5  ;;  %v8308_v15 = vcombine.low %v542_v3, %v550_v5 }
  0x58   : > { %3524 = vmatpush1.bf16.msra.mxu0 %v8164_v20  ;;  %3555 = vmatprep.mubr.bf16.mxu0 %v10147_v58  ;;  %v534_v10 = vld [vmem:[%s13467_s1 + $0x7c8] sm:$0xff] }
  0x59   : > { %3515 = vmatmul.mubr.bf16.vlgmr.msra.gmra.mxu1 %v10283_v19  ;;  %3525 = vmatprep.subr.bf16.mxu0 %v8149_v22  ;;  %v782_v11 = vld [vmem:[%s13467_s1 + $0xf88] sm:$0xff]  ;;  %v8293_v17 = vcombine.high %v526_v9, %v534_v10  ;;  %v8292_v24 = vcombine.low %v526_v9, %v534_v10 }
  0x5a   : > { %3565 = vmatpush1.bf16.msra.mxu1 %v8420_v21  ;;  %3596 = vmatprep.mubr.bf16.mxu1 %v10149_v59  ;;  %v790_v13 = vld [vmem:[%s13467_s1 + $0xfc8] sm:$0xff] }
  0x5b   : > { %3566 = vmatprep.subr.bf16.mxu1 %v8405_v25  ;;  %v510_v18 = vld [vmem:[%s13467_s1 + $0x708] sm:$0xff]  ;;  %v8549_v22 = vcombine.high %v782_v11, %v790_v13  ;;  %v8548_v25 = vcombine.low %v782_v11, %v790_v13  ;;  %v399_v13 = vld [vmem:[%s13467_s1 + $0x390] sm:$0xff] }
  0x5c   : > { %3526 = vmatpush1.bf16.msra.mxu0 %v8148_v28  ;;  %v518_v20 = vld [vmem:[%s13467_s1 + $0x748] sm:$0xff] }
  0x5d   : > { %3527 = vmatprep.subr.bf16.mxu0 %v8133_v30  ;;  %v766_v21 = vld [vmem:[%s13467_s1 + $0xf08] sm:$0xff]  ;;  %v8277_v26 = vcombine.high %v510_v18, %v518_v20  ;;  %v8276_v32 = vcombine.low %v510_v18, %v518_v20  ;;  %v663_v18 = vld [vmem:[%s13467_s1 + $0xbd0] sm:$0xff] }
  0x5e   : > { %3567 = vmatpush1.bf16.msra.mxu1 %v8404_v29  ;;  %v774_v23 = vld [vmem:[%s13467_s1 + $0xf48] sm:$0xff] }
  0x5f   : > { %3568 = vmatprep.subr.bf16.mxu1 %v8389_v34  ;;  %v494_v27 = vld [vmem:[%s13467_s1 + $0x688] sm:$0xff]  ;;  %v8533_v30 = vcombine.high %v766_v21, %v774_v23  ;;  %v8532_v33 = vcombine.low %v766_v21, %v774_v23  ;;  %v383_v23 = vld [vmem:[%s13467_s1 + $0x310] sm:$0xff] }
  0x60   : > { %3528 = vmatpush1.bf16.msra.mxu0 %v8132_v36  ;;  %v502_v28 = vld [vmem:[%s13467_s1 + $0x6c8] sm:$0xff] }
  0x61   : > { %3529 = vmatprep.subr.bf16.mxu0 %v8117_v38  ;;  %v750_v29 = vld [vmem:[%s13467_s1 + $0xe88] sm:$0xff]  ;;  %v8261_v34 = vcombine.high %v494_v27, %v502_v28  ;;  %v8260_v40 = vcombine.low %v494_v27, %v502_v28  ;;  %v647_v27 = vld [vmem:[%s13467_s1 + $0xb50] sm:$0xff] }
  0x62   : > { %3569 = vmatpush1.bf16.msra.mxu1 %v8388_v37  ;;  %v758_v31 = vld [vmem:[%s13467_s1 + $0xec8] sm:$0xff] }
  0x63   : > { %3570 = vmatprep.subr.bf16.mxu1 %v8373_v42  ;;  %v478_v35 = vld [vmem:[%s13467_s1 + $0x608] sm:$0xff]  ;;  %v8517_v38 = vcombine.high %v750_v29, %v758_v31  ;;  %v8516_v41 = vcombine.low %v750_v29, %v758_v31  ;;  %v367_v31 = vld [vmem:[%s13467_s1 + $0x290] sm:$0xff] }
  0x64   : > { %3530 = vmatpush1.bf16.msra.mxu0 %v8116_v44  ;;  %v486_v36 = vld [vmem:[%s13467_s1 + $0x648] sm:$0xff] }
  0x65   : > { %3531 = vmatprep.subr.bf16.mxu0 %v8101_v46  ;;  %v734_v37 = vld [vmem:[%s13467_s1 + $0xe08] sm:$0xff]  ;;  %v8245_v42 = vcombine.high %v478_v35, %v486_v36  ;;  %v8244_v48 = vcombine.low %v478_v35, %v486_v36  ;;  %v631_v35 = vld [vmem:[%s13467_s1 + $0xad0] sm:$0xff] }
  0x66   : > { %3571 = vmatpush1.bf16.msra.mxu1 %v8372_v45  ;;  %v742_v39 = vld [vmem:[%s13467_s1 + $0xe48] sm:$0xff] }
  0x67   : > { %3572 = vmatprep.subr.bf16.mxu1 %v8357_v50  ;;  %v462_v43 = vld [vmem:[%s13467_s1 + $0x588] sm:$0xff]  ;;  %v8501_v46 = vcombine.high %v734_v37, %v742_v39  ;;  %v8500_v49 = vcombine.low %v734_v37, %v742_v39  ;;  %v351_v39 = vld [vmem:[%s13467_s1 + $0x210] sm:$0xff] }
  0x68   : > { %3532 = vmatpush1.bf16.msra.mxu0 %v8100_v52  ;;  %v470_v44 = vld [vmem:[%s13467_s1 + $0x5c8] sm:$0xff] }
  0x69   : > { %3533 = vmatprep.subr.bf16.mxu0 %v8085_v54  ;;  %v718_v45 = vld [vmem:[%s13467_s1 + $0xd88] sm:$0xff]  ;;  %v8229_v50 = vcombine.high %v462_v43, %v470_v44  ;;  %v8228_v56 = vcombine.low %v462_v43, %v470_v44  ;;  %v615_v43 = vld [vmem:[%s13467_s1 + $0xa50] sm:$0xff] }
  0x6a   : > { %3573 = vmatpush1.bf16.msra.mxu1 %v8356_v53  ;;  %v726_v47 = vld [vmem:[%s13467_s1 + $0xdc8] sm:$0xff] }
  0x6b   : > { %3574 = vmatprep.subr.bf16.mxu1 %v8341_v60  ;;  %v446_v51 = vld [vmem:[%s13467_s1 + $0x508] sm:$0xff]  ;;  %v8485_v54 = vcombine.high %v718_v45, %v726_v47  ;;  %v8484_v57 = vcombine.low %v718_v45, %v726_v47  ;;  %v335_v47 = vld [vmem:[%s13467_s1 + $0x190] sm:$0xff] }
  0x6c   : > { %3534 = vmatpush1.bf16.msra.mxu0 %v8084_v62  ;;  %v454_v52 = vld [vmem:[%s13467_s1 + $0x548] sm:$0xff] }
  0x6d   : > { %3535 = vmatprep.subr.bf16.mxu0 %v8069_v0  ;;  %v702_v53 = vld [vmem:[%s13467_s1 + $0xd08] sm:$0xff]  ;;  %v8213_v60 = vcombine.high %v446_v51, %v454_v52  ;;  %v8212_v2 = vcombine.low %v446_v51, %v454_v52  ;;  %v599_v51 = vld [vmem:[%s13467_s1 + $0x9d0] sm:$0xff] }
  0x6e   : > { %3575 = vmatpush1.bf16.msra.mxu1 %v8340_v63  ;;  %v710_v55 = vld [vmem:[%s13467_s1 + $0xd48] sm:$0xff] }
  0x6f   : > { %3576 = vmatprep.subr.bf16.mxu1 %v8325_v4  ;;  %v430_v61 = vld [vmem:[%s13467_s1 + $0x488] sm:$0xff]  ;;  %v8469_v0 = vcombine.high %v702_v53, %v710_v55  ;;  %v8468_v3 = vcombine.low %v702_v53, %v710_v55  ;;  %v319_v55 = vld [vmem:[%s13467_s1 + $0x110] sm:$0xff] }
  0x70   : > { %3536 = vmatpush1.bf16.msra.mxu0 %v8068_v6  ;;  %v438_v62 = vld [vmem:[%s13467_s1 + $0x4c8] sm:$0xff] }
  0x71   : > { %3537 = vmatprep.subr.bf16.mxu0 %v8053_v8  ;;  %v686_v63 = vld [vmem:[%s13467_s1 + $0xc88] sm:$0xff]  ;;  %v8197_v4 = vcombine.high %v430_v61, %v438_v62  ;;  %v8196_v10 = vcombine.low %v430_v61, %v438_v62  ;;  %v583_v61 = vld [vmem:[%s13467_s1 + $0x950] sm:$0xff] }
  0x72   : > { %3577 = vmatpush1.bf16.msra.mxu1 %v8324_v7  ;;  %v694_v1 = vld [vmem:[%s13467_s1 + $0xcc8] sm:$0xff] }
  0x73   : > { %3578 = vmatprep.subr.bf16.mxu1 %v8309_v12  ;;  %v414_v5 = vld [vmem:[%s13467_s1 + $0x408] sm:$0xff]  ;;  %v8453_v8 = vcombine.high %v686_v63, %v694_v1  ;;  %v8452_v11 = vcombine.low %v686_v63, %v694_v1  ;;  %v303_v1 = vld [vmem:[%s13467_s1 + $0x90] sm:$0xff] }
  0x74   : > { %3538 = vmatpush1.bf16.msra.mxu0 %v8052_v14  ;;  %v422_v6 = vld [vmem:[%s13467_s1 + $0x448] sm:$0xff]  ;;  %v407_v14 = vld [vmem:[%s13467_s1 + $0x3d0] sm:$0xff] }
  0x75   : > { %3539 = vmatprep.subr.bf16.mxu0 %v8293_v17  ;;  %v670_v7 = vld [vmem:[%s13467_s1 + $0xc08] sm:$0xff]  ;;  %v8181_v12 = vcombine.high %v414_v5, %v422_v6  ;;  %v8180_v20 = vcombine.low %v414_v5, %v422_v6  ;;  %v8166_v28 = vcombine.low %v399_v13, %v407_v14  ;;  %v567_v5 = vld [vmem:[%s13467_s1 + $0x8d0] sm:$0xff] }
  0x76   : > { %3579 = vmatpush1.bf16.msra.mxu1 %v8308_v15  ;;  %v678_v9 = vld [vmem:[%s13467_s1 + $0xc48] sm:$0xff]  ;;  %v655_v15 = vld [vmem:[%s13467_s1 + $0xb90] sm:$0xff] }
  0x77   : > { %3580 = vmatprep.subr.bf16.mxu1 %v8549_v22  ;;  %v8437_v17 = vcombine.high %v670_v7, %v678_v9  ;;  %v8436_v21 = vcombine.low %v670_v7, %v678_v9  ;;  %v8167_v22 = vcombine.high %v399_v13, %v407_v14  ;;  %v8422_v29 = vcombine.low %v655_v15, %v663_v18  ;;  %v287_v9 = vld [vmem:[%s13467_s1 + $0x10] sm:$0xff] }
  0x78   : > { %3540 = vmatpush2.bf16.msra.mxu0 %v8292_v24  ;;  %v391_v24 = vld [vmem:[%s13467_s1 + $0x350] sm:$0xff] }
  0x79   : > { %3541 = vmatprep.subr.bf16.mxu0 %v8277_v26  ;;  %v8423_v26 = vcombine.high %v655_v15, %v663_v18  ;;  %v8150_v36 = vcombine.low %v383_v23, %v391_v24  ;;  %v551_v13 = vld [vmem:[%s13467_s1 + $0x850] sm:$0xff] }
  0x7a   : > { %3581 = vmatpush2.bf16.msra.mxu1 %v8548_v25  ;;  %v639_v25 = vld [vmem:[%s13467_s1 + $0xb10] sm:$0xff] }
  0x7b   : > { %3582 = vmatprep.subr.bf16.mxu1 %v8533_v30  ;;  %v8151_v30 = vcombine.high %v383_v23, %v391_v24  ;;  %v8406_v37 = vcombine.low %v639_v25, %v647_v27  ;;  %v527_v18 = vld [vmem:[%s13467_s1 + $0x790] sm:$0xff] }
  0x7c   : > { %3542 = vmatpush2.bf16.msra.mxu0 %v8276_v32  ;;  %v375_v32 = vld [vmem:[%s13467_s1 + $0x2d0] sm:$0xff] }
  0x7d   : > { %3543 = vmatprep.subr.bf16.mxu0 %v8261_v34  ;;  %v623_v34 = vld [vmem:[%s13467_s1 + $0xa90] sm:$0xff]  ;;  %v8134_v44 = vcombine.low %v367_v31, %v375_v32 }
  0x7e   : > { %3583 = vmatpush2.bf16.msra.mxu1 %v8532_v33  ;;  %v8407_v33 = vcombine.high %v639_v25, %v647_v27  ;;  %v8390_v45 = vcombine.low %v623_v34, %v631_v35  ;;  %v791_v23 = vld [vmem:[%s13467_s1 + $0xfd0] sm:$0xff] }
  0x7f   : > { %3584 = vmatprep.subr.bf16.mxu1 %v8517_v38  ;;  %v8135_v38 = vcombine.high %v367_v31, %v375_v32  ;;  %v511_v27 = vld [vmem:[%s13467_s1 + $0x710] sm:$0xff] }
  0x80   : > { %3544 = vmatpush2.bf16.msra.mxu0 %v8260_v40  ;;  %v359_v40 = vld [vmem:[%s13467_s1 + $0x250] sm:$0xff] }
  0x81   : > { %3545 = vmatprep.subr.bf16.mxu0 %v8245_v42  ;;  %v8391_v42 = vcombine.high %v623_v34, %v631_v35  ;;  %v8118_v52 = vcombine.low %v351_v39, %v359_v40  ;;  %v775_v31 = vld [vmem:[%s13467_s1 + $0xf50] sm:$0xff] }
  0x82   : > { %3585 = vmatpush2.bf16.msra.mxu1 %v8516_v41  ;;  %v607_v41 = vld [vmem:[%s13467_s1 + $0xa10] sm:$0xff] }
  0x83   : > { %3586 = vmatprep.subr.bf16.mxu1 %v8501_v46  ;;  %v8119_v46 = vcombine.high %v351_v39, %v359_v40  ;;  %v8374_v53 = vcombine.low %v607_v41, %v615_v43  ;;  %v495_v35 = vld [vmem:[%s13467_s1 + $0x690] sm:$0xff] }
  0x84   : > { %3546 = vmatpush2.bf16.msra.mxu0 %v8244_v48  ;;  %v343_v48 = vld [vmem:[%s13467_s1 + $0x1d0] sm:$0xff] }
  0x85   : > { %3547 = vmatprep.subr.bf16.mxu0 %v8229_v50  ;;  %v8375_v50 = vcombine.high %v607_v41, %v615_v43  ;;  %v8102_v62 = vcombine.low %v335_v47, %v343_v48  ;;  %v759_v39 = vld [vmem:[%s13467_s1 + $0xed0] sm:$0xff] }
  0x86   : > { %3587 = vmatpush2.bf16.msra.mxu1 %v8500_v49  ;;  %v591_v49 = vld [vmem:[%s13467_s1 + $0x990] sm:$0xff] }
  0x87   : > { %3588 = vmatprep.subr.bf16.mxu1 %v8485_v54  ;;  %v8103_v54 = vcombine.high %v335_v47, %v343_v48  ;;  %v8358_v63 = vcombine.low %v591_v49, %v599_v51  ;;  %v479_v43 = vld [vmem:[%s13467_s1 + $0x610] sm:$0xff] }
  0x88   : > { %3548 = vmatpush2.bf16.msra.mxu0 %v8228_v56  ;;  %v327_v56 = vld [vmem:[%s13467_s1 + $0x150] sm:$0xff] }
  0x89   : > { %3549 = vmatprep.subr.bf16.mxu0 %v8213_v60  ;;  %v8359_v60 = vcombine.high %v591_v49, %v599_v51  ;;  %v8086_v6 = vcombine.low %v319_v55, %v327_v56  ;;  %v743_v47 = vld [vmem:[%s13467_s1 + $0xe50] sm:$0xff] }
  0x8a   : > { %3589 = vmatpush2.bf16.msra.mxu1 %v8484_v57  ;;  %v575_v57 = vld [vmem:[%s13467_s1 + $0x910] sm:$0xff] }
  0x8b   : > { %3590 = vmatprep.subr.bf16.mxu1 %v8469_v0  ;;  %v8087_v0 = vcombine.high %v319_v55, %v327_v56  ;;  %v8342_v7 = vcombine.low %v575_v57, %v583_v61  ;;  %v463_v51 = vld [vmem:[%s13467_s1 + $0x590] sm:$0xff] }
  0x8c   : > { %3550 = vmatpush2.bf16.msra.mxu0 %v8212_v2  ;;  %v311_v2 = vld [vmem:[%s13467_s1 + $0xd0] sm:$0xff] }
  0x8d   : > { %3551 = vmatprep.subr.bf16.mxu0 %v8197_v4  ;;  %v8343_v4 = vcombine.high %v575_v57, %v583_v61  ;;  %v8070_v14 = vcombine.low %v303_v1, %v311_v2  ;;  %v727_v55 = vld [vmem:[%s13467_s1 + $0xdd0] sm:$0xff] }
  0x8e   : > { %3591 = vmatpush2.bf16.msra.mxu1 %v8468_v3  ;;  %v559_v3 = vld [vmem:[%s13467_s1 + $0x890] sm:$0xff] }
  0x8f   : > { %3592 = vmatprep.subr.bf16.mxu1 %v8453_v8  ;;  %v8071_v8 = vcombine.high %v303_v1, %v311_v2  ;;  %v8326_v15 = vcombine.low %v559_v3, %v567_v5  ;;  %v447_v61 = vld [vmem:[%s13467_s1 + $0x510] sm:$0xff] }
  0x90   : > { %3552 = vmatpush2.bf16.msra.mxu0 %v8196_v10  ;;  %v295_v10 = vld [vmem:[%s13467_s1 + $0x50] sm:$0xff] }
  0x91   : > { %3553 = vmatprep.subr.bf16.mxu0 %v8181_v12  ;;  %v8327_v12 = vcombine.high %v559_v3, %v567_v5  ;;  %v8054_v24 = vcombine.low %v287_v9, %v295_v10  ;;  %v711_v1 = vld [vmem:[%s13467_s1 + $0xd50] sm:$0xff] }
  0x92   : > { %3593 = vmatpush2.bf16.msra.mxu1 %v8452_v11  ;;  %v543_v11 = vld [vmem:[%s13467_s1 + $0x810] sm:$0xff] }
  0x93   : > { %3594 = vmatprep.subr.bf16.mxu1 %v8437_v17  ;;  %v8055_v17 = vcombine.high %v287_v9, %v295_v10  ;;  %v8310_v25 = vcombine.low %v543_v11, %v551_v13  ;;  %v431_v5 = vld [vmem:[%s13467_s1 + $0x490] sm:$0xff] }
  0x94   : > { %3554 = vmatpush2.bf16.msra.mxu0 %v8180_v20  ;;  %v535_v20 = vld [vmem:[%s13467_s1 + $0x7d0] sm:$0xff] }
  0x95   : > { %3605 = vmatprep.subr.bf16.mxu0 %v8167_v22  ;;  %v8311_v22 = vcombine.high %v543_v11, %v551_v13  ;;  %v8294_v32 = vcombine.low %v527_v18, %v535_v20  ;;  %v695_v9 = vld [vmem:[%s13467_s1 + $0xcd0] sm:$0xff] }
  0x96   : > { %3595 = vmatpush2.bf16.msra.mxu1 %v8436_v21  ;;  %v783_v21 = vld [vmem:[%s13467_s1 + $0xf90] sm:$0xff] }
  0x97   : > { %3646 = vmatprep.subr.bf16.mxu1 %v8423_v26  ;;  %3556 = vmatmul.mubr.bf16.vlgmr.msra.gmra.mxu0 %v10275_v16  ;;  %v8295_v26 = vcombine.high %v527_v18, %v535_v20  ;;  %v415_v13 = vld [vmem:[%s13467_s1 + $0x410] sm:$0xff] }
  0x98   : > { %3606 = vmatpush1.bf16.msra.mxu0 %v8166_v28  ;;  %3637 = vmatprep.mubr.bf16.mxu0 %v10147_v58  ;;  %v519_v28 = vld [vmem:[%s13467_s1 + $0x750] sm:$0xff] }
  0x99   : > { %3597 = vmatmul.mubr.bf16.vlgmr.msra.gmra.mxu1 %v10283_v19  ;;  %3607 = vmatprep.subr.bf16.mxu0 %v8151_v30  ;;  %v8551_v30 = vcombine.high %v783_v21, %v791_v23  ;;  %v8279_v34 = vcombine.high %v511_v27, %v519_v28  ;;  %v8278_v40 = vcombine.low %v511_v27, %v519_v28  ;;  %v679_v18 = vld [vmem:[%s13467_s1 + $0xc50] sm:$0xff]  ;;  %v664_v27 = vld [vmem:[%s13467_s1 + $0xbd8] sm:$0xff] }
  0x9a   : > { %3647 = vmatpush1.bf16.msra.mxu1 %v8422_v29  ;;  %3678 = vmatprep.mubr.bf16.mxu1 %v10149_v59  ;;  %v767_v29 = vld [vmem:[%s13467_s1 + $0xf10] sm:$0xff] }
  0x9b   : > { %3648 = vmatprep.subr.bf16.mxu1 %v8407_v33  ;;  %v8550_v33 = vcombine.low %v783_v21, %v791_v23  ;;  %v8534_v41 = vcombine.low %v767_v29, %v775_v31  ;;  %v400_v23 = vld [vmem:[%s13467_s1 + $0x398] sm:$0xff] }
  0x9c   : > { %3608 = vmatpush1.bf16.msra.mxu0 %v8150_v36  ;;  %v503_v36 = vld [vmem:[%s13467_s1 + $0x6d0] sm:$0xff] }
  0x9d   : > { %3609 = vmatprep.subr.bf16.mxu0 %v8135_v38  ;;  %v8535_v38 = vcombine.high %v767_v29, %v775_v31  ;;  %v8262_v48 = vcombine.low %v495_v35, %v503_v36  ;;  %v384_v31 = vld [vmem:[%s13467_s1 + $0x318] sm:$0xff] }
  0x9e   : > { %3649 = vmatpush1.bf16.msra.mxu1 %v8406_v37  ;;  %v751_v37 = vld [vmem:[%s13467_s1 + $0xe90] sm:$0xff] }
  0x9f   : > { %3650 = vmatprep.subr.bf16.mxu1 %v8391_v42  ;;  %v8263_v42 = vcombine.high %v495_v35, %v503_v36  ;;  %v8518_v49 = vcombine.low %v751_v37, %v759_v39  ;;  %v648_v35 = vld [vmem:[%s13467_s1 + $0xb58] sm:$0xff] }
  0xa0   : > { %3610 = vmatpush1.bf16.msra.mxu0 %v8134_v44  ;;  %v487_v44 = vld [vmem:[%s13467_s1 + $0x650] sm:$0xff] }
  0xa1   : > { %3611 = vmatprep.subr.bf16.mxu0 %v8119_v46  ;;  %v8519_v46 = vcombine.high %v751_v37, %v759_v39  ;;  %v8246_v56 = vcombine.low %v479_v43, %v487_v44  ;;  %v368_v39 = vld [vmem:[%s13467_s1 + $0x298] sm:$0xff] }
  0xa2   : > { %3651 = vmatpush1.bf16.msra.mxu1 %v8390_v45  ;;  %v735_v45 = vld [vmem:[%s13467_s1 + $0xe10] sm:$0xff] }
  0xa3   : > { %3652 = vmatprep.subr.bf16.mxu1 %v8375_v50  ;;  %v8247_v50 = vcombine.high %v479_v43, %v487_v44  ;;  %v8502_v57 = vcombine.low %v735_v45, %v743_v47  ;;  %v632_v43 = vld [vmem:[%s13467_s1 + $0xad8] sm:$0xff] }
  0xa4   : > { %3612 = vmatpush1.bf16.msra.mxu0 %v8118_v52  ;;  %v471_v52 = vld [vmem:[%s13467_s1 + $0x5d0] sm:$0xff] }
  0xa5   : > { %3613 = vmatprep.subr.bf16.mxu0 %v8103_v54  ;;  %v8503_v54 = vcombine.high %v735_v45, %v743_v47  ;;  %v8230_v2 = vcombine.low %v463_v51, %v471_v52  ;;  %v352_v47 = vld [vmem:[%s13467_s1 + $0x218] sm:$0xff] }
  0xa6   : > { %3653 = vmatpush1.bf16.msra.mxu1 %v8374_v53  ;;  %v719_v53 = vld [vmem:[%s13467_s1 + $0xd90] sm:$0xff] }
  0xa7   : > { %3654 = vmatprep.subr.bf16.mxu1 %v8359_v60  ;;  %v8231_v60 = vcombine.high %v463_v51, %v471_v52  ;;  %v8486_v3 = vcombine.low %v719_v53, %v727_v55  ;;  %v616_v51 = vld [vmem:[%s13467_s1 + $0xa58] sm:$0xff] }
  0xa8   : > { %3614 = vmatpush1.bf16.msra.mxu0 %v8102_v62  ;;  %v455_v62 = vld [vmem:[%s13467_s1 + $0x550] sm:$0xff] }
  0xa9   : > { %3615 = vmatprep.subr.bf16.mxu0 %v8087_v0  ;;  %v8487_v0 = vcombine.high %v719_v53, %v727_v55  ;;  %v8214_v10 = vcombine.low %v447_v61, %v455_v62  ;;  %v336_v55 = vld [vmem:[%s13467_s1 + $0x198] sm:$0xff] }
  0xaa   : > { %3655 = vmatpush1.bf16.msra.mxu1 %v8358_v63  ;;  %v703_v63 = vld [vmem:[%s13467_s1 + $0xd10] sm:$0xff] }
  0xab   : > { %3656 = vmatprep.subr.bf16.mxu1 %v8343_v4  ;;  %v8215_v4 = vcombine.high %v447_v61, %v455_v62  ;;  %v8470_v11 = vcombine.low %v703_v63, %v711_v1  ;;  %v600_v61 = vld [vmem:[%s13467_s1 + $0x9d8] sm:$0xff] }
  0xac   : > { %3616 = vmatpush1.bf16.msra.mxu0 %v8086_v6  ;;  %v439_v6 = vld [vmem:[%s13467_s1 + $0x4d0] sm:$0xff] }
  0xad   : > { %3617 = vmatprep.subr.bf16.mxu0 %v8071_v8  ;;  %v8471_v8 = vcombine.high %v703_v63, %v711_v1  ;;  %v8198_v20 = vcombine.low %v431_v5, %v439_v6  ;;  %v320_v1 = vld [vmem:[%s13467_s1 + $0x118] sm:$0xff] }
  0xae   : > { %3657 = vmatpush1.bf16.msra.mxu1 %v8342_v7  ;;  %v687_v7 = vld [vmem:[%s13467_s1 + $0xc90] sm:$0xff] }
  0xaf   : > { %3658 = vmatprep.subr.bf16.mxu1 %v8327_v12  ;;  %v8199_v12 = vcombine.high %v431_v5, %v439_v6  ;;  %v8454_v21 = vcombine.low %v687_v7, %v695_v9  ;;  %v584_v5 = vld [vmem:[%s13467_s1 + $0x958] sm:$0xff] }
  0xb0   : > { %3618 = vmatpush1.bf16.msra.mxu0 %v8070_v14  ;;  %v423_v14 = vld [vmem:[%s13467_s1 + $0x450] sm:$0xff] }
  0xb1   : > { %3619 = vmatprep.subr.bf16.mxu0 %v8055_v17  ;;  %v8455_v17 = vcombine.high %v687_v7, %v695_v9  ;;  %v8182_v28 = vcombine.low %v415_v13, %v423_v14  ;;  %v304_v9 = vld [vmem:[%s13467_s1 + $0x98] sm:$0xff] }
  0xb2   : > { %3659 = vmatpush1.bf16.msra.mxu1 %v8326_v15  ;;  %v671_v15 = vld [vmem:[%s13467_s1 + $0xc10] sm:$0xff] }
  0xb3   : > { %3660 = vmatprep.subr.bf16.mxu1 %v8311_v22  ;;  %v8183_v22 = vcombine.high %v415_v13, %v423_v14  ;;  %v8438_v29 = vcombine.low %v671_v15, %v679_v18  ;;  %v568_v13 = vld [vmem:[%s13467_s1 + $0x8d8] sm:$0xff] }
  0xb4   : > { %3620 = vmatpush1.bf16.msra.mxu0 %v8054_v24  ;;  %v408_v24 = vld [vmem:[%s13467_s1 + $0x3d8] sm:$0xff] }
  0xb5   : > { %3621 = vmatprep.subr.bf16.mxu0 %v8295_v26  ;;  %v8439_v26 = vcombine.high %v671_v15, %v679_v18  ;;  %v8168_v36 = vcombine.low %v400_v23, %v408_v24  ;;  %v288_v18 = vld [vmem:[%s13467_s1 + $0x18] sm:$0xff] }
  0xb6   : > { %3661 = vmatpush1.bf16.msra.mxu1 %v8310_v25  ;;  %v656_v25 = vld [vmem:[%s13467_s1 + $0xb98] sm:$0xff] }
  0xb7   : > { %3662 = vmatprep.subr.bf16.mxu1 %v8551_v30  ;;  %v8169_v30 = vcombine.high %v400_v23, %v408_v24  ;;  %v8424_v37 = vcombine.low %v656_v25, %v664_v27  ;;  %v552_v23 = vld [vmem:[%s13467_s1 + $0x858] sm:$0xff] }
  0xb8   : > { %3622 = vmatpush2.bf16.msra.mxu0 %v8294_v32  ;;  %v392_v32 = vld [vmem:[%s13467_s1 + $0x358] sm:$0xff] }
  0xb9   : > { %3623 = vmatprep.subr.bf16.mxu0 %v8279_v34  ;;  %v8425_v34 = vcombine.high %v656_v25, %v664_v27  ;;  %v8152_v44 = vcombine.low %v384_v31, %v392_v32  ;;  %v528_v27 = vld [vmem:[%s13467_s1 + $0x798] sm:$0xff] }
  0xba   : > { %3663 = vmatpush2.bf16.msra.mxu1 %v8550_v33  ;;  %v640_v33 = vld [vmem:[%s13467_s1 + $0xb18] sm:$0xff] }
  0xbb   : > { %3664 = vmatprep.subr.bf16.mxu1 %v8535_v38  ;;  %v8153_v38 = vcombine.high %v384_v31, %v392_v32  ;;  %v8408_v45 = vcombine.low %v640_v33, %v648_v35  ;;  %v792_v31 = vld [vmem:[%s13467_s1 + $0xfd8] sm:$0xff] }
  0xbc   : > { %3624 = vmatpush2.bf16.msra.mxu0 %v8278_v40  ;;  %v376_v40 = vld [vmem:[%s13467_s1 + $0x2d8] sm:$0xff] }
  0xbd   : > { %3625 = vmatprep.subr.bf16.mxu0 %v8263_v42  ;;  %v8409_v42 = vcombine.high %v640_v33, %v648_v35  ;;  %v8136_v52 = vcombine.low %v368_v39, %v376_v40  ;;  %v512_v35 = vld [vmem:[%s13467_s1 + $0x718] sm:$0xff] }
  0xbe   : > { %3665 = vmatpush2.bf16.msra.mxu1 %v8534_v41  ;;  %v624_v41 = vld [vmem:[%s13467_s1 + $0xa98] sm:$0xff] }
  0xbf   : > { %3666 = vmatprep.subr.bf16.mxu1 %v8519_v46  ;;  %v8137_v46 = vcombine.high %v368_v39, %v376_v40  ;;  %v8392_v53 = vcombine.low %v624_v41, %v632_v43  ;;  %v776_v39 = vld [vmem:[%s13467_s1 + $0xf58] sm:$0xff] }
  0xc0   : > { %3626 = vmatpush2.bf16.msra.mxu0 %v8262_v48  ;;  %v360_v48 = vld [vmem:[%s13467_s1 + $0x258] sm:$0xff] }
  0xc1   : > { %3627 = vmatprep.subr.bf16.mxu0 %v8247_v50  ;;  %v8393_v50 = vcombine.high %v624_v41, %v632_v43  ;;  %v8120_v62 = vcombine.low %v352_v47, %v360_v48  ;;  %v496_v43 = vld [vmem:[%s13467_s1 + $0x698] sm:$0xff] }
  0xc2   : > { %3667 = vmatpush2.bf16.msra.mxu1 %v8518_v49  ;;  %v608_v49 = vld [vmem:[%s13467_s1 + $0xa18] sm:$0xff] }
  0xc3   : > { %3668 = vmatprep.subr.bf16.mxu1 %v8503_v54  ;;  %v8121_v54 = vcombine.high %v352_v47, %v360_v48  ;;  %v8376_v63 = vcombine.low %v608_v49, %v616_v51  ;;  %v760_v47 = vld [vmem:[%s13467_s1 + $0xed8] sm:$0xff] }
  0xc4   : > { %3628 = vmatpush2.bf16.msra.mxu0 %v8246_v56  ;;  %v344_v56 = vld [vmem:[%s13467_s1 + $0x1d8] sm:$0xff] }
  0xc5   : > { %3629 = vmatprep.subr.bf16.mxu0 %v8231_v60  ;;  %v8377_v60 = vcombine.high %v608_v49, %v616_v51  ;;  %v8104_v6 = vcombine.low %v336_v55, %v344_v56  ;;  %v480_v51 = vld [vmem:[%s13467_s1 + $0x618] sm:$0xff] }
  0xc6   : > { %3669 = vmatpush2.bf16.msra.mxu1 %v8502_v57  ;;  %v592_v57 = vld [vmem:[%s13467_s1 + $0x998] sm:$0xff] }
  0xc7   : > { %3670 = vmatprep.subr.bf16.mxu1 %v8487_v0  ;;  %v8105_v0 = vcombine.high %v336_v55, %v344_v56  ;;  %v8360_v7 = vcombine.low %v592_v57, %v600_v61  ;;  %v744_v55 = vld [vmem:[%s13467_s1 + $0xe58] sm:$0xff] }
  0xc8   : > { %3630 = vmatpush2.bf16.msra.mxu0 %v8230_v2  ;;  %v328_v2 = vld [vmem:[%s13467_s1 + $0x158] sm:$0xff] }
  0xc9   : > { %3631 = vmatprep.subr.bf16.mxu0 %v8215_v4  ;;  %v8361_v4 = vcombine.high %v592_v57, %v600_v61  ;;  %v8088_v14 = vcombine.low %v320_v1, %v328_v2  ;;  %v464_v61 = vld [vmem:[%s13467_s1 + $0x598] sm:$0xff] }
  0xca   : > { %3671 = vmatpush2.bf16.msra.mxu1 %v8486_v3  ;;  %v576_v3 = vld [vmem:[%s13467_s1 + $0x918] sm:$0xff] }
  0xcb   : > { %3672 = vmatprep.subr.bf16.mxu1 %v8471_v8  ;;  %v8089_v8 = vcombine.high %v320_v1, %v328_v2  ;;  %v8344_v15 = vcombine.low %v576_v3, %v584_v5  ;;  %v728_v1 = vld [vmem:[%s13467_s1 + $0xdd8] sm:$0xff] }
  0xcc   : > { %3632 = vmatpush2.bf16.msra.mxu0 %v8214_v10  ;;  %v312_v10 = vld [vmem:[%s13467_s1 + $0xd8] sm:$0xff] }
  0xcd   : > { %3633 = vmatprep.subr.bf16.mxu0 %v8199_v12  ;;  %v8345_v12 = vcombine.high %v576_v3, %v584_v5  ;;  %v8072_v24 = vcombine.low %v304_v9, %v312_v10  ;;  %v448_v5 = vld [vmem:[%s13467_s1 + $0x518] sm:$0xff] }
  0xce   : > { %3673 = vmatpush2.bf16.msra.mxu1 %v8470_v11  ;;  %v560_v11 = vld [vmem:[%s13467_s1 + $0x898] sm:$0xff] }
  0xcf   : > { %3674 = vmatprep.subr.bf16.mxu1 %v8455_v17  ;;  %v8073_v17 = vcombine.high %v304_v9, %v312_v10  ;;  %v8328_v25 = vcombine.low %v560_v11, %v568_v13  ;;  %v712_v9 = vld [vmem:[%s13467_s1 + $0xd58] sm:$0xff] }
  0xd0   : > { %3634 = vmatpush2.bf16.msra.mxu0 %v8198_v20  ;;  %v296_v20 = vld [vmem:[%s13467_s1 + $0x58] sm:$0xff] }
  0xd1   : > { %3635 = vmatprep.subr.bf16.mxu0 %v8183_v22  ;;  %v8329_v22 = vcombine.high %v560_v11, %v568_v13  ;;  %v8056_v32 = vcombine.low %v288_v18, %v296_v20  ;;  %v432_v13 = vld [vmem:[%s13467_s1 + $0x498] sm:$0xff] }
  0xd2   : > { %3675 = vmatpush2.bf16.msra.mxu1 %v8454_v21  ;;  %v544_v21 = vld [vmem:[%s13467_s1 + $0x818] sm:$0xff] }
  0xd3   : > { %3676 = vmatprep.subr.bf16.mxu1 %v8439_v26  ;;  %v8057_v26 = vcombine.high %v288_v18, %v296_v20  ;;  %v8312_v33 = vcombine.low %v544_v21, %v552_v23  ;;  %v696_v18 = vld [vmem:[%s13467_s1 + $0xcd8] sm:$0xff] }
  0xd4   : > { %3636 = vmatpush2.bf16.msra.mxu0 %v8182_v28  ;;  %v536_v28 = vld [vmem:[%s13467_s1 + $0x7d8] sm:$0xff] }
  0xd5   : > { %3687 = vmatprep.subr.bf16.mxu0 %v8169_v30  ;;  %v8313_v30 = vcombine.high %v544_v21, %v552_v23  ;;  %v8296_v40 = vcombine.low %v528_v27, %v536_v28  ;;  %v801_v21 = vlaneseq }
  0xd6   : > { %3677 = vmatpush2.bf16.msra.mxu1 %v8438_v29  ;;  %v784_v29 = vld [vmem:[%s13467_s1 + $0xf98] sm:$0xff] }
  0xd7   : > { %3728 = vmatprep.subr.bf16.mxu1 %v8425_v34  ;;  %3638 = vmatmul.mubr.bf16.vlgmr.msra.gmra.mxu0 %v10275_v16  ;;  %v8297_v34 = vcombine.high %v528_v27, %v536_v28  ;;  %v8552_v41 = vcombine.low %v784_v29, %v792_v31  ;;  %v680_v28 = vld [vmem:[%s13467_s1 + $0xc58] sm:$0xff] }
  0xd8   : > { %3688 = vmatpush1.bf16.msra.mxu0 %v8168_v36  ;;  %3719 = vmatprep.mubr.bf16.mxu0 %v10147_v58  ;;  %v520_v36 = vld [vmem:[%s13467_s1 + $0x758] sm:$0xff] }
  0xd9   : > { %3679 = vmatmul.mubr.bf16.vlgmr.msra.gmra.mxu1 %v10283_v19  ;;  %3689 = vmatprep.subr.bf16.mxu0 %v8153_v38  ;;  %v8553_v38 = vcombine.high %v784_v29, %v792_v31  ;;  %v8280_v48 = vcombine.low %v512_v35, %v520_v36 }
  0xda   : > { %3729 = vmatpush1.bf16.msra.mxu1 %v8424_v37  ;;  %3760 = vmatprep.mubr.bf16.mxu1 %v10149_v59  ;;  %v768_v37 = vld [vmem:[%s13467_s1 + $0xf18] sm:$0xff] }
  0xdb   : > { %3730 = vmatprep.subr.bf16.mxu1 %v8409_v42  ;;  %v8281_v42 = vcombine.high %v512_v35, %v520_v36  ;;  %v8536_v49 = vcombine.low %v768_v37, %v776_v39  ;;  %v657_v35 = vld [vmem:[%s13467_s1 + $0xba0] sm:$0xff] }
  0xdc   : > { %3690 = vmatpush1.bf16.msra.mxu0 %v8152_v44  ;;  %v504_v44 = vld [vmem:[%s13467_s1 + $0x6d8] sm:$0xff] }
  0xdd   : > { %3691 = vmatprep.subr.bf16.mxu0 %v8137_v46  ;;  %v8537_v46 = vcombine.high %v768_v37, %v776_v39  ;;  %v8264_v56 = vcombine.low %v496_v43, %v504_v44  ;;  %v665_v37 = vld [vmem:[%s13467_s1 + $0xbe0] sm:$0xff] }
  0xde   : > { %3731 = vmatpush1.bf16.msra.mxu1 %v8408_v45  ;;  %v752_v45 = vld [vmem:[%s13467_s1 + $0xe98] sm:$0xff] }
  0xdf   : > { %3732 = vmatprep.subr.bf16.mxu1 %v8393_v50  ;;  %v8265_v50 = vcombine.high %v496_v43, %v504_v44  ;;  %v8520_v57 = vcombine.low %v752_v45, %v760_v47  ;;  %v385_v43 = vld [vmem:[%s13467_s1 + $0x320] sm:$0xff] }
  0xe0   : > { %3692 = vmatpush1.bf16.msra.mxu0 %v8136_v52  ;;  %v488_v52 = vld [vmem:[%s13467_s1 + $0x658] sm:$0xff]  ;;  %v393_v44 = vld [vmem:[%s13467_s1 + $0x360] sm:$0xff] }
  0xe1   : > { %3693 = vmatprep.subr.bf16.mxu0 %v8121_v54  ;;  %v8521_v54 = vcombine.high %v752_v45, %v760_v47  ;;  %v8248_v2 = vcombine.low %v480_v51, %v488_v52  ;;  %v641_v45 = vld [vmem:[%s13467_s1 + $0xb20] sm:$0xff] }
  0xe2   : > { %3733 = vmatpush1.bf16.msra.mxu1 %v8392_v53  ;;  %v736_v53 = vld [vmem:[%s13467_s1 + $0xe18] sm:$0xff] }
  0xe3   : > { %3734 = vmatprep.subr.bf16.mxu1 %v8377_v60  ;;  %v8249_v60 = vcombine.high %v480_v51, %v488_v52  ;;  %v8504_v3 = vcombine.low %v736_v53, %v744_v55  ;;  %v8426_v51 = vcombine.low %v657_v35, %v665_v37  ;;  %v8155_v52 = vcombine.high %v385_v43, %v393_v44 }
  0xe4   : > { %3694 = vmatpush1.bf16.msra.mxu0 %v8120_v62  ;;  %v472_v62 = vld [vmem:[%s13467_s1 + $0x5d8] sm:$0xff] }
  0xe5   : > { %3695 = vmatprep.subr.bf16.mxu0 %v8105_v0  ;;  %v8505_v0 = vcombine.high %v736_v53, %v744_v55  ;;  %v8232_v10 = vcombine.low %v464_v61, %v472_v62  ;;  %v369_v53 = vld [vmem:[%s13467_s1 + $0x2a0] sm:$0xff] }
  0xe6   : > { %3735 = vmatpush1.bf16.msra.mxu1 %v8376_v63  ;;  %v720_v63 = vld [vmem:[%s13467_s1 + $0xd98] sm:$0xff]  ;;  %v625_v55 = vld [vmem:[%s13467_s1 + $0xaa0] sm:$0xff] }
  0xe7   : > { %3736 = vmatprep.subr.bf16.mxu1 %v8361_v4  ;;  %v8233_v4 = vcombine.high %v464_v61, %v472_v62  ;;  %v8488_v11 = vcombine.low %v720_v63, %v728_v1 }
  0xe8   : > { %3696 = vmatpush1.bf16.msra.mxu0 %v8104_v6  ;;  %v456_v6 = vld [vmem:[%s13467_s1 + $0x558] sm:$0xff] }
  0xe9   : > { %3697 = vmatprep.subr.bf16.mxu0 %v8089_v8  ;;  %v8489_v8 = vcombine.high %v720_v63, %v728_v1  ;;  %v8216_v20 = vcombine.low %v448_v5, %v456_v6 }
  0xea   : > { %3737 = vmatpush1.bf16.msra.mxu1 %v8360_v7  ;;  %v704_v7 = vld [vmem:[%s13467_s1 + $0xd18] sm:$0xff] }
  0xeb   : > { %3738 = vmatprep.subr.bf16.mxu1 %v8345_v12  ;;  %v8217_v12 = vcombine.high %v448_v5, %v456_v6  ;;  %v361_v5 = vld [vmem:[%s13467_s1 + $0x260] sm:$0xff] }
  0xec   : > { %3698 = vmatpush1.bf16.msra.mxu0 %v8088_v14  ;;  %v440_v14 = vld [vmem:[%s13467_s1 + $0x4d8] sm:$0xff]  ;;  %v609_v6 = vld [vmem:[%s13467_s1 + $0xa20] sm:$0xff] }
  0xed   : > { %3699 = vmatprep.subr.bf16.mxu0 %v8073_v17  ;;  %v8473_v17 = vcombine.high %v704_v7, %v712_v9  ;;  %v8201_v23 = vcombine.high %v432_v13, %v440_v14  ;;  %v8200_v29 = vcombine.low %v432_v13, %v440_v14 }
  0xee   : > { %3739 = vmatpush1.bf16.msra.mxu1 %v8344_v15  ;;  %v688_v15 = vld [vmem:[%s13467_s1 + $0xc98] sm:$0xff] }
  0xef   : > { %3740 = vmatprep.subr.bf16.mxu1 %v8329_v22  ;;  %v8472_v22 = vcombine.low %v704_v7, %v712_v9  ;;  %v8457_v27 = vcombine.high %v688_v15, %v696_v18  ;;  %v8456_v31 = vcombine.low %v688_v15, %v696_v18 }
  0xf0   : > { %3700 = vmatpush1.bf16.msra.mxu0 %v8072_v24  ;;  %v416_v24 = vld [vmem:[%s13467_s1 + $0x418] sm:$0xff] }
  0xf1   : > { %3701 = vmatprep.subr.bf16.mxu0 %v8057_v26  ;;  %v672_v26 = vld [vmem:[%s13467_s1 + $0xc18] sm:$0xff] }
  0xf2   : > { %3741 = vmatpush1.bf16.msra.mxu1 %v8328_v25  ;;  %v424_v25 = vld [vmem:[%s13467_s1 + $0x458] sm:$0xff]  ;;  %v8441_v36 = vcombine.high %v672_v26, %v680_v28 }
  0xf3   : > { %3742 = vmatprep.subr.bf16.mxu1 %v8313_v30  ;;  %v10849_v30 = vshrl.u32 %v801_v21, 7  ;;  %v8184_v39 = vcombine.low %v416_v24, %v424_v25  ;;  %v337_v21 = vld [vmem:[%s13467_s1 + $0x1a0] sm:$0xff] }
  0xf4   : > { %3702 = vmatpush1.bf16.msra.mxu0 %v8056_v32  ;;  %v8185_v32 = vcombine.high %v416_v24, %v424_v25 }
  0xf5   : > { %3703 = vmatprep.subr.bf16.mxu0 %v8297_v34  ;;  %v409_v34 = vld [vmem:[%s13467_s1 + $0x3e0] sm:$0xff]  ;;  %v10881_v47 = vsub.s32 1, %v10849_v30 }
  0xf6   : > { %3743 = vmatpush1.bf16.msra.mxu1 %v8312_v33  ;;  %v401_v33 = vld [vmem:[%s13467_s1 + $0x3a0] sm:$0xff] }
  0xf7   : > { %3744 = vmatprep.subr.bf16.mxu1 %v8553_v38  ;;  %v10866_v38 = vld [vmem:[%s13468_s2] sm:$0xff] }
  0xf8   : > { %3704 = vmatpush2.bf16.msra.mxu0 %v8296_v40  ;;  %v10869_v40 = vsub.s32 0, %v10849_v30 }
  0xf9   : > { %3705 = vmatprep.subr.bf16.mxu0 %v8281_v42  ;;  %v8171_v42 = vcombine.high %v401_v33, %v409_v34 }
  0xfa   : > { %3745 = vmatpush2.bf16.msra.mxu1 %v8552_v41  ;;  %v8440_v41 = vcombine.low %v672_v26, %v680_v28  ;;  %v601_v26 = vld [vmem:[%s13467_s1 + $0x9e0] sm:$0xff] }
  0xfb   : > { %3746 = vmatprep.subr.bf16.mxu1 %v8537_v46  ;;  %v8427_v46 = vcombine.high %v657_v35, %v665_v37  ;;  %v585_v35 = vld [vmem:[%s13467_s1 + $0x960] sm:$0xff] }
  0xfc   : > { %3706 = vmatpush2.bf16.msra.mxu0 %v8280_v48  ;;  %v649_v48 = vld [vmem:[%s13467_s1 + $0xb60] sm:$0xff] }
  0xfd   : > { %3707 = vmatprep.subr.bf16.mxu0 %v8265_v50  ;;  %v8170_v50 = vcombine.low %v401_v33, %v409_v34  ;;  %v577_v33 = vld [vmem:[%s13467_s1 + $0x920] sm:$0xff] }
  0xfe   : > { %3747 = vmatpush2.bf16.msra.mxu1 %v8536_v49  ;;  %v804_v49 = vrot.slane %v10866_v38, %v10869_v40 }
  0xff   : > { %3748 = vmatprep.subr.bf16.mxu1 %v8521_v54  ;;  %v377_v54 = vld [vmem:[%s13467_s1 + $0x2e0] sm:$0xff] }
 0x100   : > { %3708 = vmatpush2.bf16.msra.mxu0 %v8264_v56  ;;  %v808_v56 = vrot.slane %v10866_v38, %v10881_v47  ;;  %v8138_v15 = vcombine.low %v369_v53, %v377_v54 }
 0x101   : > { %3709 = vmatprep.subr.bf16.mxu0 %v8249_v60  ;;  %v633_v60 = vld [vmem:[%s13467_s1 + $0xae0] sm:$0xff] }
 0x102   : > { %3749 = vmatpush2.bf16.msra.mxu1 %v8520_v57  ;;  %v8411_v57 = vcombine.high %v641_v45, %v649_v48  ;;  %v8394_v18 = vcombine.low %v625_v55, %v633_v60 }
 0x103   : > { %3750 = vmatprep.subr.bf16.mxu1 %v8505_v0  ;;  %v8154_v0 = vcombine.low %v385_v43, %v393_v44  ;;  %v561_v43 = vld [vmem:[%s13467_s1 + $0x8a0] sm:$0xff]  ;;  %v8347_v44 = vcombine.high %v577_v33, %v585_v35 }
 0x104   : > { %3710 = vmatpush2.bf16.msra.mxu0 %v8248_v2  ;;  %v8410_v2 = vcombine.low %v641_v45, %v649_v48  ;;  %v569_v45 = vld [vmem:[%s13467_s1 + $0x8e0] sm:$0xff]  ;;  %v8346_v48 = vcombine.low %v577_v33, %v585_v35 }
 0x105   : > { %3711 = vmatprep.subr.bf16.mxu0 %v8233_v4  ;;  %v353_v4 = vld [vmem:[%s13467_s1 + $0x220] sm:$0xff] }
 0x106   : > { %3751 = vmatpush2.bf16.msra.mxu1 %v8504_v3  ;;  %v8139_v3 = vcombine.high %v369_v53, %v377_v54  ;;  %v8331_v53 = vcombine.high %v561_v43, %v569_v45  ;;  %v553_v54 = vld [vmem:[%s13467_s1 + $0x860] sm:$0xff] }
 0x107   : > { %3752 = vmatprep.subr.bf16.mxu1 %v8489_v8  ;;  %v465_v33 = vld [vmem:[%s13467_s1 + $0x5a0] sm:$0xff] }
 0x108   : > { %3712 = vmatpush2.bf16.msra.mxu0 %v8232_v10  ;;  %v8395_v10 = vcombine.high %v625_v55, %v633_v60  ;;  %v529_v60 = vld [vmem:[%s13467_s1 + $0x7a0] sm:$0xff] }
 0x109   : > { %3713 = vmatprep.subr.bf16.mxu0 %v8217_v12  ;;  %v721_v35 = vld [vmem:[%s13467_s1 + $0xda0] sm:$0xff] }
 0x10a   : > { %3753 = vmatpush2.bf16.msra.mxu1 %v8488_v11  ;;  %v617_v11 = vld [vmem:[%s13467_s1 + $0xa60] sm:$0xff] }
 0x10b   : > { %3754 = vmatprep.subr.bf16.mxu1 %v8473_v17  ;;  %v8379_v25 = vcombine.high %v609_v6, %v617_v11  ;;  %v8378_v28 = vcombine.low %v609_v6, %v617_v11  ;;  %v769_v6 = vld [vmem:[%s13467_s1 + $0xf20] sm:$0xff] }
 0x10c   : > { %3714 = vmatpush2.bf16.msra.mxu0 %v8216_v20  ;;  %v8123_v20 = vcombine.high %v353_v4, %v361_v5 }
 0x10d   : > { %3715 = vmatprep.subr.bf16.mxu0 %v8201_v23  ;;  %v593_v23 = vld [vmem:[%s13467_s1 + $0x9a0] sm:$0xff] }
 0x10e   : > { %3755 = vmatpush2.bf16.msra.mxu1 %v8472_v22  ;;  %v345_v22 = vld [vmem:[%s13467_s1 + $0x1e0] sm:$0xff]  ;;  %v8363_v34 = vcombine.high %v593_v23, %v601_v26  ;;  %v8362_v37 = vcombine.low %v593_v23, %v601_v26 }
 0x10f   : > { %3756 = vmatprep.subr.bf16.mxu1 %v8457_v27  ;;  %v8122_v27 = vcombine.low %v353_v4, %v361_v5  ;;  %v513_v4 = vld [vmem:[%s13467_s1 + $0x720] sm:$0xff] }
 0x110   : > { %3716 = vmatpush2.bf16.msra.mxu0 %v8200_v29  ;;  %v8107_v29 = vcombine.high %v337_v21, %v345_v22  ;;  %v521_v5 = vld [vmem:[%s13467_s1 + $0x760] sm:$0xff] }
 0x111   : > { %3717 = vmatprep.subr.bf16.mxu0 %v8185_v32  ;;  %v329_v32 = vld [vmem:[%s13467_s1 + $0x160] sm:$0xff] }
 0x112   : > { %3757 = vmatpush2.bf16.msra.mxu1 %v8456_v31  ;;  %v321_v31 = vld [vmem:[%s13467_s1 + $0x120] sm:$0xff] }
 0x113   : > { %3758 = vmatprep.subr.bf16.mxu1 %v8441_v36  ;;  %v8106_v36 = vcombine.low %v337_v21, %v345_v22  ;;  %v8282_v21 = vcombine.low %v513_v4, %v521_v5  ;;  %v737_v26 = vld [vmem:[%s13467_s1 + $0xe20] sm:$0xff] }
 0x114   : > { %3718 = vmatpush2.bf16.msra.mxu0 %v8184_v39  ;;  %v8091_v39 = vcombine.high %v321_v31, %v329_v32 }
 0x115   : > { %3769 = vmatprep.subr.bf16.mxu0 %v8171_v42  ;;  %v313_v42 = vld [vmem:[%s13467_s1 + $0xe0] sm:$0xff] }
 0x116   : > { %3759 = vmatpush2.bf16.msra.mxu1 %v8440_v41  ;;  %v305_v41 = vld [vmem:[%s13467_s1 + $0xa0] sm:$0xff] }
 0x117   : > { %3810 = vmatprep.subr.bf16.mxu1 %v8427_v46  ;;  %v3475_v61 = vpop.f32.mrf.mxu0  ;;  %3720 = vmatmul.mubr.bf16.vlgmr.msra.gmra.mxu0 %v10275_v16  ;;  %v8090_v46 = vcombine.low %v321_v31, %v329_v32  ;;  %v8074_v55 = vcombine.low %v305_v41, %v313_v42 }
 0x118   : > { %v3476_v62 = vadd.f32 %v3475_v61, %v804_v49  ;;  %3770 = vmatpush1.bf16.msra.mxu0 %v8170_v50  ;;  %3801 = vmatprep.mubr.bf16.mxu0 %v10147_v58  ;;  %v8075_v49 = vcombine.high %v305_v41, %v313_v42  ;;  %v289_v50 = vld [vmem:[%s13467_s1 + $0x20] sm:$0xff] }
 0x119   : > { %v3516_v63 = vpop.f32.mrf.mxu1  ;;  %3761 = vmatmul.mubr.bf16.vlgmr.msra.gmra.mxu1 %v10283_v19  ;;  %v3477_v1 = vpop.f32.mrf.mxu0  ;;  %3771 = vmatprep.subr.bf16.mxu0 %v8155_v52  ;;  %v545_v52 = vld [vmem:[%s13467_s1 + $0x820] sm:$0xff] }
 0x11a   : > { %3811 = vmatpush1.bf16.msra.mxu1 %v8426_v51  ;;  %v10913_v7 = vadd.f32 %v3516_v63, %v3476_v62  ;;  %v3478_v8 = vadd.f32 %v3477_v1, %v808_v56  ;;  %3842 = vmatprep.mubr.bf16.mxu1 %v10149_v59  ;;  %v297_v51 = vld [vmem:[%s13467_s1 + $0x60] sm:$0xff]  ;;  %v8330_v56 = vcombine.low %v561_v43, %v569_v45 }
 0x11b   : > { %v3518_v9 = vpop.f32.mrf.mxu1  ;;  %3812 = vmatprep.subr.bf16.mxu1 %v8411_v57  ;;  %v3479_v12 = vpop.f32.mrf.mxu0  ;;  %v8059_v57 = vcombine.high %v289_v50, %v297_v51  ;;  %v537_v61 = vld [vmem:[%s13467_s1 + $0x7e0] sm:$0xff]  ;;  %v8315_v63 = vcombine.high %v545_v52, %v553_v54  ;;  %v8058_v1 = vcombine.low %v289_v50, %v297_v51 }
 0x11c   : > { %v10920_v13 = vadd.f32 %v3518_v9, %v3478_v8  ;;  %3772 = vmatpush1.bf16.msra.mxu0 %v8154_v0  ;;  %v785_v62 = vld [vmem:[%s13467_s1 + $0xfa0] sm:$0xff]  ;;  %v8283_v12 = vcombine.high %v513_v4, %v521_v5 }
 0x11d   : > { %v3520_v14 = vpop.f32.mrf.mxu1  ;;  %v3480_v17 = vpop.f32.mrf.mxu0  ;;  %3773 = vmatprep.subr.bf16.mxu0 %v8139_v3  ;;  %v793_v0 = vld [vmem:[%s13467_s1 + $0xfe0] sm:$0xff]  ;;  %v8299_v3 = vcombine.high %v529_v60, %v537_v61 }
 0x11e   : > { %3813 = vmatpush1.bf16.msra.mxu1 %v8410_v2  ;;  %v8314_v2 = vcombine.low %v545_v52, %v553_v54  ;;  %v8555_v8 = vcombine.high %v785_v62, %v793_v0  ;;  %v777_v9 = vld [vmem:[%s13467_s1 + $0xf60] sm:$0xff]  ;;  %v8554_v11 = vcombine.low %v785_v62, %v793_v0 }
 0x11f   : > { %v3521_v24 = vpop.f32.mrf.mxu1  ;;  %3814 = vmatprep.subr.bf16.mxu1 %v8395_v10  ;;  %v8298_v10 = vcombine.low %v529_v60, %v537_v61  ;;  %v497_v14 = vld [vmem:[%s13467_s1 + $0x6a0] sm:$0xff]  ;;  %v8538_v22 = vcombine.low %v769_v6, %v777_v9 }
 0x120   : > { %3774 = vmatpush1.bf16.msra.mxu0 %v8138_v15  ;;  %v505_v15 = vld [vmem:[%s13467_s1 + $0x6e0] sm:$0xff] }
 0x121   : > { %3775 = vmatprep.subr.bf16.mxu0 %v8123_v20  ;;  %v753_v17 = vld [vmem:[%s13467_s1 + $0xea0] sm:$0xff]  ;;  %v8267_v23 = vcombine.high %v497_v14, %v505_v15 }
 0x122   : > { %3815 = vmatpush1.bf16.msra.mxu1 %v8394_v18  ;;  %v8539_v18 = vcombine.high %v769_v6, %v777_v9  ;;  %v761_v20 = vld [vmem:[%s13467_s1 + $0xee0] sm:$0xff]  ;;  %v402_v6 = vld [vmem:[%s13467_s1 + $0x3a8] sm:$0xff] }
 0x123   : > { %3816 = vmatprep.subr.bf16.mxu1 %v8379_v25  ;;  %v481_v24 = vld [vmem:[%s13467_s1 + $0x620] sm:$0xff]  ;;  %v8522_v31 = vcombine.low %v753_v17, %v761_v20  ;;  %v658_v9 = vld [vmem:[%s13467_s1 + $0xba8] sm:$0xff] }
 0x124   : > { %3776 = vmatpush1.bf16.msra.mxu0 %v8122_v27  ;;  %v489_v25 = vld [vmem:[%s13467_s1 + $0x660] sm:$0xff]  ;;  %v8523_v27 = vcombine.high %v753_v17, %v761_v20  ;;  %v394_v20 = vld [vmem:[%s13467_s1 + $0x368] sm:$0xff] }
 0x125   : > { %3777 = vmatprep.subr.bf16.mxu0 %v8107_v29  ;;  %v8266_v29 = vcombine.low %v497_v14, %v505_v15  ;;  %v8251_v32 = vcombine.high %v481_v24, %v489_v25  ;;  %v449_v43 = vld [vmem:[%s13467_s1 + $0x520] sm:$0xff]  ;;  %v11079_v14 = vsub.s32 2, %v10849_v30 }
 0x126   : > { %3817 = vmatpush1.bf16.msra.mxu1 %v8378_v28  ;;  %v745_v28 = vld [vmem:[%s13467_s1 + $0xe60] sm:$0xff] }
 0x127   : > { %3818 = vmatprep.subr.bf16.mxu1 %v8363_v34  ;;  %v473_v34 = vld [vmem:[%s13467_s1 + $0x5e0] sm:$0xff]  ;;  %v8506_v41 = vcombine.low %v737_v26, %v745_v28 }
 0x128   : > { %3778 = vmatpush1.bf16.msra.mxu0 %v8106_v36  ;;  %v8507_v36 = vcombine.high %v737_v26, %v745_v28  ;;  %v8235_v42 = vcombine.high %v465_v33, %v473_v34  ;;  %v705_v45 = vld [vmem:[%s13467_s1 + $0xd20] sm:$0xff] }
 0x129   : > { %3779 = vmatprep.subr.bf16.mxu0 %v8091_v39  ;;  %v8250_v39 = vcombine.low %v481_v24, %v489_v25  ;;  %v433_v52 = vld [vmem:[%s13467_s1 + $0x4a0] sm:$0xff]  ;;  %v650_v24 = vld [vmem:[%s13467_s1 + $0xb68] sm:$0xff]  ;;  %v812_v25 = vrot.slane %v10866_v38, %v11079_v14 }
 0x12a   : > { %3819 = vmatpush1.bf16.msra.mxu1 %v8362_v37  ;;  %v729_v37 = vld [vmem:[%s13467_s1 + $0xde0] sm:$0xff] }
 0x12b   : > { %3820 = vmatprep.subr.bf16.mxu1 %v8347_v44  ;;  %v457_v44 = vld [vmem:[%s13467_s1 + $0x560] sm:$0xff]  ;;  %v8490_v50 = vcombine.low %v721_v35, %v729_v37 }
 0x12c   : > { %3780 = vmatpush1.bf16.msra.mxu0 %v8090_v46  ;;  %v8491_v46 = vcombine.high %v721_v35, %v729_v37  ;;  %v8219_v51 = vcombine.high %v449_v43, %v457_v44  ;;  %v689_v54 = vld [vmem:[%s13467_s1 + $0xca0] sm:$0xff]  ;;  %v626_v35 = vld [vmem:[%s13467_s1 + $0xaa8] sm:$0xff] }
 0x12d   : > { %3781 = vmatprep.subr.bf16.mxu0 %v8075_v49  ;;  %v8234_v49 = vcombine.low %v465_v33, %v473_v34  ;;  %v417_v62 = vld [vmem:[%s13467_s1 + $0x420] sm:$0xff]  ;;  %v378_v33 = vld [vmem:[%s13467_s1 + $0x2e8] sm:$0xff] }
 0x12e   : > { %3821 = vmatpush1.bf16.msra.mxu1 %v8346_v48  ;;  %v713_v48 = vld [vmem:[%s13467_s1 + $0xd60] sm:$0xff] }
 0x12f   : > { %3822 = vmatprep.subr.bf16.mxu1 %v8331_v53  ;;  %v441_v53 = vld [vmem:[%s13467_s1 + $0x4e0] sm:$0xff]  ;;  %v8474_v60 = vcombine.low %v705_v45, %v713_v48 }
 0x130   : > { %3782 = vmatpush1.bf16.msra.mxu0 %v8074_v55  ;;  %v8475_v55 = vcombine.high %v705_v45, %v713_v48  ;;  %v8203_v61 = vcombine.high %v433_v52, %v441_v53  ;;  %v673_v0 = vld [vmem:[%s13467_s1 + $0xc20] sm:$0xff] }
 0x131   : > { %3783 = vmatprep.subr.bf16.mxu0 %v8059_v57  ;;  %v8218_v57 = vcombine.low %v449_v43, %v457_v44 }
 0x132   : > { %3823 = vmatpush1.bf16.msra.mxu1 %v8330_v56  ;;  %v697_v56 = vld [vmem:[%s13467_s1 + $0xce0] sm:$0xff] }
 0x133   : > { %3824 = vmatprep.subr.bf16.mxu1 %v8315_v63  ;;  %v425_v63 = vld [vmem:[%s13467_s1 + $0x460] sm:$0xff]  ;;  %v8458_v4 = vcombine.low %v689_v54, %v697_v56 }
 0x134   : > { %3784 = vmatpush1.bf16.msra.mxu0 %v8058_v1  ;;  %v8459_v1 = vcombine.high %v689_v54, %v697_v56  ;;  %v8187_v5 = vcombine.high %v417_v62, %v425_v63 }
 0x135   : > { %3785 = vmatprep.subr.bf16.mxu0 %v8299_v3  ;;  %v8202_v3 = vcombine.low %v433_v52, %v441_v53  ;;  %v610_v52 = vld [vmem:[%s13467_s1 + $0xa28] sm:$0xff] }
 0x136   : > { %3825 = vmatpush1.bf16.msra.mxu1 %v8314_v2  ;;  %v681_v2 = vld [vmem:[%s13467_s1 + $0xc60] sm:$0xff]  ;;  %v618_v53 = vld [vmem:[%s13467_s1 + $0xa68] sm:$0xff] }
 0x137   : > { %3826 = vmatprep.subr.bf16.mxu1 %v8555_v8  ;;  %v410_v8 = vld [vmem:[%s13467_s1 + $0x3e8] sm:$0xff]  ;;  %v8442_v15 = vcombine.low %v673_v0, %v681_v2 }
 0x138   : > { %3786 = vmatpush2.bf16.msra.mxu0 %v8298_v10  ;;  %v8443_v10 = vcombine.high %v673_v0, %v681_v2  ;;  %v8173_v17 = vcombine.high %v402_v6, %v410_v8  ;;  %v8172_v26 = vcombine.low %v402_v6, %v410_v8  ;;  %v338_v0 = vld [vmem:[%s13467_s1 + $0x1a8] sm:$0xff] }
 0x139   : > { %3787 = vmatprep.subr.bf16.mxu0 %v8283_v12  ;;  %v8186_v12 = vcombine.low %v417_v62, %v425_v63  ;;  %v8381_v63 = vcombine.high %v610_v52, %v618_v53  ;;  %v594_v2 = vld [vmem:[%s13467_s1 + $0x9a8] sm:$0xff] }
 0x13a   : > { %3827 = vmatpush2.bf16.msra.mxu1 %v8554_v11  ;;  %v666_v11 = vld [vmem:[%s13467_s1 + $0xbe8] sm:$0xff] }
 0x13b   : > { %3828 = vmatprep.subr.bf16.mxu1 %v8539_v18  ;;  %v386_v18 = vld [vmem:[%s13467_s1 + $0x328] sm:$0xff] }
 0x13c   : > { %3788 = vmatpush2.bf16.msra.mxu0 %v8282_v21  ;;  %v642_v21 = vld [vmem:[%s13467_s1 + $0xb28] sm:$0xff]  ;;  %v8157_v28 = vcombine.high %v386_v18, %v394_v20 }
 0x13d   : > { %3789 = vmatprep.subr.bf16.mxu0 %v8267_v23  ;;  %v11091_v23 = vsub.s32 3, %v10849_v30 }
 0x13e   : > { %3829 = vmatpush2.bf16.msra.mxu1 %v8538_v22  ;;  %v8429_v22 = vcombine.high %v658_v9, %v666_v11 }
 0x13f   : > { %3830 = vmatprep.subr.bf16.mxu1 %v8523_v27  ;;  %v8428_v27 = vcombine.low %v658_v9, %v666_v11  ;;  %v322_v9 = vld [vmem:[%s13467_s1 + $0x128] sm:$0xff] }
 0x140   : > { %3790 = vmatpush2.bf16.msra.mxu0 %v8266_v29  ;;  %v370_v29 = vld [vmem:[%s13467_s1 + $0x2a8] sm:$0xff] }
 0x141   : > { %3791 = vmatprep.subr.bf16.mxu0 %v8251_v32  ;;  %v8413_v32 = vcombine.high %v642_v21, %v650_v24  ;;  %v8141_v43 = vcombine.high %v370_v29, %v378_v33  ;;  %v8140_v56 = vcombine.low %v370_v29, %v378_v33  ;;  %v578_v11 = vld [vmem:[%s13467_s1 + $0x928] sm:$0xff] }
 0x142   : > { %3831 = vmatpush2.bf16.msra.mxu1 %v8522_v31  ;;  %v816_v31 = vrot.slane %v10866_v38, %v11091_v23  ;;  %v8156_v38 = vcombine.low %v386_v18, %v394_v20  ;;  %v546_v33 = vld [vmem:[%s13467_s1 + $0x828] sm:$0xff] }
 0x143   : > { %3832 = vmatprep.subr.bf16.mxu1 %v8507_v36  ;;  %v634_v36 = vld [vmem:[%s13467_s1 + $0xae8] sm:$0xff] }
 0x144   : > { %3792 = vmatpush2.bf16.msra.mxu0 %v8250_v39  ;;  %v8397_v48 = vcombine.high %v626_v35, %v634_v36 }
 0x145   : > { %3793 = vmatprep.subr.bf16.mxu0 %v8235_v42  ;;  %v8412_v42 = vcombine.low %v642_v21, %v650_v24  ;;  %v306_v21 = vld [vmem:[%s13467_s1 + $0xa8] sm:$0xff] }
 0x146   : > { %3833 = vmatpush2.bf16.msra.mxu1 %v8506_v41  ;;  %v562_v24 = vld [vmem:[%s13467_s1 + $0x8a8] sm:$0xff] }
 0x147   : > { %3834 = vmatprep.subr.bf16.mxu1 %v8491_v46 }
 0x148   : > { %3794 = vmatpush2.bf16.msra.mxu0 %v8234_v49  ;;  %v354_v49 = vld [vmem:[%s13467_s1 + $0x228] sm:$0xff] }
 0x149   : > { %3795 = vmatprep.subr.bf16.mxu0 %v8219_v51 }
 0x14a   : > { %3835 = vmatpush2.bf16.msra.mxu1 %v8490_v50  ;;  %v362_v50 = vld [vmem:[%s13467_s1 + $0x268] sm:$0xff] }
 0x14b   : > { %3836 = vmatprep.subr.bf16.mxu1 %v8475_v55 }
 0x14c   : > { %3796 = vmatpush2.bf16.msra.mxu0 %v8218_v57 }
 0x14d   : > { %3797 = vmatprep.subr.bf16.mxu0 %v8203_v61  ;;  %v8125_v61 = vcombine.high %v354_v49, %v362_v50 }
 0x14e   : > { %3837 = vmatpush2.bf16.msra.mxu1 %v8474_v60  ;;  %v8396_v60 = vcombine.low %v626_v35, %v634_v36 }
 0x14f   : > { %3838 = vmatprep.subr.bf16.mxu1 %v8459_v1  ;;  %v346_v1 = vld [vmem:[%s13467_s1 + $0x1e8] sm:$0xff] }
 0x150   : > { %3798 = vmatpush2.bf16.msra.mxu0 %v8202_v3  ;;  %v602_v3 = vld [vmem:[%s13467_s1 + $0x9e8] sm:$0xff]  ;;  %v8109_v6 = vcombine.high %v338_v0, %v346_v1 }
 0x151   : > { %3799 = vmatprep.subr.bf16.mxu0 %v8187_v5  ;;  %v8380_v5 = vcombine.low %v610_v52, %v618_v53  ;;  %v8365_v8 = vcombine.high %v594_v2, %v602_v3  ;;  %v770_v52 = vld [vmem:[%s13467_s1 + $0xf28] sm:$0xff] }
 0x152   : > { %3839 = vmatpush2.bf16.msra.mxu1 %v8458_v4  ;;  %v8124_v4 = vcombine.low %v354_v49, %v362_v50  ;;  %v514_v50 = vld [vmem:[%s13467_s1 + $0x728] sm:$0xff] }
 0x153   : > { %3840 = vmatprep.subr.bf16.mxu1 %v8443_v10  ;;  %v330_v10 = vld [vmem:[%s13467_s1 + $0x168] sm:$0xff] }
 0x154   : > { %3800 = vmatpush2.bf16.msra.mxu0 %v8186_v12  ;;  %v586_v12 = vld [vmem:[%s13467_s1 + $0x968] sm:$0xff]  ;;  %v8093_v18 = vcombine.high %v322_v9, %v330_v10 }
 0x155   : > { %3851 = vmatprep.subr.bf16.mxu0 %v8173_v17  ;;  %v8364_v17 = vcombine.low %v594_v2, %v602_v3  ;;  %v8349_v20 = vcombine.high %v578_v11, %v586_v12  ;;  %v778_v53 = vld [vmem:[%s13467_s1 + $0xf68] sm:$0xff] }
 0x156   : > { %3841 = vmatpush2.bf16.msra.mxu1 %v8442_v15  ;;  %v8108_v15 = vcombine.low %v338_v0, %v346_v1  ;;  %v762_v0 = vld [vmem:[%s13467_s1 + $0xee8] sm:$0xff]  ;;  %v8540_v2 = vcombine.low %v770_v52, %v778_v53 }
 0x157   : > { %3892 = vmatprep.subr.bf16.mxu1 %v8429_v22  ;;  %v3557_v34 = vpop.f32.mrf.mxu0  ;;  %3802 = vmatmul.mubr.bf16.vlgmr.msra.gmra.mxu0 %v10275_v16  ;;  %v314_v22 = vld [vmem:[%s13467_s1 + $0xe8] sm:$0xff] }
 0x158   : > { %v3558_v37 = vadd.f32 %v3557_v34, %v812_v25  ;;  %3852 = vmatpush1.bf16.msra.mxu0 %v8172_v26  ;;  %3883 = vmatprep.mubr.bf16.mxu0 %v10147_v58  ;;  %v570_v25 = vld [vmem:[%s13467_s1 + $0x8e8] sm:$0xff]  ;;  %v8092_v26 = vcombine.low %v322_v9, %v330_v10  ;;  %v8076_v35 = vcombine.low %v306_v21, %v314_v22 }
 0x159   : > { %v3598_v39 = vpop.f32.mrf.mxu1  ;;  %3843 = vmatmul.mubr.bf16.vlgmr.msra.gmra.mxu1 %v10283_v19  ;;  %v3559_v41 = vpop.f32.mrf.mxu0  ;;  %3853 = vmatprep.subr.bf16.mxu0 %v8157_v28  ;;  %v8077_v28 = vcombine.high %v306_v21, %v314_v22  ;;  %v8333_v29 = vcombine.high %v562_v24, %v570_v25  ;;  %v554_v34 = vld [vmem:[%s13467_s1 + $0x868] sm:$0xff]  ;;  %v8332_v36 = vcombine.low %v562_v24, %v570_v25 }
 0x15a   : > { %3893 = vmatpush1.bf16.msra.mxu1 %v8428_v27  ;;  %v11114_v44 = vadd.f32 %v3598_v39, %v3558_v37  ;;  %v3560_v45 = vadd.f32 %v3559_v41, %v816_v31  ;;  %3924 = vmatprep.mubr.bf16.mxu1 %v10149_v59  ;;  %v8348_v27 = vcombine.low %v578_v11, %v586_v12  ;;  %v290_v31 = vld [vmem:[%s13467_s1 + $0x28] sm:$0xff] }
 0x15b   : > { %v3600_v46 = vpop.f32.mrf.mxu1  ;;  %3894 = vmatprep.subr.bf16.mxu1 %v8413_v32  ;;  %v3561_v51 = vpop.f32.mrf.mxu0  ;;  %v298_v32 = vld [vmem:[%s13467_s1 + $0x68] sm:$0xff]  ;;  %v8317_v39 = vcombine.high %v546_v33, %v554_v34 }
 0x15c   : > { %v11130_v54 = vadd.f32 %v3600_v46, %v3560_v45  ;;  %3854 = vmatpush1.bf16.msra.mxu0 %v8156_v38  ;;  %v8061_v37 = vcombine.high %v290_v31, %v298_v32  ;;  %v530_v38 = vld [vmem:[%s13467_s1 + $0x7a8] sm:$0xff]  ;;  %v8060_v45 = vcombine.low %v290_v31, %v298_v32  ;;  %v8316_v46 = vcombine.low %v546_v33, %v554_v34 }
 0x15d   : > { %v3602_v55 = vpop.f32.mrf.mxu1  ;;  %v3562_v57 = vpop.f32.mrf.mxu0  ;;  %3855 = vmatprep.subr.bf16.mxu0 %v8141_v43  ;;  %v538_v41 = vld [vmem:[%s13467_s1 + $0x7e8] sm:$0xff] }
 0x15e   : > { %3895 = vmatpush1.bf16.msra.mxu1 %v8412_v42  ;;  %v786_v42 = vld [vmem:[%s13467_s1 + $0xfa8] sm:$0xff]  ;;  %v8300_v55 = vcombine.low %v530_v38, %v538_v41 }
 0x15f   : > { %v3603_v62 = vpop.f32.mrf.mxu1  ;;  %3896 = vmatprep.subr.bf16.mxu1 %v8397_v48  ;;  %v794_v43 = vld [vmem:[%s13467_s1 + $0xfe8] sm:$0xff]  ;;  %v8301_v48 = vcombine.high %v530_v38, %v538_v41 }
 0x160   : > { %3856 = vmatpush1.bf16.msra.mxu0 %v8140_v56  ;;  %v8557_v49 = vcombine.high %v786_v42, %v794_v43  ;;  %v522_v51 = vld [vmem:[%s13467_s1 + $0x768] sm:$0xff]  ;;  %v8556_v56 = vcombine.low %v786_v42, %v794_v43 }
 0x161   : > { %3857 = vmatprep.subr.bf16.mxu0 %v8125_v61  ;;  %v8285_v57 = vcombine.high %v514_v50, %v522_v51  ;;  %v498_v61 = vld [vmem:[%s13467_s1 + $0x6a8] sm:$0xff]  ;;  %v8284_v1 = vcombine.low %v514_v50, %v522_v51 }
 0x162   : > { %3897 = vmatpush1.bf16.msra.mxu1 %v8396_v60  ;;  %v8541_v60 = vcombine.high %v770_v52, %v778_v53  ;;  %v506_v62 = vld [vmem:[%s13467_s1 + $0x6e8] sm:$0xff] }
 0x163   : > { %3898 = vmatprep.subr.bf16.mxu1 %v8381_v63  ;;  %v754_v63 = vld [vmem:[%s13467_s1 + $0xea8] sm:$0xff]  ;;  %v8269_v3 = vcombine.high %v498_v61, %v506_v62  ;;  %v8268_v10 = vcombine.low %v498_v61, %v506_v62  ;;  %v667_v61 = vld [vmem:[%s13467_s1 + $0xbf0] sm:$0xff] }
 0x164   : > { %3858 = vmatpush1.bf16.msra.mxu0 %v8124_v4  ;;  %v8525_v4 = vcombine.high %v754_v63, %v762_v0  ;;  %v746_v9 = vld [vmem:[%s13467_s1 + $0xe68] sm:$0xff]  ;;  %v8524_v11 = vcombine.low %v754_v63, %v762_v0  ;;  %v819_v63 = vsub.s32 4, %v10849_v30 }
 0x165   : > { %3859 = vmatprep.subr.bf16.mxu0 %v8109_v6  ;;  %v490_v6 = vld [vmem:[%s13467_s1 + $0x668] sm:$0xff] }
 0x166   : > { %3899 = vmatpush1.bf16.msra.mxu1 %v8380_v5  ;;  %v482_v5 = vld [vmem:[%s13467_s1 + $0x628] sm:$0xff] }
 0x167   : > { %3900 = vmatprep.subr.bf16.mxu1 %v8365_v8  ;;  %v738_v8 = vld [vmem:[%s13467_s1 + $0xe28] sm:$0xff]  ;;  %v8253_v12 = vcombine.high %v482_v5, %v490_v6  ;;  %v8252_v22 = vcombine.low %v482_v5, %v490_v6  ;;  %v395_v5 = vld [vmem:[%s13467_s1 + $0x370] sm:$0xff] }
 0x168   : > { %3860 = vmatpush1.bf16.msra.mxu0 %v8108_v15  ;;  %v8509_v15 = vcombine.high %v738_v8, %v746_v9  ;;  %v730_v21 = vld [vmem:[%s13467_s1 + $0xde8] sm:$0xff]  ;;  %v8508_v24 = vcombine.low %v738_v8, %v746_v9  ;;  %v643_v6 = vld [vmem:[%s13467_s1 + $0xb30] sm:$0xff]  ;;  %v11305_v9 = vld [vmem:[%s13468_s2] sm:$0xff] }
 0x169   : > { %3861 = vmatprep.subr.bf16.mxu0 %v8093_v18  ;;  %v474_v18 = vld [vmem:[%s13467_s1 + $0x5e8] sm:$0xff]  ;;  %v651_v8 = vld [vmem:[%s13467_s1 + $0xb70] sm:$0xff] }
 0x16a   : > { %3901 = vmatpush1.bf16.msra.mxu1 %v8364_v17  ;;  %v466_v17 = vld [vmem:[%s13467_s1 + $0x5a8] sm:$0xff] }
 0x16b   : > { %3902 = vmatprep.subr.bf16.mxu1 %v8349_v20  ;;  %v722_v20 = vld [vmem:[%s13467_s1 + $0xda8] sm:$0xff]  ;;  %v8237_v25 = vcombine.high %v466_v17, %v474_v18  ;;  %v8236_v32 = vcombine.low %v466_v17, %v474_v18  ;;  %v8415_v18 = vcombine.high %v643_v6, %v651_v8 }
 0x16c   : > { %3862 = vmatpush1.bf16.msra.mxu0 %v8092_v26  ;;  %v8493_v26 = vcombine.high %v722_v20, %v730_v21  ;;  %v714_v31 = vld [vmem:[%s13467_s1 + $0xd68] sm:$0xff]  ;;  %v8492_v33 = vcombine.low %v722_v20, %v730_v21  ;;  %v371_v20 = vld [vmem:[%s13467_s1 + $0x2b0] sm:$0xff] }
 0x16d   : > { %3863 = vmatprep.subr.bf16.mxu0 %v8077_v28  ;;  %v458_v28 = vld [vmem:[%s13467_s1 + $0x568] sm:$0xff]  ;;  %v379_v21 = vld [vmem:[%s13467_s1 + $0x2f0] sm:$0xff] }
 0x16e   : > { %3903 = vmatpush1.bf16.msra.mxu1 %v8348_v27  ;;  %v450_v27 = vld [vmem:[%s13467_s1 + $0x528] sm:$0xff] }
 0x16f   : > { %3904 = vmatprep.subr.bf16.mxu1 %v8333_v29  ;;  %v706_v29 = vld [vmem:[%s13467_s1 + $0xd28] sm:$0xff]  ;;  %v8221_v34 = vcombine.high %v450_v27, %v458_v28  ;;  %v8220_v41 = vcombine.low %v450_v27, %v458_v28 }
 0x170   : > { %3864 = vmatpush1.bf16.msra.mxu0 %v8076_v35  ;;  %v8477_v35 = vcombine.high %v706_v29, %v714_v31  ;;  %v698_v38 = vld [vmem:[%s13467_s1 + $0xce8] sm:$0xff]  ;;  %v8476_v42 = vcombine.low %v706_v29, %v714_v31  ;;  %v8414_v31 = vcombine.low %v643_v6, %v651_v8 }
 0x171   : > { %3865 = vmatprep.subr.bf16.mxu0 %v8061_v37  ;;  %v442_v37 = vld [vmem:[%s13467_s1 + $0x4e8] sm:$0xff] }
 0x172   : > { %3905 = vmatpush1.bf16.msra.mxu1 %v8332_v36  ;;  %v434_v36 = vld [vmem:[%s13467_s1 + $0x4a8] sm:$0xff] }
 0x173   : > { %3906 = vmatprep.subr.bf16.mxu1 %v8317_v39  ;;  %v690_v39 = vld [vmem:[%s13467_s1 + $0xca8] sm:$0xff]  ;;  %v8205_v43 = vcombine.high %v434_v36, %v442_v37  ;;  %v8204_v51 = vcombine.low %v434_v36, %v442_v37  ;;  %v355_v37 = vld [vmem:[%s13467_s1 + $0x230] sm:$0xff] }
 0x174   : > { %3866 = vmatpush1.bf16.msra.mxu0 %v8060_v45  ;;  %v8461_v45 = vcombine.high %v690_v39, %v698_v38  ;;  %v682_v50 = vld [vmem:[%s13467_s1 + $0xc68] sm:$0xff]  ;;  %v8460_v52 = vcombine.low %v690_v39, %v698_v38  ;;  %v363_v39 = vld [vmem:[%s13467_s1 + $0x270] sm:$0xff] }
 0x175   : > { %3867 = vmatprep.subr.bf16.mxu0 %v8301_v48  ;;  %v426_v48 = vld [vmem:[%s13467_s1 + $0x468] sm:$0xff] }
 0x176   : > { %3907 = vmatpush1.bf16.msra.mxu1 %v8316_v46  ;;  %v418_v46 = vld [vmem:[%s13467_s1 + $0x428] sm:$0xff] }
 0x177   : > { %3908 = vmatprep.subr.bf16.mxu1 %v8557_v49  ;;  %v674_v49 = vld [vmem:[%s13467_s1 + $0xc28] sm:$0xff]  ;;  %v8189_v53 = vcombine.high %v418_v46, %v426_v48  ;;  %v8188_v62 = vcombine.low %v418_v46, %v426_v48  ;;  %v8142_v46 = vcombine.low %v371_v20, %v379_v21 }
 0x178   : > { %3868 = vmatpush2.bf16.msra.mxu0 %v8300_v55  ;;  %v8445_v55 = vcombine.high %v674_v49, %v682_v50  ;;  %v8444_v0 = vcombine.low %v674_v49, %v682_v50  ;;  %v8127_v50 = vcombine.high %v355_v37, %v363_v39 }
 0x179   : > { %3869 = vmatprep.subr.bf16.mxu0 %v8285_v57  ;;  %v411_v57 = vld [vmem:[%s13467_s1 + $0x3f0] sm:$0xff] }
 0x17a   : > { %3909 = vmatpush2.bf16.msra.mxu1 %v8556_v56  ;;  %v403_v56 = vld [vmem:[%s13467_s1 + $0x3b0] sm:$0xff] }
 0x17b   : > { %3910 = vmatprep.subr.bf16.mxu1 %v8541_v60  ;;  %v659_v60 = vld [vmem:[%s13467_s1 + $0xbb0] sm:$0xff] }
 0x17c   : > { %3870 = vmatpush2.bf16.msra.mxu0 %v8284_v1  ;;  %v8175_v1 = vcombine.high %v403_v56, %v411_v57 }
 0x17d   : > { %3871 = vmatprep.subr.bf16.mxu0 %v8269_v3  ;;  %v823_v3 = vsub.s32 5, %v10849_v30 }
 0x17e   : > { %3911 = vmatpush2.bf16.msra.mxu1 %v8540_v2  ;;  %v8431_v2 = vcombine.high %v659_v60, %v667_v61 }
 0x17f   : > { %3912 = vmatprep.subr.bf16.mxu1 %v8525_v4  ;;  %v387_v4 = vld [vmem:[%s13467_s1 + $0x330] sm:$0xff]  ;;  %v824_v17 = vrot.slane %v11305_v9, %v823_v3 }
 0x180   : > { %3872 = vmatpush2.bf16.msra.mxu0 %v8268_v10  ;;  %v820_v10 = vrot.slane %v11305_v9, %v819_v63  ;;  %v8158_v28 = vcombine.low %v387_v4, %v395_v5 }
 0x181   : > { %3873 = vmatprep.subr.bf16.mxu0 %v8253_v12  ;;  %v8430_v12 = vcombine.low %v659_v60, %v667_v61  ;;  %v8126_v60 = vcombine.low %v355_v37, %v363_v39  ;;  %v787_v37 = vld [vmem:[%s13467_s1 + $0xfb0] sm:$0xff] }
 0x182   : > { %3913 = vmatpush2.bf16.msra.mxu1 %v8524_v11  ;;  %v8174_v11 = vcombine.low %v403_v56, %v411_v57  ;;  %v595_v56 = vld [vmem:[%s13467_s1 + $0x9b0] sm:$0xff] }
 0x183   : > { %3914 = vmatprep.subr.bf16.mxu1 %v8509_v15  ;;  %v8159_v15 = vcombine.high %v387_v4, %v395_v5  ;;  %v603_v57 = vld [vmem:[%s13467_s1 + $0x9f0] sm:$0xff] }
 0x184   : > { %3874 = vmatpush2.bf16.msra.mxu0 %v8252_v22  ;;  %v579_v4 = vld [vmem:[%s13467_s1 + $0x930] sm:$0xff]  ;;  %v8366_v8 = vcombine.low %v595_v56, %v603_v57 }
 0x185   : > { %3875 = vmatprep.subr.bf16.mxu0 %v8237_v25  ;;  %v635_v25 = vld [vmem:[%s13467_s1 + $0xaf0] sm:$0xff] }
 0x186   : > { %3915 = vmatpush2.bf16.msra.mxu1 %v8508_v24  ;;  %v627_v24 = vld [vmem:[%s13467_s1 + $0xab0] sm:$0xff] }
 0x187   : > { %3916 = vmatprep.subr.bf16.mxu1 %v8493_v26  ;;  %v8399_v36 = vcombine.high %v627_v24, %v635_v25  ;;  %v8398_v49 = vcombine.low %v627_v24, %v635_v25  ;;  %v587_v5 = vld [vmem:[%s13467_s1 + $0x970] sm:$0xff] }
 0x188   : > { %3876 = vmatpush2.bf16.msra.mxu0 %v8236_v32  ;;  %v8143_v32 = vcombine.high %v371_v20, %v379_v21  ;;  %v8350_v21 = vcombine.low %v579_v4, %v587_v5  ;;  %v291_v25 = vld [vmem:[%s13467_s1 + $0x30] sm:$0xff] }
 0x189   : > { %3877 = vmatprep.subr.bf16.mxu0 %v8221_v34  ;;  %v795_v39 = vld [vmem:[%s13467_s1 + $0xff0] sm:$0xff] }
 0x18a   : > { %3917 = vmatpush2.bf16.msra.mxu1 %v8492_v33 }
 0x18b   : > { %3918 = vmatprep.subr.bf16.mxu1 %v8477_v35 }
 0x18c   : > { %3878 = vmatpush2.bf16.msra.mxu0 %v8220_v41  ;;  %v611_v41 = vld [vmem:[%s13467_s1 + $0xa30] sm:$0xff] }
 0x18d   : > { %3879 = vmatprep.subr.bf16.mxu0 %v8205_v43 }
 0x18e   : > { %3919 = vmatpush2.bf16.msra.mxu1 %v8476_v42  ;;  %v619_v42 = vld [vmem:[%s13467_s1 + $0xa70] sm:$0xff] }
 0x18f   : > { %3920 = vmatprep.subr.bf16.mxu1 %v8461_v45  ;;  %v8382_v61 = vcombine.low %v611_v41, %v619_v42 }
 0x190   : > { %3880 = vmatpush2.bf16.msra.mxu0 %v8204_v51 }
 0x191   : > { %3881 = vmatprep.subr.bf16.mxu0 %v8189_v53  ;;  %v339_v53 = vld [vmem:[%s13467_s1 + $0x1b0] sm:$0xff] }
 0x192   : > { %3921 = vmatpush2.bf16.msra.mxu1 %v8460_v52  ;;  %v8383_v52 = vcombine.high %v611_v41, %v619_v42 }
 0x193   : > { %3922 = vmatprep.subr.bf16.mxu1 %v8445_v55  ;;  %v347_v55 = vld [vmem:[%s13467_s1 + $0x1f0] sm:$0xff] }
 0x194   : > { %3882 = vmatpush2.bf16.msra.mxu0 %v8188_v62  ;;  %v8111_v62 = vcombine.high %v339_v53, %v347_v55  ;;  %v8110_v6 = vcombine.low %v339_v53, %v347_v55 }
 0x195   : > { %3933 = vmatprep.subr.bf16.mxu0 %v8175_v1  ;;  %v323_v1 = vld [vmem:[%s13467_s1 + $0x130] sm:$0xff] }
 0x196   : > { %3923 = vmatpush2.bf16.msra.mxu1 %v8444_v0  ;;  %v8367_v0 = vcombine.high %v595_v56, %v603_v57  ;;  %v499_v56 = vld [vmem:[%s13467_s1 + $0x6b0] sm:$0xff] }
 0x197   : > { %3974 = vmatprep.subr.bf16.mxu1 %v8431_v2  ;;  %v3639_v22 = vpop.f32.mrf.mxu0  ;;  %3884 = vmatmul.mubr.bf16.vlgmr.msra.gmra.mxu0 %v10275_v16  ;;  %v331_v2 = vld [vmem:[%s13467_s1 + $0x170] sm:$0xff] }
 0x198   : > { %v3640_v26 = vadd.f32 %v3639_v22, %v820_v10  ;;  %3934 = vmatpush1.bf16.msra.mxu0 %v8174_v11  ;;  %3965 = vmatprep.mubr.bf16.mxu0 %v10147_v58  ;;  %v8095_v10 = vcombine.high %v323_v1, %v331_v2  ;;  %v8351_v11 = vcombine.high %v579_v4, %v587_v5  ;;  %v507_v57 = vld [vmem:[%s13467_s1 + $0x6f0] sm:$0xff] }
 0x199   : > { %v3680_v27 = vpop.f32.mrf.mxu1  ;;  %3925 = vmatmul.mubr.bf16.vlgmr.msra.gmra.mxu1 %v10283_v19  ;;  %v3641_v29 = vpop.f32.mrf.mxu0  ;;  %3935 = vmatprep.subr.bf16.mxu0 %v8159_v15  ;;  %v315_v15 = vld [vmem:[%s13467_s1 + $0xf0] sm:$0xff]  ;;  %v8094_v20 = vcombine.low %v323_v1, %v331_v2  ;;  %v8271_v1 = vcombine.high %v499_v56, %v507_v57 }
 0x19a   : > { %3975 = vmatpush1.bf16.msra.mxu1 %v8430_v12  ;;  %v11327_v33 = vadd.f32 %v3680_v27, %v3640_v26  ;;  %v3642_v34 = vadd.f32 %v3641_v29, %v824_v17  ;;  %4006 = vmatprep.mubr.bf16.mxu1 %v10149_v59  ;;  %v307_v12 = vld [vmem:[%s13467_s1 + $0xb0] sm:$0xff] }
 0x19b   : > { %v3682_v35 = vpop.f32.mrf.mxu1  ;;  %3976 = vmatprep.subr.bf16.mxu1 %v8415_v18  ;;  %v3643_v38 = vpop.f32.mrf.mxu0  ;;  %v563_v17 = vld [vmem:[%s13467_s1 + $0x8b0] sm:$0xff]  ;;  %v8079_v22 = vcombine.high %v307_v12, %v315_v15  ;;  %v8078_v29 = vcombine.low %v307_v12, %v315_v15 }
 0x19c   : > { %v11343_v43 = vadd.f32 %v3682_v35, %v3642_v34  ;;  %3936 = vmatpush1.bf16.msra.mxu0 %v8158_v28  ;;  %v571_v18 = vld [vmem:[%s13467_s1 + $0x8f0] sm:$0xff] }
 0x19d   : > { %v3684_v45 = vpop.f32.mrf.mxu1  ;;  %v3644_v48 = vpop.f32.mrf.mxu0  ;;  %3937 = vmatprep.subr.bf16.mxu0 %v8143_v32  ;;  %v8335_v24 = vcombine.high %v563_v17, %v571_v18  ;;  %v299_v26 = vld [vmem:[%s13467_s1 + $0x70] sm:$0xff] }
 0x19e   : > { %3977 = vmatpush1.bf16.msra.mxu1 %v8414_v31  ;;  %v547_v27 = vld [vmem:[%s13467_s1 + $0x830] sm:$0xff]  ;;  %v8334_v31 = vcombine.low %v563_v17, %v571_v18  ;;  %v8063_v32 = vcombine.high %v291_v25, %v299_v26  ;;  %v8062_v38 = vcombine.low %v291_v25, %v299_v26  ;;  %v8559_v45 = vcombine.high %v787_v37, %v795_v39 }
 0x19f   : > { %v3685_v51 = vpop.f32.mrf.mxu1  ;;  %3978 = vmatprep.subr.bf16.mxu1 %v8399_v36  ;;  %v555_v28 = vld [vmem:[%s13467_s1 + $0x870] sm:$0xff] }
 0x1a0   : > { %3938 = vmatpush1.bf16.msra.mxu0 %v8142_v46  ;;  %v8319_v34 = vcombine.high %v547_v27, %v555_v28  ;;  %v531_v35 = vld [vmem:[%s13467_s1 + $0x7b0] sm:$0xff]  ;;  %v8318_v41 = vcombine.low %v547_v27, %v555_v28 }
 0x1a1   : > { %3939 = vmatprep.subr.bf16.mxu0 %v8127_v50  ;;  %v539_v36 = vld [vmem:[%s13467_s1 + $0x7f0] sm:$0xff] }
 0x1a2   : > { %3979 = vmatpush1.bf16.msra.mxu1 %v8398_v49  ;;  %v8303_v42 = vcombine.high %v531_v35, %v539_v36  ;;  %v515_v46 = vld [vmem:[%s13467_s1 + $0x730] sm:$0xff]  ;;  %v8302_v51 = vcombine.low %v531_v35, %v539_v36 }
 0x1a3   : > { %3980 = vmatprep.subr.bf16.mxu1 %v8383_v52  ;;  %v523_v48 = vld [vmem:[%s13467_s1 + $0x770] sm:$0xff]  ;;  %v8558_v52 = vcombine.low %v787_v37, %v795_v39 }
 0x1a4   : > { %3940 = vmatpush1.bf16.msra.mxu0 %v8126_v60  ;;  %v771_v49 = vld [vmem:[%s13467_s1 + $0xf30] sm:$0xff]  ;;  %v8287_v53 = vcombine.high %v515_v46, %v523_v48 }
 0x1a5   : > { %3941 = vmatprep.subr.bf16.mxu0 %v8111_v62  ;;  %v779_v50 = vld [vmem:[%s13467_s1 + $0xf70] sm:$0xff]  ;;  %v8286_v62 = vcombine.low %v515_v46, %v523_v48 }
 0x1a6   : > { %3981 = vmatpush1.bf16.msra.mxu1 %v8382_v61  ;;  %v8543_v55 = vcombine.high %v771_v49, %v779_v50  ;;  %v755_v60 = vld [vmem:[%s13467_s1 + $0xeb0] sm:$0xff] }
 0x1a7   : > { %3982 = vmatprep.subr.bf16.mxu1 %v8367_v0  ;;  %v763_v61 = vld [vmem:[%s13467_s1 + $0xef0] sm:$0xff]  ;;  %v8542_v0 = vcombine.low %v771_v49, %v779_v50 }
 0x1a8   : > { %3942 = vmatpush1.bf16.msra.mxu0 %v8110_v6  ;;  %v8527_v2 = vcombine.high %v755_v60, %v763_v61  ;;  %v483_v4 = vld [vmem:[%s13467_s1 + $0x630] sm:$0xff] }
 0x1a9   : > { %3943 = vmatprep.subr.bf16.mxu0 %v8095_v10  ;;  %v491_v5 = vld [vmem:[%s13467_s1 + $0x670] sm:$0xff]  ;;  %v8270_v10 = vcombine.low %v499_v56, %v507_v57 }
 0x1aa   : > { %3983 = vmatpush1.bf16.msra.mxu1 %v8366_v8  ;;  %v739_v6 = vld [vmem:[%s13467_s1 + $0xe30] sm:$0xff]  ;;  %v8255_v12 = vcombine.high %v483_v4, %v491_v5 }
 0x1ab   : > { %3984 = vmatprep.subr.bf16.mxu1 %v8351_v11  ;;  %v747_v8 = vld [vmem:[%s13467_s1 + $0xe70] sm:$0xff]  ;;  %v8526_v11 = vcombine.low %v755_v60, %v763_v61  ;;  %v404_v60 = vld [vmem:[%s13467_s1 + $0x3b8] sm:$0xff] }
 0x1ac   : > { %3944 = vmatpush1.bf16.msra.mxu0 %v8094_v20  ;;  %v8511_v15 = vcombine.high %v739_v6, %v747_v8  ;;  %v467_v17 = vld [vmem:[%s13467_s1 + $0x5b0] sm:$0xff]  ;;  %v412_v61 = vld [vmem:[%s13467_s1 + $0x3f8] sm:$0xff] }
 0x1ad   : > { %3945 = vmatprep.subr.bf16.mxu0 %v8079_v22  ;;  %v475_v18 = vld [vmem:[%s13467_s1 + $0x5f0] sm:$0xff]  ;;  %v8254_v22 = vcombine.low %v483_v4, %v491_v5  ;;  %v8177_v5 = vcombine.high %v404_v60, %v412_v61 }
 0x1ae   : > { %3985 = vmatpush1.bf16.msra.mxu1 %v8350_v21  ;;  %v723_v20 = vld [vmem:[%s13467_s1 + $0xdb0] sm:$0xff]  ;;  %v8239_v25 = vcombine.high %v467_v17, %v475_v18 }
 0x1af   : > { %3986 = vmatprep.subr.bf16.mxu1 %v8335_v24  ;;  %v731_v21 = vld [vmem:[%s13467_s1 + $0xdf0] sm:$0xff]  ;;  %v8510_v24 = vcombine.low %v739_v6, %v747_v8  ;;  %v831_v8 = vsub.s32 7, %v10849_v30 }
 0x1b0   : > { %3946 = vmatpush1.bf16.msra.mxu0 %v8078_v29  ;;  %v8495_v26 = vcombine.high %v723_v20, %v731_v21  ;;  %v451_v27 = vld [vmem:[%s13467_s1 + $0x530] sm:$0xff] }
 0x1b1   : > { %3947 = vmatprep.subr.bf16.mxu0 %v8063_v32  ;;  %v459_v28 = vld [vmem:[%s13467_s1 + $0x570] sm:$0xff]  ;;  %v8238_v32 = vcombine.low %v467_v17, %v475_v18  ;;  %v8176_v18 = vcombine.low %v404_v60, %v412_v61  ;;  %v340_v60 = vld [vmem:[%s13467_s1 + $0x1b8] sm:$0xff] }
 0x1b2   : > { %3987 = vmatpush1.bf16.msra.mxu1 %v8334_v31  ;;  %v707_v29 = vld [vmem:[%s13467_s1 + $0xd30] sm:$0xff]  ;;  %v8223_v35 = vcombine.high %v451_v27, %v459_v28  ;;  %v596_v61 = vld [vmem:[%s13467_s1 + $0x9b8] sm:$0xff] }
 0x1b3   : > { %3988 = vmatprep.subr.bf16.mxu1 %v8319_v34  ;;  %v715_v31 = vld [vmem:[%s13467_s1 + $0xd70] sm:$0xff]  ;;  %v8494_v34 = vcombine.low %v723_v20, %v731_v21 }
 0x1b4   : > { %3948 = vmatpush1.bf16.msra.mxu0 %v8062_v38  ;;  %v8479_v36 = vcombine.high %v707_v29, %v715_v31  ;;  %v435_v37 = vld [vmem:[%s13467_s1 + $0x4b0] sm:$0xff] }
 0x1b5   : > { %3949 = vmatprep.subr.bf16.mxu0 %v8303_v42  ;;  %v443_v39 = vld [vmem:[%s13467_s1 + $0x4f0] sm:$0xff]  ;;  %v8222_v42 = vcombine.low %v451_v27, %v459_v28  ;;  %v628_v28 = vld [vmem:[%s13467_s1 + $0xab8] sm:$0xff] }
 0x1b6   : > { %3989 = vmatpush1.bf16.msra.mxu1 %v8318_v41  ;;  %v691_v38 = vld [vmem:[%s13467_s1 + $0xcb0] sm:$0xff]  ;;  %v8207_v46 = vcombine.high %v435_v37, %v443_v39 }
 0x1b7   : > { %3990 = vmatprep.subr.bf16.mxu1 %v8559_v45  ;;  %v699_v41 = vld [vmem:[%s13467_s1 + $0xcf0] sm:$0xff]  ;;  %v8478_v45 = vcombine.low %v707_v29, %v715_v31 }
 0x1b8   : > { %3950 = vmatpush2.bf16.msra.mxu0 %v8302_v51  ;;  %v8463_v48 = vcombine.high %v691_v38, %v699_v41  ;;  %v419_v49 = vld [vmem:[%s13467_s1 + $0x430] sm:$0xff] }
 0x1b9   : > { %3951 = vmatprep.subr.bf16.mxu0 %v8287_v53  ;;  %v427_v50 = vld [vmem:[%s13467_s1 + $0x470] sm:$0xff]  ;;  %v8206_v53 = vcombine.low %v435_v37, %v443_v39 }
 0x1ba   : > { %3991 = vmatpush2.bf16.msra.mxu1 %v8558_v52  ;;  %v675_v51 = vld [vmem:[%s13467_s1 + $0xc30] sm:$0xff]  ;;  %v8191_v56 = vcombine.high %v419_v49, %v427_v50 }
 0x1bb   : > { %3992 = vmatprep.subr.bf16.mxu1 %v8543_v55  ;;  %v683_v52 = vld [vmem:[%s13467_s1 + $0xc70] sm:$0xff]  ;;  %v8462_v55 = vcombine.low %v691_v38, %v699_v41 }
 0x1bc   : > { %3952 = vmatpush2.bf16.msra.mxu0 %v8286_v62  ;;  %v8447_v57 = vcombine.high %v675_v51, %v683_v52  ;;  %v660_v62 = vld [vmem:[%s13467_s1 + $0xbb8] sm:$0xff]  ;;  %v8446_v4 = vcombine.low %v675_v51, %v683_v52 }
 0x1bd   : > { %3953 = vmatprep.subr.bf16.mxu0 %v8271_v1  ;;  %v8190_v1 = vcombine.low %v419_v49, %v427_v50  ;;  %v620_v49 = vld [vmem:[%s13467_s1 + $0xa78] sm:$0xff] }
 0x1be   : > { %3993 = vmatpush2.bf16.msra.mxu1 %v8542_v0  ;;  %v668_v0 = vld [vmem:[%s13467_s1 + $0xbf8] sm:$0xff] }
 0x1bf   : > { %3994 = vmatprep.subr.bf16.mxu1 %v8527_v2  ;;  %v827_v2 = vsub.s32 6, %v10849_v30  ;;  %v8433_v6 = vcombine.high %v660_v62, %v668_v0  ;;  %v8432_v20 = vcombine.low %v660_v62, %v668_v0  ;;  %v604_v62 = vld [vmem:[%s13467_s1 + $0x9f8] sm:$0xff]  ;;  %v9494_v30 = vld [vmem:[%s13469_s3 + $0xd24] ss:$16 sps:$4 sm:$0xff]  }
 0x1c0   : > { %3954 = vmatpush2.bf16.msra.mxu0 %v8270_v10  ;;  %v388_v10 = vld [vmem:[%s13467_s1 + $0x338] sm:$0xff] }
 0x1c1   : > { %3955 = vmatprep.subr.bf16.mxu0 %v8255_v12  ;;  %v644_v12 = vld [vmem:[%s13467_s1 + $0xb38] sm:$0xff]  ;;  %v828_v17 = vrot.slane %v11305_v9, %v827_v2 }
 0x1c2   : > { %3995 = vmatpush2.bf16.msra.mxu1 %v8526_v11  ;;  %v396_v11 = vld [vmem:[%s13467_s1 + $0x378] sm:$0xff] }
 0x1c3   : > { %3996 = vmatprep.subr.bf16.mxu1 %v8511_v15  ;;  %v652_v15 = vld [vmem:[%s13467_s1 + $0xb78] sm:$0xff]  ;;  %v8161_v21 = vcombine.high %v388_v10, %v396_v11 }
 0x1c4   : > { %3956 = vmatpush2.bf16.msra.mxu0 %v8254_v22  ;;  %v832_v22 = vrot.slane %v11305_v9, %v831_v8  ;;  %v636_v9 = vld [vmem:[%s13467_s1 + $0xaf8] sm:$0xff] }
 0x1c5   : > { %3957 = vmatprep.subr.bf16.mxu0 %v8239_v25  ;;  %v372_v25 = vld [vmem:[%s13467_s1 + $0x2b8] sm:$0xff]  ;;  %v8401_v41 = vcombine.high %v628_v28, %v636_v9 }
 0x1c6   : > { %3997 = vmatpush2.bf16.msra.mxu1 %v8510_v24  ;;  %v8417_v24 = vcombine.high %v644_v12, %v652_v15 }
 0x1c7   : > { %3998 = vmatprep.subr.bf16.mxu1 %v8495_v26  ;;  %v380_v26 = vld [vmem:[%s13467_s1 + $0x2f8] sm:$0xff] }
 0x1c8   : > { %3958 = vmatpush2.bf16.msra.mxu0 %v8238_v32  ;;  %v8160_v32 = vcombine.low %v388_v10, %v396_v11  ;;  %v8144_v52 = vcombine.low %v372_v25, %v380_v26  ;;  %v332_v10 = vld [vmem:[%s13467_s1 + $0x178] sm:$0xff] }
 0x1c9   : > { %3959 = vmatprep.subr.bf16.mxu0 %v8223_v35  ;;  %v8416_v35 = vcombine.low %v644_v12, %v652_v15  ;;  %v580_v11 = vld [vmem:[%s13467_s1 + $0x938] sm:$0xff] }
 0x1ca   : > { %3999 = vmatpush2.bf16.msra.mxu1 %v8494_v34  ;;  %v588_v12 = vld [vmem:[%s13467_s1 + $0x978] sm:$0xff] }
 0x1cb   : > { %4000 = vmatprep.subr.bf16.mxu1 %v8479_v36  ;;  %v8145_v36 = vcombine.high %v372_v25, %v380_v26  ;;  %v572_v25 = vld [vmem:[%s13467_s1 + $0x8f8] sm:$0xff] }
 0x1cc   : > { %3960 = vmatpush2.bf16.msra.mxu0 %v8222_v42  ;;  %v356_v42 = vld [vmem:[%s13467_s1 + $0x238] sm:$0xff] }
 0x1cd   : > { %3961 = vmatprep.subr.bf16.mxu0 %v8207_v46 }
 0x1ce   : > { %4001 = vmatpush2.bf16.msra.mxu1 %v8478_v45  ;;  %v364_v45 = vld [vmem:[%s13467_s1 + $0x278] sm:$0xff] }
 0x1cf   : > { %4002 = vmatprep.subr.bf16.mxu1 %v8463_v48  ;;  %v612_v48 = vld [vmem:[%s13467_s1 + $0xa38] sm:$0xff]  ;;  %v8128_v0 = vcombine.low %v356_v42, %v364_v45 }
 0x1d0   : > { %3962 = vmatpush2.bf16.msra.mxu0 %v8206_v53 }
 0x1d1   : > { %3963 = vmatprep.subr.bf16.mxu0 %v8191_v56 }
 0x1d2   : > { %4003 = vmatpush2.bf16.msra.mxu1 %v8462_v55  ;;  %v8129_v55 = vcombine.high %v356_v42, %v364_v45  ;;  %v540_v42 = vld [vmem:[%s13467_s1 + $0x7f8] sm:$0xff] }
 0x1d3   : > { %4004 = vmatprep.subr.bf16.mxu1 %v8447_v57  ;;  %v8385_v57 = vcombine.high %v612_v48, %v620_v49  ;;  %v788_v45 = vld [vmem:[%s13467_s1 + $0xfb8] sm:$0xff] }
 0x1d4   : > { %3964 = vmatpush2.bf16.msra.mxu0 %v8190_v1  ;;  %v8384_v1 = vcombine.low %v612_v48, %v620_v49 }
 0x1d5   : > { %4015 = vmatprep.subr.bf16.mxu0 %v8177_v5  ;;  %v8369_v5 = vcombine.high %v596_v61, %v604_v62 }
 0x1d6   : > { %4005 = vmatpush2.bf16.msra.mxu1 %v8446_v4 }
 0x1d7   : > { %4056 = vmatprep.subr.bf16.mxu1 %v8433_v6  ;;  %v3721_v27 = vpop.f32.mrf.mxu0  ;;  %3966 = vmatmul.mubr.bf16.vlgmr.msra.gmra.mxu0 %v10275_v16  ;;  %v324_v6 = vld [vmem:[%s13467_s1 + $0x138] sm:$0xff] }
 0x1d8   : > { %v3722_v29 = vadd.f32 %v3721_v27, %v828_v17  ;;  %4016 = vmatpush1.bf16.msra.mxu0 %v8176_v18  ;;  %4047 = vmatprep.mubr.bf16.mxu0 %v10147_v58  ;;  %v8400_v58 = vcombine.low %v628_v28, %v636_v9  ;;  %v8368_v17 = vcombine.low %v596_v61, %v604_v62  ;;  %v500_v62 = vld [vmem:[%s13467_s1 + $0x6b8] sm:$0xff] }
 0x1d9   : > { %v3762_v31 = vpop.f32.mrf.mxu1  ;;  %4007 = vmatmul.mubr.bf16.vlgmr.msra.gmra.mxu1 %v10283_v19  ;;  %v3723_v34 = vpop.f32.mrf.mxu0  ;;  %4017 = vmatprep.subr.bf16.mxu0 %v8161_v21  ;;  %v8097_v18 = vcombine.high %v324_v6, %v332_v10  ;;  %v308_v21 = vld [vmem:[%s13467_s1 + $0xb8] sm:$0xff]  ;;  %v8096_v26 = vcombine.low %v324_v6, %v332_v10  ;;  %v8352_v27 = vcombine.low %v580_v11, %v588_v12 }
 0x1da   : > { %4057 = vmatpush1.bf16.msra.mxu1 %v8432_v20  ;;  %v11535_v37 = vadd.f32 %v3762_v31, %v3722_v29  ;;  %v3724_v39 = vadd.f32 %v3723_v34, %v832_v22  ;;  %4088 = vmatprep.mubr.bf16.mxu1 %v10149_v59  ;;  %v348_v59 = vld [vmem:[%s13467_s1 + $0x1f8] sm:$0xff]  ;;  %v8353_v20 = vcombine.high %v580_v11, %v588_v12 }
 0x1db   : > { %v3764_v38 = vpop.f32.mrf.mxu1  ;;  %4058 = vmatprep.subr.bf16.mxu1 %v8417_v24  ;;  %v3725_v46 = vpop.f32.mrf.mxu0  ;;  %v8113_v4 = vcombine.high %v340_v60, %v348_v59  ;;  %v8112_v15 = vcombine.low %v340_v60, %v348_v59  ;;  %v316_v22 = vld [vmem:[%s13467_s1 + $0xf8] sm:$0xff] }
 0x1dc   : > { %v11551_v50 = vadd.f32 %v3764_v38, %v3724_v39  ;;  %4018 = vmatpush1.bf16.msra.mxu0 %v8160_v32  ;;  %v564_v24 = vld [vmem:[%s13467_s1 + $0x8b8] sm:$0xff]  ;;  %v8081_v28 = vcombine.high %v308_v21, %v316_v22 }
 0x1dd   : > { %v3766_v51 = vpop.f32.mrf.mxu1  ;;  %v3726_v53 = vpop.f32.mrf.mxu0  ;;  %4019 = vmatprep.subr.bf16.mxu0 %v8145_v36  ;;  %v8337_v9 = vcombine.high %v564_v24, %v572_v25  ;;  %v292_v29 = vld [vmem:[%s13467_s1 + $0x38] sm:$0xff]  ;;  %v8336_v36 = vcombine.low %v564_v24, %v572_v25 }
 0x1de   : > { %4059 = vmatpush1.bf16.msra.mxu1 %v8416_v35  ;;  %v300_v31 = vld [vmem:[%s13467_s1 + $0x78] sm:$0xff]  ;;  %v8080_v35 = vcombine.low %v308_v21, %v316_v22 }
 0x1df   : > { %v3767_v56 = vpop.f32.mrf.mxu1  ;;  %4060 = vmatprep.subr.bf16.mxu1 %v8401_v41  ;;  %v548_v32 = vld [vmem:[%s13467_s1 + $0x838] sm:$0xff]  ;;  %v8065_v39 = vcombine.high %v292_v29, %v300_v31  ;;  %v8064_v48 = vcombine.low %v292_v29, %v300_v31 }
 0x1e0   : > { %4020 = vmatpush1.bf16.msra.mxu0 %v8144_v52  ;;  %v556_v34 = vld [vmem:[%s13467_s1 + $0x878] sm:$0xff] }
 0x1e1   : > { %4021 = vmatprep.subr.bf16.mxu0 %v8129_v55  ;;  %v8321_v38 = vcombine.high %v548_v32, %v556_v34  ;;  %v532_v41 = vld [vmem:[%s13467_s1 + $0x7b8] sm:$0xff]  ;;  %v8320_v49 = vcombine.low %v548_v32, %v556_v34 }
 0x1e2   : > { %4061 = vmatpush1.bf16.msra.mxu1 %v8400_v58  ;;  %v796_v46 = vld [vmem:[%s13467_s1 + $0xff8] sm:$0xff]  ;;  %v8305_v51 = vcombine.high %v532_v41, %v540_v42 }
 0x1e3   : > { %4062 = vmatprep.subr.bf16.mxu1 %v8385_v57  ;;  %v8561_v52 = vcombine.high %v788_v45, %v796_v46  ;;  %v516_v53 = vld [vmem:[%s13467_s1 + $0x738] sm:$0xff]  ;;  %v8304_v57 = vcombine.low %v532_v41, %v540_v42  ;;  %v8560_v60 = vcombine.low %v788_v45, %v796_v46 }
 0x1e4   : > { %4022 = vmatpush1.bf16.msra.mxu0 %v8128_v0  ;;  %v524_v58 = vld [vmem:[%s13467_s1 + $0x778] sm:$0xff] }
 0x1e5   : > { %4023 = vmatprep.subr.bf16.mxu0 %v8113_v4  ;;  %v772_v55 = vld [vmem:[%s13467_s1 + $0xf38] sm:$0xff]  ;;  %v8289_v59 = vcombine.high %v516_v53, %v524_v58 }
 0x1e6   : > { %4063 = vmatpush1.bf16.msra.mxu1 %v8384_v1  ;;  %v780_v56 = vld [vmem:[%s13467_s1 + $0xf78] sm:$0xff] }
 0x1e7   : > { %4064 = vmatprep.subr.bf16.mxu1 %v8369_v5  ;;  %v8545_v61 = vcombine.high %v772_v55, %v780_v56  ;;  %v508_v0 = vld [vmem:[%s13467_s1 + $0x6f8] sm:$0xff]  ;;  %v8288_v5 = vcombine.low %v516_v53, %v524_v58  ;;  %v8544_v6 = vcombine.low %v772_v55, %v780_v56 }
 0x1e8   : > { %4024 = vmatpush1.bf16.msra.mxu0 %v8112_v15  ;;  %v756_v1 = vld [vmem:[%s13467_s1 + $0xeb8] sm:$0xff]  ;;  %v8273_v10 = vcombine.high %v500_v62, %v508_v0 }
 0x1e9   : > { %4025 = vmatprep.subr.bf16.mxu0 %v8097_v18  ;;  %v764_v4 = vld [vmem:[%s13467_s1 + $0xef8] sm:$0xff] }
 0x1ea   : > { %4065 = vmatpush1.bf16.msra.mxu1 %v8368_v17  ;;  %v8529_v11 = vcombine.high %v756_v1, %v764_v4  ;;  %v484_v12 = vld [vmem:[%s13467_s1 + $0x638] sm:$0xff]  ;;  %v8528_v21 = vcombine.low %v756_v1, %v764_v4 }
 0x1eb   : > { %4066 = vmatprep.subr.bf16.mxu1 %v8353_v20  ;;  %v492_v15 = vld [vmem:[%s13467_s1 + $0x678] sm:$0xff]  ;;  %v8272_v20 = vcombine.low %v500_v62, %v508_v0 }
 0x1ec   : > { %4026 = vmatpush1.bf16.msra.mxu0 %v8096_v26  ;;  %v740_v17 = vld [vmem:[%s13467_s1 + $0xe38] sm:$0xff]  ;;  %v8257_v22 = vcombine.high %v484_v12, %v492_v15 }
 0x1ed   : > { %4027 = vmatprep.subr.bf16.mxu0 %v8081_v28  ;;  %v748_v18 = vld [vmem:[%s13467_s1 + $0xe78] sm:$0xff] }
 0x1ee   : > { %4067 = vmatpush1.bf16.msra.mxu1 %v8352_v27  ;;  %v8513_v24 = vcombine.high %v740_v17, %v748_v18  ;;  %v468_v25 = vld [vmem:[%s13467_s1 + $0x5b8] sm:$0xff]  ;;  %v8512_v29 = vcombine.low %v740_v17, %v748_v18  ;;  %v9120_v18 = vld [vmem:[%s13469_s3 + $0xe0] ss:$16 sps:$4 sm:$0xff]  }
 0x1ef   : > { %4068 = vmatprep.subr.bf16.mxu1 %v8337_v9  ;;  %v476_v26 = vld [vmem:[%s13467_s1 + $0x5f8] sm:$0xff]  ;;  %v8256_v9 = vcombine.low %v484_v12, %v492_v15  ;;  %v4098_v12 = vmax.f32 %v10920_v13, 0.0  ;;  %v4100_v15 = vmax.f32 %v11130_v54, 0.0  ;;  %v9128_v54 = vld [vmem:[%s13469_s3 + $0xc4] ss:$16 sps:$4 sm:$0xff]  }
 0x1f0   : > { %4028 = vmatpush1.bf16.msra.mxu0 %v8080_v35  ;;  %v724_v27 = vld [vmem:[%s13467_s1 + $0xdb8] sm:$0xff]  ;;  %v8241_v31 = vcombine.high %v468_v25, %v476_v26 }
 0x1f1   : > { %4029 = vmatprep.subr.bf16.mxu0 %v8065_v39  ;;  %v732_v28 = vld [vmem:[%s13467_s1 + $0xdf8] sm:$0xff] }
 0x1f2   : > { %4069 = vmatpush1.bf16.msra.mxu1 %v8336_v36  ;;  %v8497_v32 = vcombine.high %v724_v27, %v732_v28  ;;  %v452_v34 = vld [vmem:[%s13467_s1 + $0x538] sm:$0xff]  ;;  %v8496_v41 = vcombine.low %v724_v27, %v732_v28  ;;  %v9126_v28 = vld [vmem:[%s13469_s3 + $0xc0] ss:$16 sps:$4 sm:$0xff]  }
 0x1f3   : > { %4070 = vmatprep.subr.bf16.mxu1 %v8321_v38  ;;  %v460_v35 = vld [vmem:[%s13467_s1 + $0x578] sm:$0xff]  ;;  %v8240_v38 = vcombine.low %v468_v25, %v476_v26  ;;  %v11729_v25 = vpack.c.bf16 %v4100_v15, %v4100_v15  ;;  %v9173_v15 = vld [vmem:[%s13469_s3 + $0x3e4] ss:$16 sps:$4 sm:$0xff]  }
 0x1f4   : > { %4030 = vmatpush1.bf16.msra.mxu0 %v8064_v48  ;;  %v708_v36 = vld [vmem:[%s13467_s1 + $0xd38] sm:$0xff]  ;;  %v8225_v42 = vcombine.high %v452_v34, %v460_v35 }
 0x1f5   : > { %4031 = vmatprep.subr.bf16.mxu0 %v8305_v51  ;;  %v716_v39 = vld [vmem:[%s13467_s1 + $0xd78] sm:$0xff] }
 0x1f6   : > { %4071 = vmatpush1.bf16.msra.mxu1 %v8320_v49  ;;  %v8481_v45 = vcombine.high %v708_v36, %v716_v39  ;;  %v436_v46 = vld [vmem:[%s13467_s1 + $0x4b8] sm:$0xff]  ;;  %v8480_v53 = vcombine.low %v708_v36, %v716_v39 }
 0x1f7   : > { %4072 = vmatprep.subr.bf16.mxu1 %v8561_v52  ;;  %v444_v48 = vld [vmem:[%s13467_s1 + $0x4f8] sm:$0xff]  ;;  %v8224_v52 = vcombine.low %v452_v34, %v460_v35  ;;  %v9137_v34 = vld [vmem:[%s13469_s3 + $0x2a4] ss:$16 sps:$4 sm:$0xff]  }
 0x1f8   : > { %4032 = vmatpush2.bf16.msra.mxu0 %v8304_v57  ;;  %v692_v49 = vld [vmem:[%s13467_s1 + $0xcb8] sm:$0xff]  ;;  %v8209_v58 = vcombine.high %v436_v46, %v444_v48 }
 0x1f9   : > { %4033 = vmatprep.subr.bf16.mxu0 %v8289_v59  ;;  %v700_v51 = vld [vmem:[%s13467_s1 + $0xcf8] sm:$0xff] }
 0x1fa   : > { %4073 = vmatpush2.bf16.msra.mxu1 %v8560_v60  ;;  %v8465_v55 = vcombine.high %v692_v49, %v700_v51  ;;  %v420_v56 = vld [vmem:[%s13467_s1 + $0x438] sm:$0xff]  ;;  %v8464_v62 = vcombine.low %v692_v49, %v700_v51  ;;  %v9138_v49 = vld [vmem:[%s13469_s3 + $0x80] ss:$16 sps:$4 sm:$0xff]  }
 0x1fb   : > { %4074 = vmatprep.subr.bf16.mxu1 %v8545_v61  ;;  %v428_v57 = vld [vmem:[%s13467_s1 + $0x478] sm:$0xff]  ;;  %v8208_v61 = vcombine.low %v436_v46, %v444_v48  ;;  %v9143_v48 = vld [vmem:[%s13469_s3 + $0x284] ss:$16 sps:$4 sm:$0xff]   ;;  %v9141_v51 = vld [vmem:[%s13469_s3 + $0x280] ss:$16 sps:$4 sm:$0xff]  }
 0x1fc   : > { %4034 = vmatpush2.bf16.msra.mxu0 %v8288_v5  ;;  %v676_v60 = vld [vmem:[%s13467_s1 + $0xc38] sm:$0xff]  ;;  %v8193_v0 = vcombine.high %v420_v56, %v428_v57  ;;  %v8192_v4 = vcombine.low %v420_v56, %v428_v57  ;;  %v9152_v56 = vld [vmem:[%s13469_s3 + $0x44] ss:$16 sps:$4 sm:$0xff]  }
 0x1fd   : > { %4035 = vmatprep.subr.bf16.mxu0 %v8273_v10  ;;  %v684_v59 = vld [vmem:[%s13467_s1 + $0xc78] sm:$0xff]  ;;  %v9122_v10 = vld [vmem:[%s13469_s3 + $0xe4] ss:$16 sps:$4 sm:$0xff]  }
 0x1fe   : > { %4075 = vmatpush2.bf16.msra.mxu1 %v8544_v6  ;;  %v8449_v1 = vcombine.high %v676_v60, %v684_v59  ;;  %v8448_v5 = vcombine.low %v676_v60, %v684_v59  ;;  %v11700_v6 = vld [vmem:[%s13468_s2 + $0x8] sm:$0xff]  ;;  %v9155_v57 = vld [vmem:[%s13469_s3 + $0x244] ss:$16 sps:$4 sm:$0xff]   ;;  %v9150_v60 = vld [vmem:[%s13469_s3 + $0x40] ss:$16 sps:$4 sm:$0xff]  }
 0x1ff   : > { %4076 = vmatprep.subr.bf16.mxu1 %v8529_v11  ;;  %v9125_v11 = vld [vmem:[%s13469_s3 + $0x2e4] ss:$16 sps:$4 sm:$0xff]   ;;  %v836_v17 = vrot.slane %v11700_v6, %v10869_v40  ;;  %v840_v13 = vrot.slane %v11700_v6, %v10881_v47  ;;  %v9153_v59 = vld [vmem:[%s13469_s3 + $0x240] ss:$16 sps:$4 sm:$0xff]  }
 0x200   : > { %4036 = vmatpush2.bf16.msra.mxu0 %v8272_v20  ;;  %v9123_v20 = vld [vmem:[%s13469_s3 + $0x2e0] ss:$16 sps:$4 sm:$0xff]  }
 0x201   : > { %4037 = vmatprep.subr.bf16.mxu0 %v8257_v22 }
 0x202   : > { %4077 = vmatpush2.bf16.msra.mxu1 %v8528_v21  ;;  %v11723_v21 = vpack.c.bf16 %v4098_v12, %v4098_v12  ;;  %v9170_v12 = vld [vmem:[%s13469_s3 + $0x1e4] ss:$16 sps:$4 sm:$0xff]  }
 0x203   : > { %4078 = vmatprep.subr.bf16.mxu1 %v8513_v24  ;;  %v9131_v24 = vld [vmem:[%s13469_s3 + $0x2c4] ss:$16 sps:$4 sm:$0xff]  }
 0x204   : > { %4038 = vmatpush2.bf16.msra.mxu0 %v8256_v9 }
 0x205   : > { %4039 = vmatprep.subr.bf16.mxu0 %v8241_v31 }
 0x206   : > { %4079 = vmatpush2.bf16.msra.mxu1 %v8512_v29  ;;  %v9134_v29 = vld [vmem:[%s13469_s3 + $0xa4] ss:$16 sps:$4 sm:$0xff]  }
 0x207   : > { %4080 = vmatprep.subr.bf16.mxu1 %v8497_v32 }
 0x208   : > { %4040 = vmatpush2.bf16.msra.mxu0 %v8240_v38  ;;  %v9132_v38 = vld [vmem:[%s13469_s3 + $0xa0] ss:$16 sps:$4 sm:$0xff]  }
 0x209   : > { %4041 = vmatprep.subr.bf16.mxu0 %v8225_v42  ;;  %v9135_v42 = vld [vmem:[%s13469_s3 + $0x2a0] ss:$16 sps:$4 sm:$0xff]  }
 0x20a   : > { %4081 = vmatpush2.bf16.msra.mxu1 %v8496_v41 }
 0x20b   : > { %4082 = vmatprep.subr.bf16.mxu1 %v8481_v45  ;;  %v9140_v45 = vld [vmem:[%s13469_s3 + $0x84] ss:$16 sps:$4 sm:$0xff]  }
 0x20c   : > { %4042 = vmatpush2.bf16.msra.mxu0 %v8224_v52  ;;  %v9146_v52 = vld [vmem:[%s13469_s3 + $0x64] ss:$16 sps:$4 sm:$0xff]  }
 0x20d   : > { %4043 = vmatprep.subr.bf16.mxu0 %v8209_v58  ;;  %v9144_v58 = vld [vmem:[%s13469_s3 + $0x60] ss:$16 sps:$4 sm:$0xff]  }
 0x20e   : > { %4083 = vmatpush2.bf16.msra.mxu1 %v8480_v53  ;;  %v9149_v53 = vld [vmem:[%s13469_s3 + $0x264] ss:$16 sps:$4 sm:$0xff]  }
 0x20f   : > { %4084 = vmatprep.subr.bf16.mxu1 %v8465_v55  ;;  %v9147_v55 = vld [vmem:[%s13469_s3 + $0x260] ss:$16 sps:$4 sm:$0xff]  }
 0x210   : > { %4044 = vmatpush2.bf16.msra.mxu0 %v8208_v61  ;;  %v9158_v61 = vld [vmem:[%s13469_s3 + $0x24] ss:$16 sps:$4 sm:$0xff]  }
 0x211   : > { %4045 = vmatprep.subr.bf16.mxu0 %v8193_v0  ;;  %v9156_v0 = vld [vmem:[%s13469_s3 + $0x20] ss:$16 sps:$4 sm:$0xff]  }
 0x212   : > { %4085 = vmatpush2.bf16.msra.mxu1 %v8464_v62  ;;  %v9161_v62 = vld [vmem:[%s13469_s3 + $0x224] ss:$16 sps:$4 sm:$0xff]  }
 0x213   : > { %4086 = vmatprep.subr.bf16.mxu1 %v8449_v1  ;;  %v9159_v1 = vld [vmem:[%s13469_s3 + $0x220] ss:$16 sps:$4 sm:$0xff]  }
 0x214   : > { %4046 = vmatpush2.bf16.msra.mxu0 %v8192_v4  ;;  %v9164_v4 = vld [vmem:[%s13469_s3 + $0x4] ss:$16 sps:$4 sm:$0xff]  }
 0x215   : > { %7223 = vmatprep.subr.bf16.mxu0 %v9122_v10  ;;  %v9162_v10 = vld [vmem:[%s13469_s3] ss:$16 sps:$4 sm:$0xff]  }
 0x216   : > { %4087 = vmatpush2.bf16.msra.mxu1 %v8448_v5  ;;  %v9167_v5 = vld [vmem:[%s13469_s3 + $0x204] ss:$16 sps:$4 sm:$0xff]  }
 0x217   : > { %7264 = vmatprep.subr.bf16.mxu1 %v9125_v11  ;;  %v3803_v22 = vpop.f32.mrf.mxu0  ;;  %4048 = vmatmul.mubr.bf16.vlgmr.msra.gmra.mxu0 %v10275_v16  ;;  %v9129_v16 = vld [vmem:[%s13469_s3 + $0x2c0] ss:$16 sps:$4 sm:$0xff]  }
 0x218   : > { %v3804_v26 = vadd.f32 %v3803_v22, %v836_v17  ;;  %7224 = vmatpush1.bf16.msra.mxu0 %v9120_v18  ;;  %7255 = vmatprep.mubr.bf16.mxu0 %v11723_v21  ;;  %v9165_v11 = vld [vmem:[%s13469_s3 + $0x200] ss:$16 sps:$4 sm:$0xff]  }
 0x219   : > { %v3844_v27 = vpop.f32.mrf.mxu1  ;;  %4089 = vmatmul.mubr.bf16.vlgmr.msra.gmra.mxu1 %v10283_v19  ;;  %v3805_v9 = vpop.f32.mrf.mxu0  ;;  %7225 = vmatprep.subr.bf16.mxu0 %v9128_v54  ;;  %v9168_v17 = vld [vmem:[%s13469_s3 + $0x1e0] ss:$16 sps:$4 sm:$0xff]  }
 0x21a   : > { %7265 = vmatpush1.bf16.msra.mxu1 %v9123_v20  ;;  %v11742_v31 = vadd.f32 %v3844_v27, %v3804_v26  ;;  %7296 = vmatprep.mubr.bf16.mxu1 %v11729_v25  ;;  %v3806_v19 = vadd.f32 %v3805_v9, %v840_v13  ;;  %v9171_v18 = vld [vmem:[%s13469_s3 + $0x3e0] ss:$16 sps:$4 sm:$0xff]   ;;  %v9176_v20 = vld [vmem:[%s13469_s3 + $0x1c4] ss:$16 sps:$4 sm:$0xff]  }
 0x21b   : > { %v3846_v32 = vpop.f32.mrf.mxu1  ;;  %v3807_v35 = vpop.f32.mrf.mxu0  ;;  %7266 = vmatprep.subr.bf16.mxu1 %v9131_v24  ;;  %v9179_v13 = vld [vmem:[%s13469_s3 + $0x3c4] ss:$16 sps:$4 sm:$0xff]   ;;  %v9174_v54 = vld [vmem:[%s13469_s3 + $0x1c0] ss:$16 sps:$4 sm:$0xff]  }
 0x21c   : > { %v11748_v36 = vadd.f32 %v3846_v32, %v3806_v19  ;;  %7226 = vmatpush1.bf16.msra.mxu0 %v9126_v28  ;;  %v9177_v22 = vld [vmem:[%s13469_s3 + $0x3c0] ss:$16 sps:$4 sm:$0xff]   ;;  %v9182_v24 = vld [vmem:[%s13469_s3 + $0x1a4] ss:$16 sps:$4 sm:$0xff]  }
 0x21d   : > { %v3848_v39 = vpop.f32.mrf.mxu1  ;;  %v3808_v41 = vpop.f32.mrf.mxu0  ;;  %7227 = vmatprep.subr.bf16.mxu0 %v9134_v29  ;;  %v9185_v26 = vld [vmem:[%s13469_s3 + $0x3a4] ss:$16 sps:$4 sm:$0xff]   ;;  %v9180_v27 = vld [vmem:[%s13469_s3 + $0x1a0] ss:$16 sps:$4 sm:$0xff]  }
 0x21e   : > { %7267 = vmatpush1.bf16.msra.mxu1 %v9129_v16  ;;  %v9183_v28 = vld [vmem:[%s13469_s3 + $0x3a0] ss:$16 sps:$4 sm:$0xff]   ;;  %v9188_v9 = vld [vmem:[%s13469_s3 + $0x184] ss:$16 sps:$4 sm:$0xff]  }
 0x21f   : > { %v3849_v46 = vpop.f32.mrf.mxu1  ;;  %7268 = vmatprep.subr.bf16.mxu1 %v9137_v34  ;;  %v9191_v16 = vld [vmem:[%s13469_s3 + $0x384] ss:$16 sps:$4 sm:$0xff]   ;;  %v9186_v29 = vld [vmem:[%s13469_s3 + $0x180] ss:$16 sps:$4 sm:$0xff]  }
 0x220   : > { %7228 = vmatpush1.bf16.msra.mxu0 %v9132_v38  ;;  %v9189_v19 = vld [vmem:[%s13469_s3 + $0x380] ss:$16 sps:$4 sm:$0xff]   ;;  %v9194_v32 = vld [vmem:[%s13469_s3 + $0x164] ss:$16 sps:$4 sm:$0xff]  }
 0x221   : > { %7229 = vmatprep.subr.bf16.mxu0 %v9140_v45  ;;  %v9197_v34 = vld [vmem:[%s13469_s3 + $0x364] ss:$16 sps:$4 sm:$0xff]   ;;  %v9192_v35 = vld [vmem:[%s13469_s3 + $0x160] ss:$16 sps:$4 sm:$0xff]  }
 0x222   : > { %7269 = vmatpush1.bf16.msra.mxu1 %v9135_v42  ;;  %v9195_v39 = vld [vmem:[%s13469_s3 + $0x360] ss:$16 sps:$4 sm:$0xff]   ;;  %v9200_v38 = vld [vmem:[%s13469_s3 + $0x144] ss:$16 sps:$4 sm:$0xff]  }
 0x223   : > { %7270 = vmatprep.subr.bf16.mxu1 %v9143_v48  ;;  %v9203_v41 = vld [vmem:[%s13469_s3 + $0x344] ss:$16 sps:$4 sm:$0xff]   ;;  %v9198_v42 = vld [vmem:[%s13469_s3 + $0x140] ss:$16 sps:$4 sm:$0xff]  }
 0x224   : > { %7230 = vmatpush1.bf16.msra.mxu0 %v9138_v49  ;;  %v9201_v45 = vld [vmem:[%s13469_s3 + $0x340] ss:$16 sps:$4 sm:$0xff]   ;;  %v9206_v46 = vld [vmem:[%s13469_s3 + $0x124] ss:$16 sps:$4 sm:$0xff]  }
 0x225   : > { %7231 = vmatprep.subr.bf16.mxu0 %v9146_v52  ;;  %v9209_v48 = vld [vmem:[%s13469_s3 + $0x324] ss:$16 sps:$4 sm:$0xff]   ;;  %v9204_v49 = vld [vmem:[%s13469_s3 + $0x120] ss:$16 sps:$4 sm:$0xff]  }
 0x226   : > { %7271 = vmatpush1.bf16.msra.mxu1 %v9141_v51  ;;  %v9207_v51 = vld [vmem:[%s13469_s3 + $0x320] ss:$16 sps:$4 sm:$0xff]   ;;  %v9212_v52 = vld [vmem:[%s13469_s3 + $0x104] ss:$16 sps:$4 sm:$0xff]  }
 0x227   : > { %7272 = vmatprep.subr.bf16.mxu1 %v9149_v53  ;;  %v9215_v53 = vld [vmem:[%s13469_s3 + $0x304] ss:$16 sps:$4 sm:$0xff]  }
 0x228   : > { %7232 = vmatpush1.bf16.msra.mxu0 %v9144_v58  ;;  %v9210_v58 = vld [vmem:[%s13469_s3 + $0x100] ss:$16 sps:$4 sm:$0xff]  }
 0x229   : > { %7233 = vmatprep.subr.bf16.mxu0 %v9152_v56  ;;  %v9213_v56 = vld [vmem:[%s13469_s3 + $0x300] ss:$16 sps:$4 sm:$0xff]  }
 0x22a   : > { %7273 = vmatpush1.bf16.msra.mxu1 %v9147_v55  ;;  %v4097_v55 = vmax.f32 %v10913_v7, 0.0  ;;  %v4104_v7 = vmax.f32 %v11551_v50, 0.0 }
 0x22b   : > { %7274 = vmatprep.subr.bf16.mxu1 %v9155_v57  ;;  %v9218_v57 = vld [vmem:[%s13469_s3 + $0x4e4] ss:$16 sps:$4 sm:$0xff]  }
 0x22c   : > { %7234 = vmatpush1.bf16.msra.mxu0 %v9150_v60  ;;  %v4099_v60 = vmax.f32 %v11114_v44, 0.0  ;;  %v9219_v44 = vld [vmem:[%s13469_s3 + $0x6e0] ss:$16 sps:$4 sm:$0xff]  }
 0x22d   : > { %7235 = vmatprep.subr.bf16.mxu0 %v9158_v61  ;;  %v4102_v61 = vmax.f32 %v11343_v43, 0.0  ;;  %v9224_v43 = vld [vmem:[%s13469_s3 + $0x4c4] ss:$16 sps:$4 sm:$0xff]  }
 0x22e   : > { %7275 = vmatpush1.bf16.msra.mxu1 %v9153_v59  ;;  %v9221_v59 = vld [vmem:[%s13469_s3 + $0x6e4] ss:$16 sps:$4 sm:$0xff]  }
 0x22f   : > { %7276 = vmatprep.subr.bf16.mxu1 %v9161_v62  ;;  %v844_v62 = vrot.slane %v11700_v6, %v11079_v14  ;;  %v11937_v50 = vpack.c.bf16 %v4102_v61, %v4102_v61  ;;  %v9269_v61 = vld [vmem:[%s13469_s3 + $0x7e4] ss:$16 sps:$4 sm:$0xff]  }
 0x230   : > { %7236 = vmatpush1.bf16.msra.mxu0 %v9156_v0  ;;  %v9216_v0 = vld [vmem:[%s13469_s3 + $0x4e0] ss:$16 sps:$4 sm:$0xff]  }
 0x231   : > { %7237 = vmatprep.subr.bf16.mxu0 %v9164_v4  ;;  %v11932_v4 = vpack.c.bf16 %v4099_v60, %v4099_v60  ;;  %v9261_v60 = vld [vmem:[%s13469_s3 + $0x600] ss:$16 sps:$4 sm:$0xff]  }
 0x232   : > { %7277 = vmatpush1.bf16.msra.mxu1 %v9159_v1  ;;  %v11927_v1 = vpack.c.bf16 %v4097_v55, %v4097_v55  ;;  %v9260_v55 = vld [vmem:[%s13469_s3 + $0x404] ss:$16 sps:$4 sm:$0xff]  }
 0x233   : > { %7278 = vmatprep.subr.bf16.mxu1 %v9167_v5 }
 0x234   : > { %7238 = vmatpush1.bf16.msra.mxu0 %v9162_v10  ;;  %v9227_v10 = vld [vmem:[%s13469_s3 + $0x6c4] ss:$16 sps:$4 sm:$0xff]  }
 0x235   : > { %7239 = vmatprep.subr.bf16.mxu0 %v9170_v12 }
 0x236   : > { %7279 = vmatpush1.bf16.msra.mxu1 %v9165_v11  ;;  %v11943_v11 = vpack.c.bf16 %v4104_v7, %v4104_v7  ;;  %v9264_v7 = vld [vmem:[%s13469_s3 + $0x5e0] ss:$16 sps:$4 sm:$0xff]  }
 0x237   : > { %7280 = vmatprep.subr.bf16.mxu1 %v9173_v15 }
 0x238   : > { %7240 = vmatpush2.bf16.msra.mxu0 %v9168_v17  ;;  %v9222_v17 = vld [vmem:[%s13469_s3 + $0x4c0] ss:$16 sps:$4 sm:$0xff]  }
 0x239   : > { %7241 = vmatprep.subr.bf16.mxu0 %v9176_v20  ;;  %v9225_v20 = vld [vmem:[%s13469_s3 + $0x6c0] ss:$16 sps:$4 sm:$0xff]  }
 0x23a   : > { %7281 = vmatpush2.bf16.msra.mxu1 %v9171_v18 }
 0x23b   : > { %7282 = vmatprep.subr.bf16.mxu1 %v9179_v13  ;;  %v9230_v13 = vld [vmem:[%s13469_s3 + $0x4a4] ss:$16 sps:$4 sm:$0xff]  }
 0x23c   : > { %7242 = vmatpush2.bf16.msra.mxu0 %v9174_v54 }
 0x23d   : > { %7243 = vmatprep.subr.bf16.mxu0 %v9182_v24  ;;  %v9233_v24 = vld [vmem:[%s13469_s3 + $0x6a4] ss:$16 sps:$4 sm:$0xff]  }
 0x23e   : > { %7283 = vmatpush2.bf16.msra.mxu1 %v9177_v22 }
 0x23f   : > { %7284 = vmatprep.subr.bf16.mxu1 %v9185_v26 }
 0x240   : > { %7244 = vmatpush2.bf16.msra.mxu0 %v9180_v27 }
 0x241   : > { %7245 = vmatprep.subr.bf16.mxu0 %v9188_v9 }
 0x242   : > { %7285 = vmatpush2.bf16.msra.mxu1 %v9183_v28  ;;  %v9228_v28 = vld [vmem:[%s13469_s3 + $0x4a0] ss:$16 sps:$4 sm:$0xff]  }
 0x243   : > { %7286 = vmatprep.subr.bf16.mxu1 %v9191_v16  ;;  %v9231_v16 = vld [vmem:[%s13469_s3 + $0x6a0] ss:$16 sps:$4 sm:$0xff]  }
 0x244   : > { %7246 = vmatpush2.bf16.msra.mxu0 %v9186_v29  ;;  %v9236_v29 = vld [vmem:[%s13469_s3 + $0x484] ss:$16 sps:$4 sm:$0xff]  }
 0x245   : > { %7247 = vmatprep.subr.bf16.mxu0 %v9194_v32  ;;  %v9239_v32 = vld [vmem:[%s13469_s3 + $0x684] ss:$16 sps:$4 sm:$0xff]  }
 0x246   : > { %7287 = vmatpush2.bf16.msra.mxu1 %v9189_v19 }
 0x247   : > { %7288 = vmatprep.subr.bf16.mxu1 %v9197_v34  ;;  %v9234_v34 = vld [vmem:[%s13469_s3 + $0x480] ss:$16 sps:$4 sm:$0xff]  }
 0x248   : > { %7248 = vmatpush2.bf16.msra.mxu0 %v9192_v35  ;;  %v9237_v35 = vld [vmem:[%s13469_s3 + $0x680] ss:$16 sps:$4 sm:$0xff]  }
 0x249   : > { %7249 = vmatprep.subr.bf16.mxu0 %v9200_v38  ;;  %v9245_v38 = vld [vmem:[%s13469_s3 + $0x664] ss:$16 sps:$4 sm:$0xff]  }
 0x24a   : > { %7289 = vmatpush2.bf16.msra.mxu1 %v9195_v39  ;;  %v9242_v39 = vld [vmem:[%s13469_s3 + $0x464] ss:$16 sps:$4 sm:$0xff]  }
 0x24b   : > { %7290 = vmatprep.subr.bf16.mxu1 %v9203_v41  ;;  %v9240_v41 = vld [vmem:[%s13469_s3 + $0x460] ss:$16 sps:$4 sm:$0xff]  }
 0x24c   : > { %7250 = vmatpush2.bf16.msra.mxu0 %v9198_v42  ;;  %v9243_v42 = vld [vmem:[%s13469_s3 + $0x660] ss:$16 sps:$4 sm:$0xff]  }
 0x24d   : > { %7251 = vmatprep.subr.bf16.mxu0 %v9206_v46  ;;  %v9251_v46 = vld [vmem:[%s13469_s3 + $0x644] ss:$16 sps:$4 sm:$0xff]  }
 0x24e   : > { %7291 = vmatpush2.bf16.msra.mxu1 %v9201_v45  ;;  %v9248_v45 = vld [vmem:[%s13469_s3 + $0x444] ss:$16 sps:$4 sm:$0xff]  }
 0x24f   : > { %7292 = vmatprep.subr.bf16.mxu1 %v9209_v48  ;;  %v9246_v48 = vld [vmem:[%s13469_s3 + $0x440] ss:$16 sps:$4 sm:$0xff]  }
 0x250   : > { %7252 = vmatpush2.bf16.msra.mxu0 %v9204_v49  ;;  %v9249_v49 = vld [vmem:[%s13469_s3 + $0x640] ss:$16 sps:$4 sm:$0xff]  }
 0x251   : > { %7253 = vmatprep.subr.bf16.mxu0 %v9212_v52  ;;  %v9257_v52 = vld [vmem:[%s13469_s3 + $0x624] ss:$16 sps:$4 sm:$0xff]  }
 0x252   : > { %7293 = vmatpush2.bf16.msra.mxu1 %v9207_v51  ;;  %v9254_v51 = vld [vmem:[%s13469_s3 + $0x424] ss:$16 sps:$4 sm:$0xff]  }
 0x253   : > { %7294 = vmatprep.subr.bf16.mxu1 %v9215_v53  ;;  %v9252_v53 = vld [vmem:[%s13469_s3 + $0x420] ss:$16 sps:$4 sm:$0xff]  }
 0x254   : > { %7254 = vmatpush2.bf16.msra.mxu0 %v9210_v58  ;;  %v9255_v58 = vld [vmem:[%s13469_s3 + $0x620] ss:$16 sps:$4 sm:$0xff]  }
 0x255   : > { %7305 = vmatprep.subr.bf16.mxu0 %v9218_v57  ;;  %v9258_v57 = vld [vmem:[%s13469_s3 + $0x400] ss:$16 sps:$4 sm:$0xff]  }
 0x256   : > { %7295 = vmatpush2.bf16.msra.mxu1 %v9213_v56  ;;  %v9263_v56 = vld [vmem:[%s13469_s3 + $0x604] ss:$16 sps:$4 sm:$0xff]  }
 0x257   : > { %7346 = vmatprep.subr.bf16.mxu1 %v9221_v59  ;;  %v3885_v5 = vpop.f32.mrf.mxu0  ;;  %7256 = vmatmul.mubr.bf16.vlgmr.msra.gmra.mxu0 %v11927_v1  ;;  %v9266_v59 = vld [vmem:[%s13469_s3 + $0x5e4] ss:$16 sps:$4 sm:$0xff]  }
 0x258   : > { %v3886_v12 = vadd.f32 %v3885_v5, %v844_v62  ;;  %7306 = vmatpush1.bf16.msra.mxu0 %v9216_v0  ;;  %7337 = vmatprep.mubr.bf16.mxu0 %v11937_v50  ;;  %v9267_v62 = vld [vmem:[%s13469_s3 + $0x7e0] ss:$16 sps:$4 sm:$0xff]   ;;  %v9272_v0 = vld [vmem:[%s13469_s3 + $0x5c4] ss:$16 sps:$4 sm:$0xff]  }
 0x259   : > { %v3926_v15 = vpop.f32.mrf.mxu1  ;;  %7297 = vmatmul.mubr.bf16.vlgmr.msra.gmra.mxu1 %v11932_v4  ;;  %v11950_v18 = vpop.f32.mrf.mxu0  ;;  %7307 = vmatprep.subr.bf16.mxu0 %v9224_v43  ;;  %v9270_v43 = vld [vmem:[%s13469_s3 + $0x5c0] ss:$16 sps:$4 sm:$0xff]  }
 0x25a   : > { %7347 = vmatpush1.bf16.msra.mxu1 %v9219_v44  ;;  %v11958_v54 = vadd.f32 %v3926_v15, %v3886_v12  ;;  %7378 = vmatprep.mubr.bf16.mxu1 %v11943_v11  ;;  %v9275_v44 = vld [vmem:[%s13469_s3 + $0x7c4] ss:$16 sps:$4 sm:$0xff]   ;;  %v9273_v5 = vld [vmem:[%s13469_s3 + $0x7c0] ss:$16 sps:$4 sm:$0xff]  }
 0x25b   : > { %v11961_v22 = vpop.f32.mrf.mxu1  ;;  %v3889_v26 = vpop.f32.mrf.mxu0  ;;  %7348 = vmatprep.subr.bf16.mxu1 %v9227_v10  ;;  %v9278_v10 = vld [vmem:[%s13469_s3 + $0x5a4] ss:$16 sps:$4 sm:$0xff]   ;;  %v9276_v15 = vld [vmem:[%s13469_s3 + $0x5a0] ss:$16 sps:$4 sm:$0xff]  }
 0x25c   : > { %7308 = vmatpush1.bf16.msra.mxu0 %v9222_v17  ;;  %v9281_v12 = vld [vmem:[%s13469_s3 + $0x7a4] ss:$16 sps:$4 sm:$0xff]   ;;  %v9279_v17 = vld [vmem:[%s13469_s3 + $0x7a0] ss:$16 sps:$4 sm:$0xff]  }
 0x25d   : > { %v3930_v27 = vpop.f32.mrf.mxu1  ;;  %v3890_v9 = vpop.f32.mrf.mxu0  ;;  %7309 = vmatprep.subr.bf16.mxu0 %v9230_v13  ;;  %v9287_v13 = vld [vmem:[%s13469_s3 + $0x784] ss:$16 sps:$4 sm:$0xff]   ;;  %v9285_v26 = vld [vmem:[%s13469_s3 + $0x780] ss:$16 sps:$4 sm:$0xff]  }
 0x25e   : > { %7349 = vmatpush1.bf16.msra.mxu1 %v9225_v20  ;;  %v9284_v20 = vld [vmem:[%s13469_s3 + $0x584] ss:$16 sps:$4 sm:$0xff]   ;;  %v9288_v9 = vld [vmem:[%s13469_s3 + $0x560] ss:$16 sps:$4 sm:$0xff]  }
 0x25f   : > { %v3931_v19 = vpop.f32.mrf.mxu1  ;;  %7350 = vmatprep.subr.bf16.mxu1 %v9233_v24  ;;  %v9282_v24 = vld [vmem:[%s13469_s3 + $0x580] ss:$16 sps:$4 sm:$0xff]   ;;  %v9290_v27 = vld [vmem:[%s13469_s3 + $0x564] ss:$16 sps:$4 sm:$0xff]  }
 0x260   : > { %7310 = vmatpush1.bf16.msra.mxu0 %v9228_v28  ;;  %v9293_v28 = vld [vmem:[%s13469_s3 + $0x764] ss:$16 sps:$4 sm:$0xff]  }
 0x261   : > { %7311 = vmatprep.subr.bf16.mxu0 %v9236_v29  ;;  %v9296_v29 = vld [vmem:[%s13469_s3 + $0x544] ss:$16 sps:$4 sm:$0xff]  }
 0x262   : > { %7351 = vmatpush1.bf16.msra.mxu1 %v9231_v16  ;;  %v9291_v16 = vld [vmem:[%s13469_s3 + $0x760] ss:$16 sps:$4 sm:$0xff]   ;;  %v9299_v19 = vld [vmem:[%s13469_s3 + $0x744] ss:$16 sps:$4 sm:$0xff]  }
 0x263   : > { %7352 = vmatprep.subr.bf16.mxu1 %v9239_v32  ;;  %v848_v32 = vrot.slane %v11700_v6, %v11091_v23 }
 0x264   : > { %7312 = vmatpush1.bf16.msra.mxu0 %v9234_v34  ;;  %v9294_v34 = vld [vmem:[%s13469_s3 + $0x540] ss:$16 sps:$4 sm:$0xff]  }
 0x265   : > { %7313 = vmatprep.subr.bf16.mxu0 %v9242_v39  ;;  %v9302_v39 = vld [vmem:[%s13469_s3 + $0x524] ss:$16 sps:$4 sm:$0xff]  }
 0x266   : > { %7353 = vmatpush1.bf16.msra.mxu1 %v9237_v35  ;;  %v9297_v35 = vld [vmem:[%s13469_s3 + $0x740] ss:$16 sps:$4 sm:$0xff]  }
 0x267   : > { %7354 = vmatprep.subr.bf16.mxu1 %v9245_v38  ;;  %v9305_v38 = vld [vmem:[%s13469_s3 + $0x724] ss:$16 sps:$4 sm:$0xff]  }
 0x268   : > { %7314 = vmatpush1.bf16.msra.mxu0 %v9240_v41  ;;  %v3888_v41 = vadd.f32 %v11950_v18, %v848_v32  ;;  %v9311_v18 = vld [vmem:[%s13469_s3 + $0x704] ss:$16 sps:$4 sm:$0xff]   ;;  %v9333_v32 = vld [vmem:[%s13469_s3 + $0xa80] ss:$16 sps:$4 sm:$0xff]  }
 0x269   : > { %7315 = vmatprep.subr.bf16.mxu0 %v9248_v45  ;;  %v9303_v45 = vld [vmem:[%s13469_s3 + $0x720] ss:$16 sps:$4 sm:$0xff]  }
 0x26a   : > { %7355 = vmatpush1.bf16.msra.mxu1 %v9243_v42  ;;  %v9300_v42 = vld [vmem:[%s13469_s3 + $0x520] ss:$16 sps:$4 sm:$0xff]  }
 0x26b   : > { %7356 = vmatprep.subr.bf16.mxu1 %v9251_v46  ;;  %v9308_v46 = vld [vmem:[%s13469_s3 + $0x504] ss:$16 sps:$4 sm:$0xff]  }
 0x26c   : > { %7316 = vmatpush1.bf16.msra.mxu0 %v9246_v48  ;;  %v3929_v48 = vadd.f32 %v11961_v22, %v3888_v41  ;;  %v9317_v22 = vld [vmem:[%s13469_s3 + $0xae4] ss:$16 sps:$4 sm:$0xff]  }
 0x26d   : > { %7317 = vmatprep.subr.bf16.mxu0 %v9254_v51  ;;  %v4101_v51 = vmax.f32 %v11327_v33, 0.0  ;;  %v9344_v41 = vld [vmem:[%s13469_s3 + $0x844] ss:$16 sps:$4 sm:$0xff]  }
 0x26e   : > { %7357 = vmatpush1.bf16.msra.mxu1 %v9249_v49  ;;  %v9306_v49 = vld [vmem:[%s13469_s3 + $0x500] ss:$16 sps:$4 sm:$0xff]   ;;  %v4108_v33 = vmax.f32 %v3929_v48, 0.0  ;;  %v9353_v48 = vld [vmem:[%s13469_s3 + $0xa24] ss:$16 sps:$4 sm:$0xff]  }
 0x26f   : > { %7358 = vmatprep.subr.bf16.mxu1 %v9257_v52  ;;  %v9309_v52 = vld [vmem:[%s13469_s3 + $0x700] ss:$16 sps:$4 sm:$0xff]  }
 0x270   : > { %7318 = vmatpush1.bf16.msra.mxu0 %v9252_v53  ;;  %v9314_v53 = vld [vmem:[%s13469_s3 + $0x8e4] ss:$16 sps:$4 sm:$0xff]  }
 0x271   : > { %7319 = vmatprep.subr.bf16.mxu0 %v9260_v55  ;;  %v4106_v55 = vmax.f32 %v11748_v36, 0.0  ;;  %v9320_v36 = vld [vmem:[%s13469_s3 + $0x8c4] ss:$16 sps:$4 sm:$0xff]  }
 0x272   : > { %7359 = vmatpush1.bf16.msra.mxu1 %v9255_v58  ;;  %v4103_v58 = vmax.f32 %v11535_v37, 0.0  ;;  %v9315_v37 = vld [vmem:[%s13469_s3 + $0xae0] ss:$16 sps:$4 sm:$0xff]  }
 0x273   : > { %7360 = vmatprep.subr.bf16.mxu1 %v9263_v56  ;;  %v852_v56 = vrot.slane %v11700_v6, %v819_v63  ;;  %v12157_v63 = vpack.c.bf16 %v4106_v55, %v4106_v55  ;;  %v9362_v55 = vld [vmem:[%s13469_s3 + $0x9e4] ss:$16 sps:$4 sm:$0xff]  }
 0x274   : > { %7320 = vmatpush1.bf16.msra.mxu0 %v9258_v57  ;;  %v9312_v57 = vld [vmem:[%s13469_s3 + $0x8e0] ss:$16 sps:$4 sm:$0xff]  }
 0x275   : > { %7321 = vmatprep.subr.bf16.mxu0 %v9266_v59  ;;  %v12152_v59 = vpack.c.bf16 %v4103_v58, %v4103_v58  ;;  %v9354_v58 = vld [vmem:[%s13469_s3 + $0x800] ss:$16 sps:$4 sm:$0xff]  }
 0x276   : > { %7361 = vmatpush1.bf16.msra.mxu1 %v9261_v60  ;;  %v12147_v60 = vpack.c.bf16 %v4101_v51, %v4101_v51  ;;  %v9351_v51 = vld [vmem:[%s13469_s3 + $0xa20] ss:$16 sps:$4 sm:$0xff]  }
 0x277   : > { %7362 = vmatprep.subr.bf16.mxu1 %v9269_v61 }
 0x278   : > { %7322 = vmatpush2.bf16.msra.mxu0 %v9264_v7  ;;  %v9323_v7 = vld [vmem:[%s13469_s3 + $0xac4] ss:$16 sps:$4 sm:$0xff]  }
 0x279   : > { %7323 = vmatprep.subr.bf16.mxu0 %v9272_v0 }
 0x27a   : > { %7363 = vmatpush2.bf16.msra.mxu1 %v9267_v62  ;;  %v12163_v62 = vpack.c.bf16 %v4108_v33, %v4108_v33  ;;  %v9365_v33 = vld [vmem:[%s13469_s3 + $0xbe4] ss:$16 sps:$4 sm:$0xff]  }
 0x27b   : > { %7364 = vmatprep.subr.bf16.mxu1 %v9275_v44 }
 0x27c   : > { %7324 = vmatpush2.bf16.msra.mxu0 %v9270_v43  ;;  %v9318_v43 = vld [vmem:[%s13469_s3 + $0x8c0] ss:$16 sps:$4 sm:$0xff]  }
 0x27d   : > { %7325 = vmatprep.subr.bf16.mxu0 %v9278_v10  ;;  %v9321_v10 = vld [vmem:[%s13469_s3 + $0xac0] ss:$16 sps:$4 sm:$0xff]  }
 0x27e   : > { %7365 = vmatpush2.bf16.msra.mxu1 %v9273_v5 }
 0x27f   : > { %7366 = vmatprep.subr.bf16.mxu1 %v9281_v12  ;;  %v9326_v12 = vld [vmem:[%s13469_s3 + $0x8a4] ss:$16 sps:$4 sm:$0xff]  }
 0x280   : > { %7326 = vmatpush2.bf16.msra.mxu0 %v9276_v15 }
 0x281   : > { %7327 = vmatprep.subr.bf16.mxu0 %v9284_v20  ;;  %v9329_v20 = vld [vmem:[%s13469_s3 + $0xaa4] ss:$16 sps:$4 sm:$0xff]  }
 0x282   : > { %7367 = vmatpush2.bf16.msra.mxu1 %v9279_v17 }
 0x283   : > { %7368 = vmatprep.subr.bf16.mxu1 %v9287_v13 }
 0x284   : > { %7328 = vmatpush2.bf16.msra.mxu0 %v9282_v24 }
 0x285   : > { %7329 = vmatprep.subr.bf16.mxu0 %v9290_v27 }
 0x286   : > { %7369 = vmatpush2.bf16.msra.mxu1 %v9285_v26  ;;  %v9324_v26 = vld [vmem:[%s13469_s3 + $0x8a0] ss:$16 sps:$4 sm:$0xff]  }
 0x287   : > { %7370 = vmatprep.subr.bf16.mxu1 %v9293_v28  ;;  %v9327_v28 = vld [vmem:[%s13469_s3 + $0xaa0] ss:$16 sps:$4 sm:$0xff]  }
 0x288   : > { %7330 = vmatpush2.bf16.msra.mxu0 %v9288_v9  ;;  %v9332_v9 = vld [vmem:[%s13469_s3 + $0x884] ss:$16 sps:$4 sm:$0xff]  }
 0x289   : > { %7331 = vmatprep.subr.bf16.mxu0 %v9296_v29  ;;  %v9335_v29 = vld [vmem:[%s13469_s3 + $0xa84] ss:$16 sps:$4 sm:$0xff]  }
 0x28a   : > { %7371 = vmatpush2.bf16.msra.mxu1 %v9291_v16 }
 0x28b   : > { %7372 = vmatprep.subr.bf16.mxu1 %v9299_v19  ;;  %v9330_v19 = vld [vmem:[%s13469_s3 + $0x880] ss:$16 sps:$4 sm:$0xff]  }
 0x28c   : > { %7332 = vmatpush2.bf16.msra.mxu0 %v9294_v34  ;;  %v9338_v34 = vld [vmem:[%s13469_s3 + $0x864] ss:$16 sps:$4 sm:$0xff]  }
 0x28d   : > { %7333 = vmatprep.subr.bf16.mxu0 %v9302_v39  ;;  %v9336_v39 = vld [vmem:[%s13469_s3 + $0x860] ss:$16 sps:$4 sm:$0xff]  }
 0x28e   : > { %7373 = vmatpush2.bf16.msra.mxu1 %v9297_v35  ;;  %v9341_v35 = vld [vmem:[%s13469_s3 + $0xa64] ss:$16 sps:$4 sm:$0xff]  }
 0x28f   : > { %7374 = vmatprep.subr.bf16.mxu1 %v9305_v38  ;;  %v9339_v38 = vld [vmem:[%s13469_s3 + $0xa60] ss:$16 sps:$4 sm:$0xff]  }
 0x290   : > { %7334 = vmatpush2.bf16.msra.mxu0 %v9300_v42  ;;  %v9347_v42 = vld [vmem:[%s13469_s3 + $0xa44] ss:$16 sps:$4 sm:$0xff]  }
 0x291   : > { %7335 = vmatprep.subr.bf16.mxu0 %v9308_v46  ;;  %v9345_v46 = vld [vmem:[%s13469_s3 + $0xa40] ss:$16 sps:$4 sm:$0xff]  }
 0x292   : > { %7375 = vmatpush2.bf16.msra.mxu1 %v9303_v45  ;;  %v9342_v45 = vld [vmem:[%s13469_s3 + $0x840] ss:$16 sps:$4 sm:$0xff]  }
 0x293   : > { %7376 = vmatprep.subr.bf16.mxu1 %v9311_v18  ;;  %v9350_v18 = vld [vmem:[%s13469_s3 + $0x824] ss:$16 sps:$4 sm:$0xff]  }
 0x294   : > { %7336 = vmatpush2.bf16.msra.mxu0 %v9306_v49  ;;  %v9348_v49 = vld [vmem:[%s13469_s3 + $0x820] ss:$16 sps:$4 sm:$0xff]  }
 0x295   : > { %7387 = vmatprep.subr.bf16.mxu0 %v9314_v53  ;;  %v9359_v53 = vld [vmem:[%s13469_s3 + $0xa04] ss:$16 sps:$4 sm:$0xff]  }
 0x296   : > { %7377 = vmatpush2.bf16.msra.mxu1 %v9309_v52  ;;  %v9356_v52 = vld [vmem:[%s13469_s3 + $0x804] ss:$16 sps:$4 sm:$0xff]  }
 0x297   : > { %7428 = vmatprep.subr.bf16.mxu1 %v9317_v22  ;;  %v3967_v61 = vpop.f32.mrf.mxu0  ;;  %7338 = vmatmul.mubr.bf16.vlgmr.msra.gmra.mxu0 %v12147_v60  ;;  %v9357_v22 = vld [vmem:[%s13469_s3 + $0xa00] ss:$16 sps:$4 sm:$0xff]  }
 0x298   : > { %v3968_v0 = vadd.f32 %v3967_v61, %v852_v56  ;;  %7388 = vmatpush1.bf16.msra.mxu0 %v9312_v57  ;;  %7419 = vmatprep.mubr.bf16.mxu0 %v12157_v63  ;;  %v9360_v56 = vld [vmem:[%s13469_s3 + $0x9e0] ss:$16 sps:$4 sm:$0xff]  }
 0x299   : > { %v4008_v44 = vpop.f32.mrf.mxu1  ;;  %7379 = vmatmul.mubr.bf16.vlgmr.msra.gmra.mxu1 %v12152_v59  ;;  %v12170_v5 = vpop.f32.mrf.mxu0  ;;  %7389 = vmatprep.subr.bf16.mxu0 %v9320_v36  ;;  %v9363_v57 = vld [vmem:[%s13469_s3 + $0xbe0] ss:$16 sps:$4 sm:$0xff]   ;;  %v9371_v36 = vld [vmem:[%s13469_s3 + $0xbc4] ss:$16 sps:$4 sm:$0xff]  }
 0x29a   : > { %7429 = vmatpush1.bf16.msra.mxu1 %v9315_v37  ;;  %v12178_v15 = vadd.f32 %v4008_v44, %v3968_v0  ;;  %7460 = vmatprep.mubr.bf16.mxu1 %v12163_v62  ;;  %v9368_v37 = vld [vmem:[%s13469_s3 + $0x9c4] ss:$16 sps:$4 sm:$0xff]   ;;  %v9366_v61 = vld [vmem:[%s13469_s3 + $0x9c0] ss:$16 sps:$4 sm:$0xff]  }
 0x29b   : > { %v12181_v17 = vpop.f32.mrf.mxu1  ;;  %v3971_v13 = vpop.f32.mrf.mxu0  ;;  %7430 = vmatprep.subr.bf16.mxu1 %v9323_v7  ;;  %v9369_v7 = vld [vmem:[%s13469_s3 + $0xbc0] ss:$16 sps:$4 sm:$0xff]   ;;  %v9374_v0 = vld [vmem:[%s13469_s3 + $0x9a4] ss:$16 sps:$4 sm:$0xff]  }
 0x29c   : > { %7390 = vmatpush1.bf16.msra.mxu0 %v9318_v43  ;;  %v9377_v44 = vld [vmem:[%s13469_s3 + $0xba4] ss:$16 sps:$4 sm:$0xff]   ;;  %v9372_v43 = vld [vmem:[%s13469_s3 + $0x9a0] ss:$16 sps:$4 sm:$0xff]  }
 0x29d   : > { %v4012_v24 = vpop.f32.mrf.mxu1  ;;  %v3972_v27 = vpop.f32.mrf.mxu0  ;;  %7391 = vmatprep.subr.bf16.mxu0 %v9326_v12  ;;  %v9380_v12 = vld [vmem:[%s13469_s3 + $0x984] ss:$16 sps:$4 sm:$0xff]   ;;  %v9378_v13 = vld [vmem:[%s13469_s3 + $0x980] ss:$16 sps:$4 sm:$0xff]  }
 0x29e   : > { %7431 = vmatpush1.bf16.msra.mxu1 %v9321_v10  ;;  %v9375_v10 = vld [vmem:[%s13469_s3 + $0xba0] ss:$16 sps:$4 sm:$0xff]   ;;  %v9389_v27 = vld [vmem:[%s13469_s3 + $0xb64] ss:$16 sps:$4 sm:$0xff]  }
 0x29f   : > { %v4013_v16 = vpop.f32.mrf.mxu1  ;;  %7432 = vmatprep.subr.bf16.mxu1 %v9329_v20  ;;  %v9383_v20 = vld [vmem:[%s13469_s3 + $0xb84] ss:$16 sps:$4 sm:$0xff]   ;;  %v9381_v24 = vld [vmem:[%s13469_s3 + $0xb80] ss:$16 sps:$4 sm:$0xff]  }
 0x2a0   : > { %7392 = vmatpush1.bf16.msra.mxu0 %v9324_v26  ;;  %v9386_v26 = vld [vmem:[%s13469_s3 + $0x964] ss:$16 sps:$4 sm:$0xff]  }
 0x2a1   : > { %7393 = vmatprep.subr.bf16.mxu0 %v9332_v9  ;;  %v9387_v9 = vld [vmem:[%s13469_s3 + $0xb60] ss:$16 sps:$4 sm:$0xff]   ;;  %v9392_v16 = vld [vmem:[%s13469_s3 + $0x944] ss:$16 sps:$4 sm:$0xff]  }
 0x2a2   : > { %7433 = vmatpush1.bf16.msra.mxu1 %v9327_v28  ;;  %v9384_v28 = vld [vmem:[%s13469_s3 + $0x960] ss:$16 sps:$4 sm:$0xff]  }
 0x2a3   : > { %7434 = vmatprep.subr.bf16.mxu1 %v9335_v29  ;;  %v9395_v29 = vld [vmem:[%s13469_s3 + $0xb44] ss:$16 sps:$4 sm:$0xff]  }
 0x2a4   : > { %7394 = vmatpush1.bf16.msra.mxu0 %v9330_v19  ;;  %v856_v19 = vrot.slane %v11700_v6, %v823_v3  ;;  %v9401_v3 = vld [vmem:[%s13469_s3 + $0xb24] ss:$16 sps:$4 sm:$0xff]  }
 0x2a5   : > { %7395 = vmatprep.subr.bf16.mxu0 %v9338_v34  ;;  %v9393_v34 = vld [vmem:[%s13469_s3 + $0xb40] ss:$16 sps:$4 sm:$0xff]  }
 0x2a6   : > { %7435 = vmatpush1.bf16.msra.mxu1 %v9333_v32  ;;  %v9390_v32 = vld [vmem:[%s13469_s3 + $0x940] ss:$16 sps:$4 sm:$0xff]  }
 0x2a7   : > { %7436 = vmatprep.subr.bf16.mxu1 %v9341_v35  ;;  %v9398_v35 = vld [vmem:[%s13469_s3 + $0x924] ss:$16 sps:$4 sm:$0xff]  }
 0x2a8   : > { %7396 = vmatpush1.bf16.msra.mxu0 %v9336_v39  ;;  %v3970_v39 = vadd.f32 %v12170_v5, %v856_v19  ;;  %v9407_v5 = vld [vmem:[%s13469_s3 + $0xb04] ss:$16 sps:$4 sm:$0xff]   ;;  %v9429_v19 = vld [vmem:[%s13469_s3 + $0xe80] ss:$16 sps:$4 sm:$0xff]  }
 0x2a9   : > { %7397 = vmatprep.subr.bf16.mxu0 %v9344_v41  ;;  %v9399_v41 = vld [vmem:[%s13469_s3 + $0xb20] ss:$16 sps:$4 sm:$0xff]  }
 0x2aa   : > { %7437 = vmatpush1.bf16.msra.mxu1 %v9339_v38  ;;  %v9396_v38 = vld [vmem:[%s13469_s3 + $0x920] ss:$16 sps:$4 sm:$0xff]  }
 0x2ab   : > { %7438 = vmatprep.subr.bf16.mxu1 %v9347_v42  ;;  %v9404_v42 = vld [vmem:[%s13469_s3 + $0x904] ss:$16 sps:$4 sm:$0xff]  }
 0x2ac   : > { %7398 = vmatpush1.bf16.msra.mxu0 %v9342_v45  ;;  %v4011_v45 = vadd.f32 %v12181_v17, %v3970_v39  ;;  %v9413_v17 = vld [vmem:[%s13469_s3 + $0xee4] ss:$16 sps:$4 sm:$0xff]  }
 0x2ad   : > { %7399 = vmatprep.subr.bf16.mxu0 %v9350_v18  ;;  %v4105_v18 = vmax.f32 %v11742_v31, 0.0  ;;  %v9408_v31 = vld [vmem:[%s13469_s3 + $0xce0] ss:$16 sps:$4 sm:$0xff]   ;;  %v9440_v39 = vld [vmem:[%s13469_s3 + $0xc44] ss:$16 sps:$4 sm:$0xff]  }
 0x2ae   : > { %7439 = vmatpush1.bf16.msra.mxu1 %v9345_v46  ;;  %v9402_v46 = vld [vmem:[%s13469_s3 + $0x900] ss:$16 sps:$4 sm:$0xff]  }
 0x2af   : > { %7440 = vmatprep.subr.bf16.mxu1 %v9353_v48  ;;  %v9405_v48 = vld [vmem:[%s13469_s3 + $0xb00] ss:$16 sps:$4 sm:$0xff]  }
 0x2b0   : > { %7400 = vmatpush1.bf16.msra.mxu0 %v9348_v49  ;;  %v9410_v49 = vld [vmem:[%s13469_s3 + $0xce4] ss:$16 sps:$4 sm:$0xff]  }
 0x2b1   : > { %7401 = vmatprep.subr.bf16.mxu0 %v9356_v52  ;;  %v4110_v52 = vmax.f32 %v4011_v45, 0.0  ;;  %v9449_v45 = vld [vmem:[%s13469_s3 + $0xe24] ss:$16 sps:$4 sm:$0xff]  }
 0x2b2   : > { %7441 = vmatpush1.bf16.msra.mxu1 %v9351_v51  ;;  %v4107_v51 = vmax.f32 %v11958_v54, 0.0 }
 0x2b3   : > { %7442 = vmatprep.subr.bf16.mxu1 %v9359_v53  ;;  %v12364_v53 = vpack.c.bf16 %v4105_v18, %v4105_v18  ;;  %v9447_v18 = vld [vmem:[%s13469_s3 + $0xe20] ss:$16 sps:$4 sm:$0xff]  }
 0x2b4   : > { %7402 = vmatpush1.bf16.msra.mxu0 %v9354_v58  ;;  %v9411_v58 = vld [vmem:[%s13469_s3 + $0xee0] ss:$16 sps:$4 sm:$0xff]   ;;  %v12369_v54 = vpack.c.bf16 %v4107_v51, %v4107_v51 }
 0x2b5   : > { %7403 = vmatprep.subr.bf16.mxu0 %v9362_v55  ;;  %v9416_v55 = vld [vmem:[%s13469_s3 + $0xcc4] ss:$16 sps:$4 sm:$0xff]   ;;  %v9450_v51 = vld [vmem:[%s13469_s3 + $0xc00] ss:$16 sps:$4 sm:$0xff]  }
 0x2b6   : > { %7443 = vmatpush1.bf16.msra.mxu1 %v9357_v22  ;;  %v864_v22 = vrot.slane %v11700_v6, %v831_v8  ;;  %v9414_v8 = vld [vmem:[%s13469_s3 + $0xcc0] ss:$16 sps:$4 sm:$0xff]  }
 0x2b7   : > { %7444 = vmatprep.subr.bf16.mxu1 %v9365_v33  ;;  %v9419_v33 = vld [vmem:[%s13469_s3 + $0xec4] ss:$16 sps:$4 sm:$0xff]  }
 0x2b8   : > { %7404 = vmatpush2.bf16.msra.mxu0 %v9360_v56  ;;  %v12380_v56 = vpack.c.bf16 %v4110_v52, %v4110_v52  ;;  %v9458_v52 = vld [vmem:[%s13469_s3 + $0xde4] ss:$16 sps:$4 sm:$0xff]  }
 0x2b9   : > { %7405 = vmatprep.subr.bf16.mxu0 %v9368_v37 }
 0x2ba   : > { %7445 = vmatpush2.bf16.msra.mxu1 %v9363_v57 }
 0x2bb   : > { %7446 = vmatprep.subr.bf16.mxu1 %v9371_v36  ;;  %v9417_v36 = vld [vmem:[%s13469_s3 + $0xec0] ss:$16 sps:$4 sm:$0xff]  }
 0x2bc   : > { %7406 = vmatpush2.bf16.msra.mxu0 %v9366_v61  ;;  %v9422_v61 = vld [vmem:[%s13469_s3 + $0xca4] ss:$16 sps:$4 sm:$0xff]  }
 0x2bd   : > { %7407 = vmatprep.subr.bf16.mxu0 %v9374_v0 }
 0x2be   : > { %7447 = vmatpush2.bf16.msra.mxu1 %v9369_v7 }
 0x2bf   : > { %7448 = vmatprep.subr.bf16.mxu1 %v9377_v44  ;;  %v9425_v44 = vld [vmem:[%s13469_s3 + $0xea4] ss:$16 sps:$4 sm:$0xff]  }
 0x2c0   : > { %7408 = vmatpush2.bf16.msra.mxu0 %v9372_v43 }
 0x2c1   : > { %7409 = vmatprep.subr.bf16.mxu0 %v9380_v12 }
 0x2c2   : > { %7449 = vmatpush2.bf16.msra.mxu1 %v9375_v10 }
 0x2c3   : > { %7450 = vmatprep.subr.bf16.mxu1 %v9383_v20  ;;  %v9420_v20 = vld [vmem:[%s13469_s3 + $0xca0] ss:$16 sps:$4 sm:$0xff]  }
 0x2c4   : > { %7410 = vmatpush2.bf16.msra.mxu0 %v9378_v13 }
 0x2c5   : > { %7411 = vmatprep.subr.bf16.mxu0 %v9386_v26  ;;  %v9428_v26 = vld [vmem:[%s13469_s3 + $0xc84] ss:$16 sps:$4 sm:$0xff]  }
 0x2c6   : > { %7451 = vmatpush2.bf16.msra.mxu1 %v9381_v24  ;;  %v9423_v24 = vld [vmem:[%s13469_s3 + $0xea0] ss:$16 sps:$4 sm:$0xff]  }
 0x2c7   : > { %7452 = vmatprep.subr.bf16.mxu1 %v9389_v27 }
 0x2c8   : > { %7412 = vmatpush2.bf16.msra.mxu0 %v9384_v28 }
 0x2c9   : > { %7413 = vmatprep.subr.bf16.mxu0 %v9392_v16 }
 0x2ca   : > { %7453 = vmatpush2.bf16.msra.mxu1 %v9387_v9  ;;  %v9431_v9 = vld [vmem:[%s13469_s3 + $0xe84] ss:$16 sps:$4 sm:$0xff]  }
 0x2cb   : > { %7454 = vmatprep.subr.bf16.mxu1 %v9395_v29  ;;  %v9426_v29 = vld [vmem:[%s13469_s3 + $0xc80] ss:$16 sps:$4 sm:$0xff]  }
 0x2cc   : > { %7414 = vmatpush2.bf16.msra.mxu0 %v9390_v32  ;;  %v9434_v32 = vld [vmem:[%s13469_s3 + $0xc64] ss:$16 sps:$4 sm:$0xff]  }
 0x2cd   : > { %7415 = vmatprep.subr.bf16.mxu0 %v9398_v35  ;;  %v9432_v35 = vld [vmem:[%s13469_s3 + $0xc60] ss:$16 sps:$4 sm:$0xff]  }
 0x2ce   : > { %7455 = vmatpush2.bf16.msra.mxu1 %v9393_v34  ;;  %v9437_v34 = vld [vmem:[%s13469_s3 + $0xe64] ss:$16 sps:$4 sm:$0xff]  }
 0x2cf   : > { %7456 = vmatprep.subr.bf16.mxu1 %v9401_v3  ;;  %v9435_v3 = vld [vmem:[%s13469_s3 + $0xe60] ss:$16 sps:$4 sm:$0xff]  }
 0x2d0   : > { %7416 = vmatpush2.bf16.msra.mxu0 %v9396_v38  ;;  %v9443_v38 = vld [vmem:[%s13469_s3 + $0xe44] ss:$16 sps:$4 sm:$0xff]  }
 0x2d1   : > { %7417 = vmatprep.subr.bf16.mxu0 %v9404_v42  ;;  %v9441_v42 = vld [vmem:[%s13469_s3 + $0xe40] ss:$16 sps:$4 sm:$0xff]  }
 0x2d2   : > { %7457 = vmatpush2.bf16.msra.mxu1 %v9399_v41  ;;  %v9438_v41 = vld [vmem:[%s13469_s3 + $0xc40] ss:$16 sps:$4 sm:$0xff]  }
 0x2d3   : > { %7458 = vmatprep.subr.bf16.mxu1 %v9407_v5  ;;  %v9446_v5 = vld [vmem:[%s13469_s3 + $0xc24] ss:$16 sps:$4 sm:$0xff]  }
 0x2d4   : > { %7418 = vmatpush2.bf16.msra.mxu0 %v9402_v46  ;;  %v9444_v46 = vld [vmem:[%s13469_s3 + $0xc20] ss:$16 sps:$4 sm:$0xff]  }
 0x2d5   : > { %7469 = vmatprep.subr.bf16.mxu0 %v9410_v49  ;;  %v9455_v49 = vld [vmem:[%s13469_s3 + $0xe04] ss:$16 sps:$4 sm:$0xff]  }
 0x2d6   : > { %7459 = vmatpush2.bf16.msra.mxu1 %v9405_v48  ;;  %v9452_v48 = vld [vmem:[%s13469_s3 + $0xc04] ss:$16 sps:$4 sm:$0xff]  }
 0x2d7   : > { %7510 = vmatprep.subr.bf16.mxu1 %v9413_v17  ;;  %v12382_v57 = vpop.f32.mrf.mxu0  ;;  %7420 = vmatmul.mubr.bf16.vlgmr.msra.gmra.mxu0 %v12364_v53  ;;  %v9453_v17 = vld [vmem:[%s13469_s3 + $0xe00] ss:$16 sps:$4 sm:$0xff]  }
 0x2d8   : > { %7470 = vmatpush1.bf16.msra.mxu0 %v9408_v31  ;;  %7501 = vmatprep.mubr.bf16.mxu0 %v12380_v56  ;;  %v9461_v31 = vld [vmem:[%s13469_s3 + $0xfe4] ss:$16 sps:$4 sm:$0xff]  }
 0x2d9   : > { %v12385_v37 = vpop.f32.mrf.mxu1  ;;  %7461 = vmatmul.mubr.bf16.vlgmr.msra.gmra.mxu1 %v12369_v54  ;;  %v4051_v6 = vpop.f32.mrf.mxu0  ;;  %7471 = vmatprep.subr.bf16.mxu0 %v9416_v55  ;;  %v9464_v55 = vld [vmem:[%s13469_s3 + $0xdc4] ss:$16 sps:$4 sm:$0xff]  }
 0x2da   : > { %7511 = vmatpush1.bf16.msra.mxu1 %v9411_v58  ;;  %v4052_v7 = vadd.f32 %v4051_v6, %v864_v22  ;;  %v9456_v58 = vld [vmem:[%s13469_s3 + $0xde0] ss:$16 sps:$4 sm:$0xff]  }
 0x2db   : > { %v4092_v0 = vpop.f32.mrf.mxu1  ;;  %7512 = vmatprep.subr.bf16.mxu1 %v9419_v33  ;;  %v4053_v43 = vpop.f32.mrf.mxu0  ;;  %v9459_v22 = vld [vmem:[%s13469_s3 + $0xfe0] ss:$16 sps:$4 sm:$0xff]   ;;  %v9467_v33 = vld [vmem:[%s13469_s3 + $0xfc4] ss:$16 sps:$4 sm:$0xff]  }
 0x2dc   : > { %v4093_v10 = vadd.f32 %v4092_v0, %v4052_v7  ;;  %7472 = vmatpush1.bf16.msra.mxu0 %v9414_v8  ;;  %v9462_v8 = vld [vmem:[%s13469_s3 + $0xdc0] ss:$16 sps:$4 sm:$0xff]   ;;  %v9479_v43 = vld [vmem:[%s13469_s3 + $0xf84] ss:$16 sps:$4 sm:$0xff]  }
 0x2dd   : > { %v4094_v12 = vpop.f32.mrf.mxu1  ;;  %v4054_v13 = vpop.f32.mrf.mxu0  ;;  %7473 = vmatprep.subr.bf16.mxu0 %v9422_v61  ;;  %v9465_v6 = vld [vmem:[%s13469_s3 + $0xfc0] ss:$16 sps:$4 sm:$0xff]   ;;  %v9473_v61 = vld [vmem:[%s13469_s3 + $0xfa4] ss:$16 sps:$4 sm:$0xff]  }
 0x2de   : > { %7513 = vmatpush1.bf16.msra.mxu1 %v9417_v36  ;;  %v4112_v27 = vmax.f32 %v4093_v10, 0.0  ;;  %v9470_v36 = vld [vmem:[%s13469_s3 + $0xda4] ss:$16 sps:$4 sm:$0xff]   ;;  %v9468_v7 = vld [vmem:[%s13469_s3 + $0xda0] ss:$16 sps:$4 sm:$0xff]  }
 0x2df   : > { %v4095_v28 = vpop.f32.mrf.mxu1  ;;  %7514 = vmatprep.subr.bf16.mxu1 %v9425_v44  ;;  %v9471_v0 = vld [vmem:[%s13469_s3 + $0xfa0] ss:$16 sps:$4 sm:$0xff]   ;;  %v9476_v44 = vld [vmem:[%s13469_s3 + $0xd84] ss:$16 sps:$4 sm:$0xff]  }
 0x2e0   : > { %v12413_v16 = vpack.c.bf16 %v4112_v27, %v4112_v27  ;;  %7474 = vmatpush1.bf16.msra.mxu0 %v9420_v20  ;;  %v9474_v10 = vld [vmem:[%s13469_s3 + $0xd80] ss:$16 sps:$4 sm:$0xff]   ;;  %v9482_v20 = vld [vmem:[%s13469_s3 + $0xd64] ss:$16 sps:$4 sm:$0xff]   ;;  %v9891_v28 = vld [vmem:[%s13468_s2 + $0x8] sm:$0xff] }
 0x2e1   : > { %7475 = vmatprep.subr.bf16.mxu0 %v9428_v26  ;;  %v9477_v12 = vld [vmem:[%s13469_s3 + $0xf80] ss:$16 sps:$4 sm:$0xff]   ;;  %v9485_v13 = vld [vmem:[%s13469_s3 + $0xf64] ss:$16 sps:$4 sm:$0xff]  }
 0x2e2   : > { %7515 = vmatpush1.bf16.msra.mxu1 %v9423_v24  ;;  %7542 = vmatprep.mubr.bf16.mxu1 %v12413_v16  ;;  %v9480_v24 = vld [vmem:[%s13469_s3 + $0xd60] ss:$16 sps:$4 sm:$0xff]   ;;  %v9488_v27 = vld [vmem:[%s13469_s3 + $0xd44] ss:$16 sps:$4 sm:$0xff]  }
 0x2e3   : > { %7516 = vmatprep.subr.bf16.mxu1 %v9431_v9  ;;  %v9483_v26 = vld [vmem:[%s13469_s3 + $0xf60] ss:$16 sps:$4 sm:$0xff]   ;;  %v860_v9 = vrot.slane %v9891_v28, %v827_v2  ;;  %v9522_v28 = vld [vmem:[%s13469_s3 + $0x88] ss:$16 sps:$4 sm:$0xff]  }
 0x2e4   : > { %7476 = vmatpush1.bf16.msra.mxu0 %v9426_v29  ;;  %v9491_v29 = vld [vmem:[%s13469_s3 + $0xf44] ss:$16 sps:$4 sm:$0xff]  }
 0x2e5   : > { %7477 = vmatprep.subr.bf16.mxu0 %v9434_v32  ;;  %v9489_v32 = vld [vmem:[%s13469_s3 + $0xf40] ss:$16 sps:$4 sm:$0xff]   ;;  %v4050_v2 = vadd.f32 %v12382_v57, %v860_v9  ;;  %v9500_v57 = vld [vmem:[%s13469_s3 + $0xd04] ss:$16 sps:$4 sm:$0xff]   ;;  %v9525_v9 = vld [vmem:[%s13469_s3 + $0x288] ss:$16 sps:$4 sm:$0xff]  }
 0x2e6   : > { %7517 = vmatpush1.bf16.msra.mxu1 %v9429_v19  ;;  %v9486_v19 = vld [vmem:[%s13469_s3 + $0xd40] ss:$16 sps:$4 sm:$0xff]  }
 0x2e7   : > { %7518 = vmatprep.subr.bf16.mxu1 %v9437_v34  ;;  %v9497_v34 = vld [vmem:[%s13469_s3 + $0xf24] ss:$16 sps:$4 sm:$0xff]  }
 0x2e8   : > { %7478 = vmatpush1.bf16.msra.mxu0 %v9432_v35  ;;  %v9492_v35 = vld [vmem:[%s13469_s3 + $0xd20] ss:$16 sps:$4 sm:$0xff]  }
 0x2e9   : > { %7479 = vmatprep.subr.bf16.mxu0 %v9440_v39  ;;  %v4091_v39 = vadd.f32 %v12385_v37, %v4050_v2  ;;  %v4641_v37 = vld [vmem:[%s13470_s4] sm:$0xf]  ;;  %v9536_v2 = vld [vmem:[%s13469_s3 + $0x4c] ss:$16 sps:$4 sm:$0xff]  }
 0x2ea   : > { %7519 = vmatpush1.bf16.msra.mxu1 %v9435_v3  ;;  %v9495_v3 = vld [vmem:[%s13469_s3 + $0xf20] ss:$16 sps:$4 sm:$0xff]  }
 0x2eb   : > { %7520 = vmatprep.subr.bf16.mxu1 %v9443_v38  ;;  %v9503_v38 = vld [vmem:[%s13469_s3 + $0xf04] ss:$16 sps:$4 sm:$0xff]  }
 0x2ec   : > { %7480 = vmatpush1.bf16.msra.mxu0 %v9438_v41  ;;  %v9498_v41 = vld [vmem:[%s13469_s3 + $0xd00] ss:$16 sps:$4 sm:$0xff]  }
 0x2ed   : > { %7481 = vmatprep.subr.bf16.mxu0 %v9446_v5  ;;  %v4109_v5 = vmax.f32 %v12178_v15, 0.0  ;;  %v9504_v15 = vld [vmem:[%s13469_s3 + $0xe8] ss:$16 sps:$4 sm:$0xff]  }
 0x2ee   : > { %7521 = vmatpush1.bf16.msra.mxu1 %v9441_v42  ;;  %v9501_v42 = vld [vmem:[%s13469_s3 + $0xf00] ss:$16 sps:$4 sm:$0xff]  }
 0x2ef   : > { %7522 = vmatprep.subr.bf16.mxu1 %v9449_v45  ;;  %v9506_v45 = vld [vmem:[%s13469_s3 + $0xec] ss:$16 sps:$4 sm:$0xff]  }
 0x2f0   : > { %7482 = vmatpush1.bf16.msra.mxu0 %v9444_v46  ;;  %v4111_v46 = vmax.f32 %v4091_v39, 0.0  ;;  %v9545_v39 = vld [vmem:[%s13469_s3 + $0x22c] ss:$16 sps:$4 sm:$0xff]  }
 0x2f1   : > { %7483 = vmatprep.subr.bf16.mxu0 %v9452_v48  ;;  %v4646_v48 = vrot.slane %v4641_v37, %v10869_v40 }
 0x2f2   : > { %7523 = vmatpush1.bf16.msra.mxu1 %v9447_v18  ;;  %v9509_v18 = vld [vmem:[%s13469_s3 + $0x2ec] ss:$16 sps:$4 sm:$0xff]  }
 0x2f3   : > { %7524 = vmatprep.subr.bf16.mxu1 %v9455_v49  ;;  %v12587_v49 = vpack.c.bf16 %v4109_v5, %v4109_v5  ;;  %v9551_v5 = vld [vmem:[%s13469_s3 + $0x20c] ss:$16 sps:$4 sm:$0xff]  }
 0x2f4   : > { %7484 = vmatpush1.bf16.msra.mxu0 %v9450_v51  ;;  %v9507_v51 = vld [vmem:[%s13469_s3 + $0x2e8] ss:$16 sps:$4 sm:$0xff]  }
 0x2f5   : > { %7485 = vmatprep.subr.bf16.mxu0 %v9458_v52  ;;  %v4650_v52 = vrot.slane %v4641_v37, %v10881_v47  ;;  %v9546_v37 = vld [vmem:[%s13469_s3 + $0x8] ss:$16 sps:$4 sm:$0xff]  }
 0x2f6   : > { %7525 = vmatpush1.bf16.msra.mxu1 %v9453_v17  ;;  %v12592_v17 = vpack.c.bf16 %v4111_v46, %v4111_v46  ;;  %v9554_v46 = vld [vmem:[%s13469_s3 + $0x1ec] ss:$16 sps:$4 sm:$0xff]  }
 0x2f7   : > { %7526 = vmatprep.subr.bf16.mxu1 %v9461_v31  ;;  %v9512_v31 = vld [vmem:[%s13469_s3 + $0xcc] ss:$16 sps:$4 sm:$0xff]  }
 0x2f8   : > { %7486 = vmatpush2.bf16.msra.mxu0 %v9456_v58 }
 0x2f9   : > { %7487 = vmatprep.subr.bf16.mxu0 %v9464_v55 }
 0x2fa   : > { %7527 = vmatpush2.bf16.msra.mxu1 %v9459_v22  ;;  %v9515_v22 = vld [vmem:[%s13469_s3 + $0x2cc] ss:$16 sps:$4 sm:$0xff]  }
 0x2fb   : > { %7528 = vmatprep.subr.bf16.mxu1 %v9467_v33 }
 0x2fc   : > { %7488 = vmatpush2.bf16.msra.mxu0 %v9462_v8  ;;  %v9510_v8 = vld [vmem:[%s13469_s3 + $0xc8] ss:$16 sps:$4 sm:$0xff]  }
 0x2fd   : > { %7489 = vmatprep.subr.bf16.mxu0 %v9470_v36  ;;  %v9513_v36 = vld [vmem:[%s13469_s3 + $0x2c8] ss:$16 sps:$4 sm:$0xff]  }
 0x2fe   : > { %7529 = vmatpush2.bf16.msra.mxu1 %v9465_v6 }
 0x2ff   : > { %7530 = vmatprep.subr.bf16.mxu1 %v9473_v61  ;;  %v9518_v61 = vld [vmem:[%s13469_s3 + $0xac] ss:$16 sps:$4 sm:$0xff]  }
 0x300   : > { %7490 = vmatpush2.bf16.msra.mxu0 %v9468_v7 }
 0x301   : > { %7491 = vmatprep.subr.bf16.mxu0 %v9476_v44 }
 0x302   : > { %7531 = vmatpush2.bf16.msra.mxu1 %v9471_v0 }
 0x303   : > { %7532 = vmatprep.subr.bf16.mxu1 %v9479_v43 }
 0x304   : > { %7492 = vmatpush2.bf16.msra.mxu0 %v9474_v10 }
 0x305   : > { %7493 = vmatprep.subr.bf16.mxu0 %v9482_v20  ;;  %v9516_v20 = vld [vmem:[%s13469_s3 + $0xa8] ss:$16 sps:$4 sm:$0xff]  }
 0x306   : > { %7533 = vmatpush2.bf16.msra.mxu1 %v9477_v12 }
 0x307   : > { %7534 = vmatprep.subr.bf16.mxu1 %v9485_v13 }
 0x308   : > { %7494 = vmatpush2.bf16.msra.mxu0 %v9480_v24  ;;  %v9524_v24 = vld [vmem:[%s13469_s3 + $0x8c] ss:$16 sps:$4 sm:$0xff]  }
 0x309   : > { %7495 = vmatprep.subr.bf16.mxu0 %v9488_v27  ;;  %v9527_v27 = vld [vmem:[%s13469_s3 + $0x28c] ss:$16 sps:$4 sm:$0xff]  }
 0x30a   : > { %7535 = vmatpush2.bf16.msra.mxu1 %v9483_v26 }
 0x30b   : > { %7536 = vmatprep.subr.bf16.mxu1 %v9491_v29  ;;  %v9530_v29 = vld [vmem:[%s13469_s3 + $0x6c] ss:$16 sps:$4 sm:$0xff]  }
 0x30c   : > { %7496 = vmatpush2.bf16.msra.mxu0 %v9486_v19  ;;  %v9533_v19 = vld [vmem:[%s13469_s3 + $0x26c] ss:$16 sps:$4 sm:$0xff]  }
 0x30d   : > { %7497 = vmatprep.subr.bf16.mxu0 %v9494_v30  ;;  %v9531_v30 = vld [vmem:[%s13469_s3 + $0x268] ss:$16 sps:$4 sm:$0xff]  }
 0x30e   : > { %7537 = vmatpush2.bf16.msra.mxu1 %v9489_v32  ;;  %v9528_v32 = vld [vmem:[%s13469_s3 + $0x68] ss:$16 sps:$4 sm:$0xff]  }
 0x30f   : > { %7538 = vmatprep.subr.bf16.mxu1 %v9497_v34  ;;  %v9539_v34 = vld [vmem:[%s13469_s3 + $0x24c] ss:$16 sps:$4 sm:$0xff]  }
 0x310   : > { %7498 = vmatpush2.bf16.msra.mxu0 %v9492_v35  ;;  %v9534_v35 = vld [vmem:[%s13469_s3 + $0x48] ss:$16 sps:$4 sm:$0xff]  }
 0x311   : > { %7499 = vmatprep.subr.bf16.mxu0 %v9500_v57  ;;  %v9542_v57 = vld [vmem:[%s13469_s3 + $0x2c] ss:$16 sps:$4 sm:$0xff]  }
 0x312   : > { %7539 = vmatpush2.bf16.msra.mxu1 %v9495_v3  ;;  %v9537_v3 = vld [vmem:[%s13469_s3 + $0x248] ss:$16 sps:$4 sm:$0xff]  }
 0x313   : > { %7540 = vmatprep.subr.bf16.mxu1 %v9503_v38  ;;  %v9540_v38 = vld [vmem:[%s13469_s3 + $0x28] ss:$16 sps:$4 sm:$0xff]  }
 0x314   : > { %7500 = vmatpush2.bf16.msra.mxu0 %v9498_v41  ;;  %v9543_v41 = vld [vmem:[%s13469_s3 + $0x228] ss:$16 sps:$4 sm:$0xff]  }
 0x315   : > { %7551 = vmatprep.subr.bf16.mxu0 %v9506_v45  ;;  %v9549_v45 = vld [vmem:[%s13469_s3 + $0x208] ss:$16 sps:$4 sm:$0xff]  }
 0x316   : > { %7541 = vmatpush2.bf16.msra.mxu1 %v9501_v42  ;;  %v9548_v42 = vld [vmem:[%s13469_s3 + $0xc] ss:$16 sps:$4 sm:$0xff]  }
 0x317   : > { %7592 = vmatprep.subr.bf16.mxu1 %v9509_v18  ;;  %v7257_v58 = vpop.f32.mrf.mxu0  ;;  %7502 = vmatmul.mubr.bf16.vlgmr.msra.gmra.mxu0 %v12587_v49  ;;  %v9557_v18 = vld [vmem:[%s13469_s3 + $0x3ec] ss:$16 sps:$4 sm:$0xff]  }
 0x318   : > { %v7258_v55 = vadd.f32 %v7257_v58, %v4646_v48  ;;  %7552 = vmatpush1.bf16.msra.mxu0 %v9504_v15  ;;  %7583 = vmatprep.mubr.bf16.mxu0 %v11723_v21  ;;  %v9521_v21 = vld [vmem:[%s13469_s3 + $0x2ac] ss:$16 sps:$4 sm:$0xff]   ;;  %v9552_v48 = vld [vmem:[%s13469_s3 + $0x1e8] ss:$16 sps:$4 sm:$0xff]  }
 0x319   : > { %v7298_v33 = vpop.f32.mrf.mxu1  ;;  %7543 = vmatmul.mubr.bf16.vlgmr.msra.gmra.mxu1 %v12592_v17  ;;  %v7259_v6 = vpop.f32.mrf.mxu0  ;;  %7553 = vmatprep.subr.bf16.mxu0 %v9512_v31  ;;  %v9555_v15 = vld [vmem:[%s13469_s3 + $0x3e8] ss:$16 sps:$4 sm:$0xff]  }
 0x31a   : > { %7593 = vmatpush1.bf16.msra.mxu1 %v9507_v51  ;;  %v12613_v7 = vadd.f32 %v7298_v33, %v7258_v55  ;;  %7624 = vmatprep.mubr.bf16.mxu1 %v11729_v25  ;;  %v7260_v0 = vadd.f32 %v7259_v6, %v4650_v52  ;;  %v9519_v25 = vld [vmem:[%s13469_s3 + $0x2a8] ss:$16 sps:$4 sm:$0xff]   ;;  %v9560_v51 = vld [vmem:[%s13469_s3 + $0x1cc] ss:$16 sps:$4 sm:$0xff]  }
 0x31b   : > { %v7300_v44 = vpop.f32.mrf.mxu1  ;;  %v7261_v43 = vpop.f32.mrf.mxu0  ;;  %7594 = vmatprep.subr.bf16.mxu1 %v9515_v22  ;;  %v9563_v52 = vld [vmem:[%s13469_s3 + $0x3cc] ss:$16 sps:$4 sm:$0xff]   ;;  %v9558_v31 = vld [vmem:[%s13469_s3 + $0x1c8] ss:$16 sps:$4 sm:$0xff]  }
 0x31c   : > { %v12619_v10 = vadd.f32 %v7300_v44, %v7260_v0  ;;  %7554 = vmatpush1.bf16.msra.mxu0 %v9510_v8  ;;  %v9561_v58 = vld [vmem:[%s13469_s3 + $0x3c8] ss:$16 sps:$4 sm:$0xff]   ;;  %v9566_v22 = vld [vmem:[%s13469_s3 + $0x1ac] ss:$16 sps:$4 sm:$0xff]  }
 0x31d   : > { %v7302_v12 = vpop.f32.mrf.mxu1  ;;  %v7262_v13 = vpop.f32.mrf.mxu0  ;;  %7555 = vmatprep.subr.bf16.mxu0 %v9518_v61  ;;  %v9569_v55 = vld [vmem:[%s13469_s3 + $0x3ac] ss:$16 sps:$4 sm:$0xff]   ;;  %v9564_v33 = vld [vmem:[%s13469_s3 + $0x1a8] ss:$16 sps:$4 sm:$0xff]  }
 0x31e   : > { %7595 = vmatpush1.bf16.msra.mxu1 %v9513_v36  ;;  %v9567_v8 = vld [vmem:[%s13469_s3 + $0x3a8] ss:$16 sps:$4 sm:$0xff]   ;;  %v9572_v6 = vld [vmem:[%s13469_s3 + $0x18c] ss:$16 sps:$4 sm:$0xff]  }
 0x31f   : > { %v7303_v26 = vpop.f32.mrf.mxu1  ;;  %7596 = vmatprep.subr.bf16.mxu1 %v9521_v21  ;;  %v9575_v36 = vld [vmem:[%s13469_s3 + $0x38c] ss:$16 sps:$4 sm:$0xff]   ;;  %v9570_v61 = vld [vmem:[%s13469_s3 + $0x188] ss:$16 sps:$4 sm:$0xff]  }
 0x320   : > { %7556 = vmatpush1.bf16.msra.mxu0 %v9516_v20  ;;  %v9573_v0 = vld [vmem:[%s13469_s3 + $0x388] ss:$16 sps:$4 sm:$0xff]   ;;  %v9578_v44 = vld [vmem:[%s13469_s3 + $0x16c] ss:$16 sps:$4 sm:$0xff]  }
 0x321   : > { %7557 = vmatprep.subr.bf16.mxu0 %v9524_v24  ;;  %v9581_v21 = vld [vmem:[%s13469_s3 + $0x36c] ss:$16 sps:$4 sm:$0xff]   ;;  %v9576_v43 = vld [vmem:[%s13469_s3 + $0x168] ss:$16 sps:$4 sm:$0xff]  }
 0x322   : > { %7597 = vmatpush1.bf16.msra.mxu1 %v9519_v25  ;;  %v9579_v12 = vld [vmem:[%s13469_s3 + $0x368] ss:$16 sps:$4 sm:$0xff]   ;;  %v9584_v20 = vld [vmem:[%s13469_s3 + $0x14c] ss:$16 sps:$4 sm:$0xff]  }
 0x323   : > { %7598 = vmatprep.subr.bf16.mxu1 %v9527_v27  ;;  %v9587_v13 = vld [vmem:[%s13469_s3 + $0x34c] ss:$16 sps:$4 sm:$0xff]   ;;  %v9582_v25 = vld [vmem:[%s13469_s3 + $0x148] ss:$16 sps:$4 sm:$0xff]  }
 0x324   : > { %7558 = vmatpush1.bf16.msra.mxu0 %v9522_v28  ;;  %v9585_v24 = vld [vmem:[%s13469_s3 + $0x348] ss:$16 sps:$4 sm:$0xff]   ;;  %v9590_v26 = vld [vmem:[%s13469_s3 + $0x12c] ss:$16 sps:$4 sm:$0xff]  }
 0x325   : > { %7559 = vmatprep.subr.bf16.mxu0 %v9530_v29  ;;  %v9593_v27 = vld [vmem:[%s13469_s3 + $0x32c] ss:$16 sps:$4 sm:$0xff]   ;;  %v9588_v28 = vld [vmem:[%s13469_s3 + $0x128] ss:$16 sps:$4 sm:$0xff]  }
 0x326   : > { %7599 = vmatpush1.bf16.msra.mxu1 %v9525_v9  ;;  %v9591_v9 = vld [vmem:[%s13469_s3 + $0x328] ss:$16 sps:$4 sm:$0xff]   ;;  %v9596_v29 = vld [vmem:[%s13469_s3 + $0x10c] ss:$16 sps:$4 sm:$0xff]  }
 0x327   : > { %7600 = vmatprep.subr.bf16.mxu1 %v9533_v19  ;;  %v9599_v19 = vld [vmem:[%s13469_s3 + $0x30c] ss:$16 sps:$4 sm:$0xff]  }
 0x328   : > { %7560 = vmatpush1.bf16.msra.mxu0 %v9528_v32  ;;  %v9594_v32 = vld [vmem:[%s13469_s3 + $0x108] ss:$16 sps:$4 sm:$0xff]  }
 0x329   : > { %7561 = vmatprep.subr.bf16.mxu0 %v9536_v2  ;;  %v9602_v2 = vld [vmem:[%s13469_s3 + $0x4ec] ss:$16 sps:$4 sm:$0xff]  }
 0x32a   : > { %7601 = vmatpush1.bf16.msra.mxu1 %v9531_v30  ;;  %v9597_v30 = vld [vmem:[%s13469_s3 + $0x308] ss:$16 sps:$4 sm:$0xff]  }
 0x32b   : > { %7602 = vmatprep.subr.bf16.mxu1 %v9539_v34  ;;  %v9605_v34 = vld [vmem:[%s13469_s3 + $0x6ec] ss:$16 sps:$4 sm:$0xff]  }
 0x32c   : > { %7562 = vmatpush1.bf16.msra.mxu0 %v9534_v35  ;;  %v9600_v35 = vld [vmem:[%s13469_s3 + $0x4e8] ss:$16 sps:$4 sm:$0xff]  }
 0x32d   : > { %7563 = vmatprep.subr.bf16.mxu0 %v9542_v57  ;;  %v9608_v57 = vld [vmem:[%s13469_s3 + $0x4cc] ss:$16 sps:$4 sm:$0xff]  }
 0x32e   : > { %7603 = vmatpush1.bf16.msra.mxu1 %v9537_v3  ;;  %v9603_v3 = vld [vmem:[%s13469_s3 + $0x6e8] ss:$16 sps:$4 sm:$0xff]  }
 0x32f   : > { %7604 = vmatprep.subr.bf16.mxu1 %v9545_v39 }
 0x330   : > { %7564 = vmatpush1.bf16.msra.mxu0 %v9540_v38  ;;  %v9611_v38 = vld [vmem:[%s13469_s3 + $0x6cc] ss:$16 sps:$4 sm:$0xff]  }
 0x331   : > { %7565 = vmatprep.subr.bf16.mxu0 %v9548_v42 }
 0x332   : > { %7605 = vmatpush1.bf16.msra.mxu1 %v9543_v41 }
 0x333   : > { %7606 = vmatprep.subr.bf16.mxu1 %v9551_v5  ;;  %v9606_v5 = vld [vmem:[%s13469_s3 + $0x4c8] ss:$16 sps:$4 sm:$0xff]  }
 0x334   : > { %7566 = vmatpush1.bf16.msra.mxu0 %v9546_v37 }
 0x335   : > { %7567 = vmatprep.subr.bf16.mxu0 %v9554_v46 }
 0x336   : > { %7607 = vmatpush1.bf16.msra.mxu1 %v9549_v45 }
 0x337   : > { %7608 = vmatprep.subr.bf16.mxu1 %v9557_v18 }
 0x338   : > { %7568 = vmatpush2.bf16.msra.mxu0 %v9552_v48 }
 0x339   : > { %7569 = vmatprep.subr.bf16.mxu0 %v9560_v51  ;;  %v9612_v51 = vld [vmem:[%s13469_s3 + $0x4a8] ss:$16 sps:$4 sm:$0xff]  }
 0x33a   : > { %7609 = vmatpush2.bf16.msra.mxu1 %v9555_v15 }
 0x33b   : > { %7610 = vmatprep.subr.bf16.mxu1 %v9563_v52  ;;  %v9620_v52 = vld [vmem:[%s13469_s3 + $0x48c] ss:$16 sps:$4 sm:$0xff]  }
 0x33c   : > { %7570 = vmatpush2.bf16.msra.mxu0 %v9558_v31 }
 0x33d   : > { %7571 = vmatprep.subr.bf16.mxu0 %v9566_v22  ;;  %v9618_v22 = vld [vmem:[%s13469_s3 + $0x488] ss:$16 sps:$4 sm:$0xff]  }
 0x33e   : > { %7611 = vmatpush2.bf16.msra.mxu1 %v9561_v58  ;;  %v9623_v58 = vld [vmem:[%s13469_s3 + $0x68c] ss:$16 sps:$4 sm:$0xff]  }
 0x33f   : > { %7612 = vmatprep.subr.bf16.mxu1 %v9569_v55  ;;  %v9621_v55 = vld [vmem:[%s13469_s3 + $0x688] ss:$16 sps:$4 sm:$0xff]  }
 0x340   : > { %7572 = vmatpush2.bf16.msra.mxu0 %v9564_v33  ;;  %v9626_v33 = vld [vmem:[%s13469_s3 + $0x46c] ss:$16 sps:$4 sm:$0xff]  }
 0x341   : > { %7573 = vmatprep.subr.bf16.mxu0 %v9572_v6  ;;  %v9624_v6 = vld [vmem:[%s13469_s3 + $0x468] ss:$16 sps:$4 sm:$0xff]  }
 0x342   : > { %7613 = vmatpush2.bf16.msra.mxu1 %v9567_v8  ;;  %v9629_v8 = vld [vmem:[%s13469_s3 + $0x66c] ss:$16 sps:$4 sm:$0xff]  }
 0x343   : > { %7614 = vmatprep.subr.bf16.mxu1 %v9575_v36  ;;  %v9627_v36 = vld [vmem:[%s13469_s3 + $0x668] ss:$16 sps:$4 sm:$0xff]  }
 0x344   : > { %7574 = vmatpush2.bf16.msra.mxu0 %v9570_v61  ;;  %v9632_v61 = vld [vmem:[%s13469_s3 + $0x44c] ss:$16 sps:$4 sm:$0xff]  }
 0x345   : > { %7575 = vmatprep.subr.bf16.mxu0 %v9578_v44  ;;  %v9630_v44 = vld [vmem:[%s13469_s3 + $0x448] ss:$16 sps:$4 sm:$0xff]  }
 0x346   : > { %7615 = vmatpush2.bf16.msra.mxu1 %v9573_v0  ;;  %v9635_v0 = vld [vmem:[%s13469_s3 + $0x64c] ss:$16 sps:$4 sm:$0xff]  }
 0x347   : > { %7616 = vmatprep.subr.bf16.mxu1 %v9581_v21  ;;  %v9633_v21 = vld [vmem:[%s13469_s3 + $0x648] ss:$16 sps:$4 sm:$0xff]  }
 0x348   : > { %7576 = vmatpush2.bf16.msra.mxu0 %v9576_v43  ;;  %v9638_v43 = vld [vmem:[%s13469_s3 + $0x42c] ss:$16 sps:$4 sm:$0xff]  }
 0x349   : > { %7577 = vmatprep.subr.bf16.mxu0 %v9584_v20  ;;  %v9636_v20 = vld [vmem:[%s13469_s3 + $0x428] ss:$16 sps:$4 sm:$0xff]  }
 0x34a   : > { %7617 = vmatpush2.bf16.msra.mxu1 %v9579_v12  ;;  %v9641_v12 = vld [vmem:[%s13469_s3 + $0x62c] ss:$16 sps:$4 sm:$0xff]  }
 0x34b   : > { %7618 = vmatprep.subr.bf16.mxu1 %v9587_v13  ;;  %v9639_v13 = vld [vmem:[%s13469_s3 + $0x628] ss:$16 sps:$4 sm:$0xff]  }
 0x34c   : > { %7578 = vmatpush2.bf16.msra.mxu0 %v9582_v25  ;;  %v9644_v25 = vld [vmem:[%s13469_s3 + $0x40c] ss:$16 sps:$4 sm:$0xff]  }
 0x34d   : > { %7579 = vmatprep.subr.bf16.mxu0 %v9590_v26  ;;  %v9642_v26 = vld [vmem:[%s13469_s3 + $0x408] ss:$16 sps:$4 sm:$0xff]  }
 0x34e   : > { %7619 = vmatpush2.bf16.msra.mxu1 %v9585_v24  ;;  %v9647_v24 = vld [vmem:[%s13469_s3 + $0x60c] ss:$16 sps:$4 sm:$0xff]  }
 0x34f   : > { %7620 = vmatprep.subr.bf16.mxu1 %v9593_v27  ;;  %v9645_v27 = vld [vmem:[%s13469_s3 + $0x608] ss:$16 sps:$4 sm:$0xff]  }
 0x350   : > { %7580 = vmatpush2.bf16.msra.mxu0 %v9588_v28  ;;  %v9650_v28 = vld [vmem:[%s13469_s3 + $0x5ec] ss:$16 sps:$4 sm:$0xff]  }
 0x351   : > { %7581 = vmatprep.subr.bf16.mxu0 %v9596_v29  ;;  %v9648_v29 = vld [vmem:[%s13469_s3 + $0x5e8] ss:$16 sps:$4 sm:$0xff]  }
 0x352   : > { %7621 = vmatpush2.bf16.msra.mxu1 %v9591_v9  ;;  %v9653_v9 = vld [vmem:[%s13469_s3 + $0x7ec] ss:$16 sps:$4 sm:$0xff]  }
 0x353   : > { %7622 = vmatprep.subr.bf16.mxu1 %v9599_v19  ;;  %v9651_v19 = vld [vmem:[%s13469_s3 + $0x7e8] ss:$16 sps:$4 sm:$0xff]  }
 0x354   : > { %7582 = vmatpush2.bf16.msra.mxu0 %v9594_v32  ;;  %v9656_v32 = vld [vmem:[%s13469_s3 + $0x5cc] ss:$16 sps:$4 sm:$0xff]  }
 0x355   : > { %7633 = vmatprep.subr.bf16.mxu0 %v9602_v2  ;;  %v9654_v2 = vld [vmem:[%s13469_s3 + $0x5c8] ss:$16 sps:$4 sm:$0xff]  }
 0x356   : > { %7623 = vmatpush2.bf16.msra.mxu1 %v9597_v30  ;;  %v9659_v30 = vld [vmem:[%s13469_s3 + $0x7cc] ss:$16 sps:$4 sm:$0xff]  }
 0x357   : > { %7674 = vmatprep.subr.bf16.mxu1 %v9605_v34  ;;  %v7339_v39 = vpop.f32.mrf.mxu0  ;;  %7584 = vmatmul.mubr.bf16.vlgmr.msra.gmra.mxu0 %v11927_v1  ;;  %v9609_v1 = vld [vmem:[%s13469_s3 + $0x6c8] ss:$16 sps:$4 sm:$0xff]  }
 0x358   : > { %v7340_v41 = vadd.f32 %v7339_v39, %v12613_v7  ;;  %7634 = vmatpush1.bf16.msra.mxu0 %v9600_v35  ;;  %7665 = vmatprep.mubr.bf16.mxu0 %v11937_v50  ;;  %v9614_v7 = vld [vmem:[%s13469_s3 + $0x4ac] ss:$16 sps:$4 sm:$0xff]   ;;  %v9657_v34 = vld [vmem:[%s13469_s3 + $0x7c8] ss:$16 sps:$4 sm:$0xff]  }
 0x359   : > { %v7380_v42 = vpop.f32.mrf.mxu1  ;;  %7625 = vmatmul.mubr.bf16.vlgmr.msra.gmra.mxu1 %v11932_v4  ;;  %v7341_v37 = vpop.f32.mrf.mxu0  ;;  %7635 = vmatprep.subr.bf16.mxu0 %v9608_v57  ;;  %v9617_v50 = vld [vmem:[%s13469_s3 + $0x6ac] ss:$16 sps:$4 sm:$0xff]   ;;  %v9660_v57 = vld [vmem:[%s13469_s3 + $0x5a8] ss:$16 sps:$4 sm:$0xff]  }
 0x35a   : > { %7675 = vmatpush1.bf16.msra.mxu1 %v9603_v3  ;;  %v12814_v45 = vadd.f32 %v7380_v42, %v7340_v41  ;;  %7706 = vmatprep.mubr.bf16.mxu1 %v11943_v11  ;;  %v7342_v4 = vadd.f32 %v7341_v37, %v12619_v10  ;;  %v9615_v10 = vld [vmem:[%s13469_s3 + $0x6a8] ss:$16 sps:$4 sm:$0xff]   ;;  %v9662_v35 = vld [vmem:[%s13469_s3 + $0x5ac] ss:$16 sps:$4 sm:$0xff]  }
 0x35b   : > { %v7382_v46 = vpop.f32.mrf.mxu1  ;;  %v7343_v18 = vpop.f32.mrf.mxu0  ;;  %7676 = vmatprep.subr.bf16.mxu1 %v9611_v38  ;;  %v9665_v3 = vld [vmem:[%s13469_s3 + $0x7ac] ss:$16 sps:$4 sm:$0xff]   ;;  %v9663_v39 = vld [vmem:[%s13469_s3 + $0x7a8] ss:$16 sps:$4 sm:$0xff]  }
 0x35c   : > { %v12821_v48 = vadd.f32 %v7382_v46, %v7342_v4  ;;  %7636 = vmatpush1.bf16.msra.mxu0 %v9606_v5  ;;  %v9668_v38 = vld [vmem:[%s13469_s3 + $0x58c] ss:$16 sps:$4 sm:$0xff]   ;;  %v9666_v42 = vld [vmem:[%s13469_s3 + $0x588] ss:$16 sps:$4 sm:$0xff]  }
 0x35d   : > { %v7384_v15 = vpop.f32.mrf.mxu1  ;;  %v7344_v11 = vpop.f32.mrf.mxu0  ;;  %7637 = vmatprep.subr.bf16.mxu0 %v9614_v7  ;;  %v9671_v41 = vld [vmem:[%s13469_s3 + $0x78c] ss:$16 sps:$4 sm:$0xff]   ;;  %v9669_v5 = vld [vmem:[%s13469_s3 + $0x788] ss:$16 sps:$4 sm:$0xff]  }
 0x35e   : > { %7677 = vmatpush1.bf16.msra.mxu1 %v9609_v1  ;;  %v9674_v37 = vld [vmem:[%s13469_s3 + $0x56c] ss:$16 sps:$4 sm:$0xff]   ;;  %v9672_v7 = vld [vmem:[%s13469_s3 + $0x568] ss:$16 sps:$4 sm:$0xff]  }
 0x35f   : > { %v7385_v31 = vpop.f32.mrf.mxu1  ;;  %7678 = vmatprep.subr.bf16.mxu1 %v9617_v50  ;;  %v9677_v1 = vld [vmem:[%s13469_s3 + $0x76c] ss:$16 sps:$4 sm:$0xff]   ;;  %v9675_v4 = vld [vmem:[%s13469_s3 + $0x768] ss:$16 sps:$4 sm:$0xff]  }
 0x360   : > { %7638 = vmatpush1.bf16.msra.mxu0 %v9612_v51  ;;  %v9680_v46 = vld [vmem:[%s13469_s3 + $0x54c] ss:$16 sps:$4 sm:$0xff]   ;;  %v9678_v18 = vld [vmem:[%s13469_s3 + $0x548] ss:$16 sps:$4 sm:$0xff]  }
 0x361   : > { %7639 = vmatprep.subr.bf16.mxu0 %v9620_v52  ;;  %v9683_v50 = vld [vmem:[%s13469_s3 + $0x74c] ss:$16 sps:$4 sm:$0xff]   ;;  %v9681_v15 = vld [vmem:[%s13469_s3 + $0x748] ss:$16 sps:$4 sm:$0xff]  }
 0x362   : > { %7679 = vmatpush1.bf16.msra.mxu1 %v9615_v10  ;;  %v9686_v51 = vld [vmem:[%s13469_s3 + $0x52c] ss:$16 sps:$4 sm:$0xff]   ;;  %v9684_v10 = vld [vmem:[%s13469_s3 + $0x528] ss:$16 sps:$4 sm:$0xff]  }
 0x363   : > { %7680 = vmatprep.subr.bf16.mxu1 %v9623_v58  ;;  %v9689_v11 = vld [vmem:[%s13469_s3 + $0x72c] ss:$16 sps:$4 sm:$0xff]   ;;  %v9687_v52 = vld [vmem:[%s13469_s3 + $0x728] ss:$16 sps:$4 sm:$0xff]  }
 0x364   : > { %7640 = vmatpush1.bf16.msra.mxu0 %v9618_v22  ;;  %v9692_v31 = vld [vmem:[%s13469_s3 + $0x50c] ss:$16 sps:$4 sm:$0xff]   ;;  %v9690_v22 = vld [vmem:[%s13469_s3 + $0x508] ss:$16 sps:$4 sm:$0xff]  }
 0x365   : > { %7641 = vmatprep.subr.bf16.mxu0 %v9626_v33  ;;  %v9695_v58 = vld [vmem:[%s13469_s3 + $0x70c] ss:$16 sps:$4 sm:$0xff]  }
 0x366   : > { %7681 = vmatpush1.bf16.msra.mxu1 %v9621_v55  ;;  %v9693_v55 = vld [vmem:[%s13469_s3 + $0x708] ss:$16 sps:$4 sm:$0xff]   ;;  %v9698_v33 = vld [vmem:[%s13469_s3 + $0x8ec] ss:$16 sps:$4 sm:$0xff]  }
 0x367   : > { %7682 = vmatprep.subr.bf16.mxu1 %v9629_v8  ;;  %v9701_v8 = vld [vmem:[%s13469_s3 + $0xaec] ss:$16 sps:$4 sm:$0xff]  }
 0x368   : > { %7642 = vmatpush1.bf16.msra.mxu0 %v9624_v6  ;;  %v9696_v6 = vld [vmem:[%s13469_s3 + $0x8e8] ss:$16 sps:$4 sm:$0xff]  }
 0x369   : > { %7643 = vmatprep.subr.bf16.mxu0 %v9632_v61  ;;  %v9704_v61 = vld [vmem:[%s13469_s3 + $0x8cc] ss:$16 sps:$4 sm:$0xff]  }
 0x36a   : > { %7683 = vmatpush1.bf16.msra.mxu1 %v9627_v36  ;;  %v9699_v36 = vld [vmem:[%s13469_s3 + $0xae8] ss:$16 sps:$4 sm:$0xff]  }
 0x36b   : > { %7684 = vmatprep.subr.bf16.mxu1 %v9635_v0 }
 0x36c   : > { %7644 = vmatpush1.bf16.msra.mxu0 %v9630_v44  ;;  %v9707_v44 = vld [vmem:[%s13469_s3 + $0xacc] ss:$16 sps:$4 sm:$0xff]  }
 0x36d   : > { %7645 = vmatprep.subr.bf16.mxu0 %v9638_v43 }
 0x36e   : > { %7685 = vmatpush1.bf16.msra.mxu1 %v9633_v21 }
 0x36f   : > { %7686 = vmatprep.subr.bf16.mxu1 %v9641_v12  ;;  %v9702_v12 = vld [vmem:[%s13469_s3 + $0x8c8] ss:$16 sps:$4 sm:$0xff]  }
 0x370   : > { %7646 = vmatpush1.bf16.msra.mxu0 %v9636_v20 }
 0x371   : > { %7647 = vmatprep.subr.bf16.mxu0 %v9644_v25 }
 0x372   : > { %7687 = vmatpush1.bf16.msra.mxu1 %v9639_v13 }
 0x373   : > { %7688 = vmatprep.subr.bf16.mxu1 %v9647_v24 }
 0x374   : > { %7648 = vmatpush1.bf16.msra.mxu0 %v9642_v26 }
 0x375   : > { %7649 = vmatprep.subr.bf16.mxu0 %v9650_v28  ;;  %v9708_v28 = vld [vmem:[%s13469_s3 + $0x8a8] ss:$16 sps:$4 sm:$0xff]  }
 0x376   : > { %7689 = vmatpush1.bf16.msra.mxu1 %v9645_v27 }
 0x377   : > { %7690 = vmatprep.subr.bf16.mxu1 %v9653_v9  ;;  %v9716_v9 = vld [vmem:[%s13469_s3 + $0x88c] ss:$16 sps:$4 sm:$0xff]  }
 0x378   : > { %7650 = vmatpush2.bf16.msra.mxu0 %v9648_v29 }
 0x379   : > { %7651 = vmatprep.subr.bf16.mxu0 %v9656_v32  ;;  %v9714_v32 = vld [vmem:[%s13469_s3 + $0x888] ss:$16 sps:$4 sm:$0xff]  }
 0x37a   : > { %7691 = vmatpush2.bf16.msra.mxu1 %v9651_v19  ;;  %v9719_v19 = vld [vmem:[%s13469_s3 + $0xa8c] ss:$16 sps:$4 sm:$0xff]  }
 0x37b   : > { %7692 = vmatprep.subr.bf16.mxu1 %v9659_v30  ;;  %v9717_v30 = vld [vmem:[%s13469_s3 + $0xa88] ss:$16 sps:$4 sm:$0xff]  }
 0x37c   : > { %7652 = vmatpush2.bf16.msra.mxu0 %v9654_v2  ;;  %v9722_v2 = vld [vmem:[%s13469_s3 + $0x86c] ss:$16 sps:$4 sm:$0xff]  }
 0x37d   : > { %7653 = vmatprep.subr.bf16.mxu0 %v9662_v35  ;;  %v9720_v35 = vld [vmem:[%s13469_s3 + $0x868] ss:$16 sps:$4 sm:$0xff]  }
 0x37e   : > { %7693 = vmatpush2.bf16.msra.mxu1 %v9657_v34  ;;  %v9725_v34 = vld [vmem:[%s13469_s3 + $0xa6c] ss:$16 sps:$4 sm:$0xff]  }
 0x37f   : > { %7694 = vmatprep.subr.bf16.mxu1 %v9665_v3  ;;  %v9723_v3 = vld [vmem:[%s13469_s3 + $0xa68] ss:$16 sps:$4 sm:$0xff]  }
 0x380   : > { %7654 = vmatpush2.bf16.msra.mxu0 %v9660_v57  ;;  %v9728_v57 = vld [vmem:[%s13469_s3 + $0x84c] ss:$16 sps:$4 sm:$0xff]  }
 0x381   : > { %7655 = vmatprep.subr.bf16.mxu0 %v9668_v38  ;;  %v9726_v38 = vld [vmem:[%s13469_s3 + $0x848] ss:$16 sps:$4 sm:$0xff]  }
 0x382   : > { %7695 = vmatpush2.bf16.msra.mxu1 %v9663_v39  ;;  %v9731_v39 = vld [vmem:[%s13469_s3 + $0xa4c] ss:$16 sps:$4 sm:$0xff]  }
 0x383   : > { %7696 = vmatprep.subr.bf16.mxu1 %v9671_v41  ;;  %v9729_v41 = vld [vmem:[%s13469_s3 + $0xa48] ss:$16 sps:$4 sm:$0xff]  }
 0x384   : > { %7656 = vmatpush2.bf16.msra.mxu0 %v9666_v42  ;;  %v9734_v42 = vld [vmem:[%s13469_s3 + $0x82c] ss:$16 sps:$4 sm:$0xff]  }
 0x385   : > { %7657 = vmatprep.subr.bf16.mxu0 %v9674_v37  ;;  %v9732_v37 = vld [vmem:[%s13469_s3 + $0x828] ss:$16 sps:$4 sm:$0xff]  }
 0x386   : > { %7697 = vmatpush2.bf16.msra.mxu1 %v9669_v5  ;;  %v9737_v5 = vld [vmem:[%s13469_s3 + $0xa2c] ss:$16 sps:$4 sm:$0xff]  }
 0x387   : > { %7698 = vmatprep.subr.bf16.mxu1 %v9677_v1  ;;  %v9735_v1 = vld [vmem:[%s13469_s3 + $0xa28] ss:$16 sps:$4 sm:$0xff]  }
 0x388   : > { %7658 = vmatpush2.bf16.msra.mxu0 %v9672_v7  ;;  %v9740_v7 = vld [vmem:[%s13469_s3 + $0x80c] ss:$16 sps:$4 sm:$0xff]  }
 0x389   : > { %7659 = vmatprep.subr.bf16.mxu0 %v9680_v46  ;;  %v9738_v46 = vld [vmem:[%s13469_s3 + $0x808] ss:$16 sps:$4 sm:$0xff]  }
 0x38a   : > { %7699 = vmatpush2.bf16.msra.mxu1 %v9675_v4  ;;  %v9743_v4 = vld [vmem:[%s13469_s3 + $0xa0c] ss:$16 sps:$4 sm:$0xff]  }
 0x38b   : > { %7700 = vmatprep.subr.bf16.mxu1 %v9683_v50  ;;  %v9741_v50 = vld [vmem:[%s13469_s3 + $0xa08] ss:$16 sps:$4 sm:$0xff]  }
 0x38c   : > { %7660 = vmatpush2.bf16.msra.mxu0 %v9678_v18  ;;  %v9746_v18 = vld [vmem:[%s13469_s3 + $0x9ec] ss:$16 sps:$4 sm:$0xff]  }
 0x38d   : > { %7661 = vmatprep.subr.bf16.mxu0 %v9686_v51  ;;  %v9744_v51 = vld [vmem:[%s13469_s3 + $0x9e8] ss:$16 sps:$4 sm:$0xff]  }
 0x38e   : > { %7701 = vmatpush2.bf16.msra.mxu1 %v9681_v15  ;;  %v9749_v15 = vld [vmem:[%s13469_s3 + $0xbec] ss:$16 sps:$4 sm:$0xff]  }
 0x38f   : > { %7702 = vmatprep.subr.bf16.mxu1 %v9689_v11  ;;  %v9747_v11 = vld [vmem:[%s13469_s3 + $0xbe8] ss:$16 sps:$4 sm:$0xff]  }
 0x390   : > { %7662 = vmatpush2.bf16.msra.mxu0 %v9684_v10  ;;  %v9752_v10 = vld [vmem:[%s13469_s3 + $0x9cc] ss:$16 sps:$4 sm:$0xff]  }
 0x391   : > { %7663 = vmatprep.subr.bf16.mxu0 %v9692_v31  ;;  %v9750_v31 = vld [vmem:[%s13469_s3 + $0x9c8] ss:$16 sps:$4 sm:$0xff]  }
 0x392   : > { %7703 = vmatpush2.bf16.msra.mxu1 %v9687_v52  ;;  %v9755_v52 = vld [vmem:[%s13469_s3 + $0xbcc] ss:$16 sps:$4 sm:$0xff]  }
 0x393   : > { %7704 = vmatprep.subr.bf16.mxu1 %v9695_v58  ;;  %v9753_v58 = vld [vmem:[%s13469_s3 + $0xbc8] ss:$16 sps:$4 sm:$0xff]  }
 0x394   : > { %7664 = vmatpush2.bf16.msra.mxu0 %v9690_v22  ;;  %v9758_v22 = vld [vmem:[%s13469_s3 + $0x9ac] ss:$16 sps:$4 sm:$0xff]  }
 0x395   : > { %7715 = vmatprep.subr.bf16.mxu0 %v9698_v33  ;;  %v9756_v33 = vld [vmem:[%s13469_s3 + $0x9a8] ss:$16 sps:$4 sm:$0xff]  }
 0x396   : > { %7705 = vmatpush2.bf16.msra.mxu1 %v9693_v55  ;;  %v9761_v55 = vld [vmem:[%s13469_s3 + $0xbac] ss:$16 sps:$4 sm:$0xff]  }
 0x397   : > { %7756 = vmatprep.subr.bf16.mxu1 %v9701_v8  ;;  %v7421_v0 = vpop.f32.mrf.mxu0  ;;  %7666 = vmatmul.mubr.bf16.vlgmr.msra.gmra.mxu0 %v12147_v60  ;;  %v9705_v60 = vld [vmem:[%s13469_s3 + $0xac8] ss:$16 sps:$4 sm:$0xff]  }
 0x398   : > { %v7422_v21 = vadd.f32 %v7421_v0, %v12814_v45  ;;  %7716 = vmatpush1.bf16.msra.mxu0 %v9696_v6  ;;  %7747 = vmatprep.mubr.bf16.mxu0 %v12157_v63  ;;  %v9710_v45 = vld [vmem:[%s13469_s3 + $0x8ac] ss:$16 sps:$4 sm:$0xff]   ;;  %v9759_v8 = vld [vmem:[%s13469_s3 + $0xba8] ss:$16 sps:$4 sm:$0xff]  }
 0x399   : > { %v7462_v43 = vpop.f32.mrf.mxu1  ;;  %7707 = vmatmul.mubr.bf16.vlgmr.msra.gmra.mxu1 %v12152_v59  ;;  %v7423_v20 = vpop.f32.mrf.mxu0  ;;  %7717 = vmatprep.subr.bf16.mxu0 %v9704_v61  ;;  %v9713_v63 = vld [vmem:[%s13469_s3 + $0xaac] ss:$16 sps:$4 sm:$0xff]   ;;  %v9762_v61 = vld [vmem:[%s13469_s3 + $0x988] ss:$16 sps:$4 sm:$0xff]  }
 0x39a   : > { %7757 = vmatpush1.bf16.msra.mxu1 %v9699_v36  ;;  %v13016_v13 = vadd.f32 %v7462_v43, %v7422_v21  ;;  %7788 = vmatprep.mubr.bf16.mxu1 %v12163_v62  ;;  %v7424_v59 = vadd.f32 %v7423_v20, %v12821_v48  ;;  %v9711_v48 = vld [vmem:[%s13469_s3 + $0xaa8] ss:$16 sps:$4 sm:$0xff]   ;;  %v9764_v6 = vld [vmem:[%s13469_s3 + $0x98c] ss:$16 sps:$4 sm:$0xff]  }
 0x39b   : > { %v7464_v25 = vpop.f32.mrf.mxu1  ;;  %v7425_v24 = vpop.f32.mrf.mxu0  ;;  %7758 = vmatprep.subr.bf16.mxu1 %v9707_v44  ;;  %v9767_v36 = vld [vmem:[%s13469_s3 + $0xb8c] ss:$16 sps:$4 sm:$0xff]   ;;  %v9765_v0 = vld [vmem:[%s13469_s3 + $0xb88] ss:$16 sps:$4 sm:$0xff]  }
 0x39c   : > { %v13023_v26 = vadd.f32 %v7464_v25, %v7424_v59  ;;  %7718 = vmatpush1.bf16.msra.mxu0 %v9702_v12  ;;  %v9770_v44 = vld [vmem:[%s13469_s3 + $0x96c] ss:$16 sps:$4 sm:$0xff]   ;;  %v9768_v43 = vld [vmem:[%s13469_s3 + $0x968] ss:$16 sps:$4 sm:$0xff]  }
 0x39d   : > { %v7466_v27 = vpop.f32.mrf.mxu1  ;;  %v7426_v62 = vpop.f32.mrf.mxu0  ;;  %7719 = vmatprep.subr.bf16.mxu0 %v9710_v45  ;;  %v9773_v21 = vld [vmem:[%s13469_s3 + $0xb6c] ss:$16 sps:$4 sm:$0xff]   ;;  %v9771_v12 = vld [vmem:[%s13469_s3 + $0xb68] ss:$16 sps:$4 sm:$0xff]  }
 0x39e   : > { %7759 = vmatpush1.bf16.msra.mxu1 %v9705_v60  ;;  %v9776_v20 = vld [vmem:[%s13469_s3 + $0x94c] ss:$16 sps:$4 sm:$0xff]   ;;  %v9774_v45 = vld [vmem:[%s13469_s3 + $0x948] ss:$16 sps:$4 sm:$0xff]  }
 0x39f   : > { %v7467_v29 = vpop.f32.mrf.mxu1  ;;  %7760 = vmatprep.subr.bf16.mxu1 %v9713_v63  ;;  %v9779_v60 = vld [vmem:[%s13469_s3 + $0xb4c] ss:$16 sps:$4 sm:$0xff]   ;;  %v9777_v59 = vld [vmem:[%s13469_s3 + $0xb48] ss:$16 sps:$4 sm:$0xff]  }
 0x3a0   : > { %7720 = vmatpush1.bf16.msra.mxu0 %v9708_v28  ;;  %v9782_v25 = vld [vmem:[%s13469_s3 + $0x92c] ss:$16 sps:$4 sm:$0xff]   ;;  %v9780_v24 = vld [vmem:[%s13469_s3 + $0x928] ss:$16 sps:$4 sm:$0xff]  }
 0x3a1   : > { %7721 = vmatprep.subr.bf16.mxu0 %v9716_v9  ;;  %v9785_v63 = vld [vmem:[%s13469_s3 + $0xb2c] ss:$16 sps:$4 sm:$0xff]   ;;  %v9783_v27 = vld [vmem:[%s13469_s3 + $0xb28] ss:$16 sps:$4 sm:$0xff]  }
 0x3a2   : > { %7761 = vmatpush1.bf16.msra.mxu1 %v9711_v48  ;;  %v9788_v28 = vld [vmem:[%s13469_s3 + $0x90c] ss:$16 sps:$4 sm:$0xff]   ;;  %v9786_v48 = vld [vmem:[%s13469_s3 + $0x908] ss:$16 sps:$4 sm:$0xff]  }
 0x3a3   : > { %7762 = vmatprep.subr.bf16.mxu1 %v9719_v19  ;;  %v9791_v62 = vld [vmem:[%s13469_s3 + $0xb0c] ss:$16 sps:$4 sm:$0xff]   ;;  %v9789_v9 = vld [vmem:[%s13469_s3 + $0xb08] ss:$16 sps:$4 sm:$0xff]  }
 0x3a4   : > { %7722 = vmatpush1.bf16.msra.mxu0 %v9714_v32  ;;  %v9794_v29 = vld [vmem:[%s13469_s3 + $0xcec] ss:$16 sps:$4 sm:$0xff]   ;;  %v9792_v32 = vld [vmem:[%s13469_s3 + $0xce8] ss:$16 sps:$4 sm:$0xff]  }
 0x3a5   : > { %7723 = vmatprep.subr.bf16.mxu0 %v9722_v2  ;;  %v9797_v19 = vld [vmem:[%s13469_s3 + $0xeec] ss:$16 sps:$4 sm:$0xff]  }
 0x3a6   : > { %7763 = vmatpush1.bf16.msra.mxu1 %v9717_v30  ;;  %v9795_v30 = vld [vmem:[%s13469_s3 + $0xee8] ss:$16 sps:$4 sm:$0xff]   ;;  %v9800_v2 = vld [vmem:[%s13469_s3 + $0xccc] ss:$16 sps:$4 sm:$0xff]  }
 0x3a7   : > { %7764 = vmatprep.subr.bf16.mxu1 %v9725_v34 }
 0x3a8   : > { %7724 = vmatpush1.bf16.msra.mxu0 %v9720_v35  ;;  %v9803_v35 = vld [vmem:[%s13469_s3 + $0xecc] ss:$16 sps:$4 sm:$0xff]  }
 0x3a9   : > { %7725 = vmatprep.subr.bf16.mxu0 %v9728_v57 }
 0x3aa   : > { %7765 = vmatpush1.bf16.msra.mxu1 %v9723_v3 }
 0x3ab   : > { %7766 = vmatprep.subr.bf16.mxu1 %v9731_v39  ;;  %v9798_v39 = vld [vmem:[%s13469_s3 + $0xcc8] ss:$16 sps:$4 sm:$0xff]  }
 0x3ac   : > { %7726 = vmatpush1.bf16.msra.mxu0 %v9726_v38 }
 0x3ad   : > { %7727 = vmatprep.subr.bf16.mxu0 %v9734_v42 }
 0x3ae   : > { %7767 = vmatpush1.bf16.msra.mxu1 %v9729_v41 }
 0x3af   : > { %7768 = vmatprep.subr.bf16.mxu1 %v9737_v5 }
 0x3b0   : > { %7728 = vmatpush1.bf16.msra.mxu0 %v9732_v37 }
 0x3b1   : > { %7729 = vmatprep.subr.bf16.mxu0 %v9740_v7  ;;  %v9804_v7 = vld [vmem:[%s13469_s3 + $0xca8] ss:$16 sps:$4 sm:$0xff]  }
 0x3b2   : > { %7769 = vmatpush1.bf16.msra.mxu1 %v9735_v1 }
 0x3b3   : > { %7770 = vmatprep.subr.bf16.mxu1 %v9743_v4  ;;  %v9812_v4 = vld [vmem:[%s13469_s3 + $0xc8c] ss:$16 sps:$4 sm:$0xff]  }
 0x3b4   : > { %7730 = vmatpush1.bf16.msra.mxu0 %v9738_v46 }
 0x3b5   : > { %7731 = vmatprep.subr.bf16.mxu0 %v9746_v18  ;;  %v9810_v18 = vld [vmem:[%s13469_s3 + $0xc88] ss:$16 sps:$4 sm:$0xff]  }
 0x3b6   : > { %7771 = vmatpush1.bf16.msra.mxu1 %v9741_v50  ;;  %v9815_v50 = vld [vmem:[%s13469_s3 + $0xe8c] ss:$16 sps:$4 sm:$0xff]  }
 0x3b7   : > { %7772 = vmatprep.subr.bf16.mxu1 %v9749_v15  ;;  %v9813_v15 = vld [vmem:[%s13469_s3 + $0xe88] ss:$16 sps:$4 sm:$0xff]  }
 0x3b8   : > { %7732 = vmatpush2.bf16.msra.mxu0 %v9744_v51  ;;  %v9818_v51 = vld [vmem:[%s13469_s3 + $0xc6c] ss:$16 sps:$4 sm:$0xff]  }
 0x3b9   : > { %7733 = vmatprep.subr.bf16.mxu0 %v9752_v10  ;;  %v9816_v10 = vld [vmem:[%s13469_s3 + $0xc68] ss:$16 sps:$4 sm:$0xff]  }
 0x3ba   : > { %7773 = vmatpush2.bf16.msra.mxu1 %v9747_v11  ;;  %v9821_v11 = vld [vmem:[%s13469_s3 + $0xe6c] ss:$16 sps:$4 sm:$0xff]  }
 0x3bb   : > { %7774 = vmatprep.subr.bf16.mxu1 %v9755_v52  ;;  %v9819_v52 = vld [vmem:[%s13469_s3 + $0xe68] ss:$16 sps:$4 sm:$0xff]  }
 0x3bc   : > { %7734 = vmatpush2.bf16.msra.mxu0 %v9750_v31  ;;  %v9824_v31 = vld [vmem:[%s13469_s3 + $0xc4c] ss:$16 sps:$4 sm:$0xff]  }
 0x3bd   : > { %7735 = vmatprep.subr.bf16.mxu0 %v9758_v22  ;;  %v9822_v22 = vld [vmem:[%s13469_s3 + $0xc48] ss:$16 sps:$4 sm:$0xff]  }
 0x3be   : > { %7775 = vmatpush2.bf16.msra.mxu1 %v9753_v58  ;;  %v9827_v58 = vld [vmem:[%s13469_s3 + $0xe4c] ss:$16 sps:$4 sm:$0xff]  }
 0x3bf   : > { %7776 = vmatprep.subr.bf16.mxu1 %v9761_v55  ;;  %v9825_v55 = vld [vmem:[%s13469_s3 + $0xe48] ss:$16 sps:$4 sm:$0xff]  }
 0x3c0   : > { %7736 = vmatpush2.bf16.msra.mxu0 %v9756_v33  ;;  %v9830_v33 = vld [vmem:[%s13469_s3 + $0xc2c] ss:$16 sps:$4 sm:$0xff]  }
 0x3c1   : > { %7737 = vmatprep.subr.bf16.mxu0 %v9764_v6  ;;  %v9828_v6 = vld [vmem:[%s13469_s3 + $0xc28] ss:$16 sps:$4 sm:$0xff]  }
 0x3c2   : > { %7777 = vmatpush2.bf16.msra.mxu1 %v9759_v8  ;;  %v9833_v8 = vld [vmem:[%s13469_s3 + $0xe2c] ss:$16 sps:$4 sm:$0xff]  }
 0x3c3   : > { %7778 = vmatprep.subr.bf16.mxu1 %v9767_v36  ;;  %v9831_v36 = vld [vmem:[%s13469_s3 + $0xe28] ss:$16 sps:$4 sm:$0xff]  }
 0x3c4   : > { %7738 = vmatpush2.bf16.msra.mxu0 %v9762_v61  ;;  %v9836_v61 = vld [vmem:[%s13469_s3 + $0xc0c] ss:$16 sps:$4 sm:$0xff]  }
 0x3c5   : > { %7739 = vmatprep.subr.bf16.mxu0 %v9770_v44  ;;  %v9834_v44 = vld [vmem:[%s13469_s3 + $0xc08] ss:$16 sps:$4 sm:$0xff]  }
 0x3c6   : > { %7779 = vmatpush2.bf16.msra.mxu1 %v9765_v0  ;;  %v9839_v0 = vld [vmem:[%s13469_s3 + $0xe0c] ss:$16 sps:$4 sm:$0xff]  }
 0x3c7   : > { %7780 = vmatprep.subr.bf16.mxu1 %v9773_v21  ;;  %v9837_v21 = vld [vmem:[%s13469_s3 + $0xe08] ss:$16 sps:$4 sm:$0xff]  }
 0x3c8   : > { %7740 = vmatpush2.bf16.msra.mxu0 %v9768_v43  ;;  %v9842_v43 = vld [vmem:[%s13469_s3 + $0xdec] ss:$16 sps:$4 sm:$0xff]  }
 0x3c9   : > { %7741 = vmatprep.subr.bf16.mxu0 %v9776_v20  ;;  %v9840_v20 = vld [vmem:[%s13469_s3 + $0xde8] ss:$16 sps:$4 sm:$0xff]  }
 0x3ca   : > { %7781 = vmatpush2.bf16.msra.mxu1 %v9771_v12  ;;  %v9845_v12 = vld [vmem:[%s13469_s3 + $0xfec] ss:$16 sps:$4 sm:$0xff]  }
 0x3cb   : > { %7782 = vmatprep.subr.bf16.mxu1 %v9779_v60  ;;  %v9843_v60 = vld [vmem:[%s13469_s3 + $0xfe8] ss:$16 sps:$4 sm:$0xff]  }
 0x3cc   : > { %7742 = vmatpush2.bf16.msra.mxu0 %v9774_v45  ;;  %v9848_v45 = vld [vmem:[%s13469_s3 + $0xdcc] ss:$16 sps:$4 sm:$0xff]  }
 0x3cd   : > { %7743 = vmatprep.subr.bf16.mxu0 %v9782_v25  ;;  %v9846_v25 = vld [vmem:[%s13469_s3 + $0xdc8] ss:$16 sps:$4 sm:$0xff]  }
 0x3ce   : > { %7783 = vmatpush2.bf16.msra.mxu1 %v9777_v59  ;;  %v9851_v59 = vld [vmem:[%s13469_s3 + $0xfcc] ss:$16 sps:$4 sm:$0xff]  }
 0x3cf   : > { %7784 = vmatprep.subr.bf16.mxu1 %v9785_v63  ;;  %v9849_v63 = vld [vmem:[%s13469_s3 + $0xfc8] ss:$16 sps:$4 sm:$0xff]  }
 0x3d0   : > { %7744 = vmatpush2.bf16.msra.mxu0 %v9780_v24  ;;  %v9854_v24 = vld [vmem:[%s13469_s3 + $0xdac] ss:$16 sps:$4 sm:$0xff]  }
 0x3d1   : > { %7745 = vmatprep.subr.bf16.mxu0 %v9788_v28  ;;  %v9852_v28 = vld [vmem:[%s13469_s3 + $0xda8] ss:$16 sps:$4 sm:$0xff]  }
 0x3d2   : > { %7785 = vmatpush2.bf16.msra.mxu1 %v9783_v27  ;;  %v9857_v27 = vld [vmem:[%s13469_s3 + $0xfac] ss:$16 sps:$4 sm:$0xff]  }
 0x3d3   : > { %7786 = vmatprep.subr.bf16.mxu1 %v9791_v62  ;;  %v9855_v62 = vld [vmem:[%s13469_s3 + $0xfa8] ss:$16 sps:$4 sm:$0xff]  }
 0x3d4   : > { %7746 = vmatpush2.bf16.msra.mxu0 %v9786_v48  ;;  %v9860_v48 = vld [vmem:[%s13469_s3 + $0xd8c] ss:$16 sps:$4 sm:$0xff]  }
 0x3d5   : > { %7797 = vmatprep.subr.bf16.mxu0 %v9794_v29  ;;  %v9858_v29 = vld [vmem:[%s13469_s3 + $0xd88] ss:$16 sps:$4 sm:$0xff]  }
 0x3d6   : > { %7787 = vmatpush2.bf16.msra.mxu1 %v9789_v9  ;;  %v9863_v9 = vld [vmem:[%s13469_s3 + $0xf8c] ss:$16 sps:$4 sm:$0xff]  }
 0x3d7   : > { %7838 = vmatprep.subr.bf16.mxu1 %v9797_v19  ;;  %v7503_v34 = vpop.f32.mrf.mxu0  ;;  %7748 = vmatmul.mubr.bf16.vlgmr.msra.gmra.mxu0 %v12364_v53  ;;  %v9801_v53 = vld [vmem:[%s13469_s3 + $0xec8] ss:$16 sps:$4 sm:$0xff]  }
 0x3d8   : > { %v7504_v3 = vadd.f32 %v7503_v34, %v13016_v13  ;;  %7798 = vmatpush1.bf16.msra.mxu0 %v9792_v32  ;;  %7829 = vmatprep.mubr.bf16.mxu0 %v12380_v56  ;;  %v9806_v13 = vld [vmem:[%s13469_s3 + $0xcac] ss:$16 sps:$4 sm:$0xff]   ;;  %v9861_v19 = vld [vmem:[%s13469_s3 + $0xf88] ss:$16 sps:$4 sm:$0xff]  }
 0x3d9   : > { %v7544_v57 = vpop.f32.mrf.mxu1  ;;  %7789 = vmatmul.mubr.bf16.vlgmr.msra.gmra.mxu1 %v12369_v54  ;;  %v7505_v38 = vpop.f32.mrf.mxu0  ;;  %7799 = vmatprep.subr.bf16.mxu0 %v9800_v2  ;;  %v9809_v56 = vld [vmem:[%s13469_s3 + $0xeac] ss:$16 sps:$4 sm:$0xff]   ;;  %v9864_v2 = vld [vmem:[%s13469_s3 + $0xd68] ss:$16 sps:$4 sm:$0xff]  }
 0x3da   : > { %7839 = vmatpush1.bf16.msra.mxu1 %v9795_v30  ;;  %v13218_v41 = vadd.f32 %v7544_v57, %v7504_v3  ;;  %7870 = vmatprep.mubr.bf16.mxu1 %v12413_v16  ;;  %v7506_v54 = vadd.f32 %v7505_v38, %v13023_v26  ;;  %v9807_v26 = vld [vmem:[%s13469_s3 + $0xea8] ss:$16 sps:$4 sm:$0xff]   ;;  %v9866_v32 = vld [vmem:[%s13469_s3 + $0xd6c] ss:$16 sps:$4 sm:$0xff]  }
 0x3db   : > { %v7546_v42 = vpop.f32.mrf.mxu1  ;;  %v7507_v5 = vpop.f32.mrf.mxu0  ;;  %7840 = vmatprep.subr.bf16.mxu1 %v9803_v35  ;;  %v9869_v30 = vld [vmem:[%s13469_s3 + $0xf6c] ss:$16 sps:$4 sm:$0xff]   ;;  %v9867_v34 = vld [vmem:[%s13469_s3 + $0xf68] ss:$16 sps:$4 sm:$0xff]  }
 0x3dc   : > { %v13225_v37 = vadd.f32 %v7546_v42, %v7506_v54  ;;  %7800 = vmatpush1.bf16.msra.mxu0 %v9798_v39  ;;  %v9872_v35 = vld [vmem:[%s13469_s3 + $0xd4c] ss:$16 sps:$4 sm:$0xff]   ;;  %v9870_v57 = vld [vmem:[%s13469_s3 + $0xd48] ss:$16 sps:$4 sm:$0xff]  }
 0x3dd   : > { %v7548_v1 = vpop.f32.mrf.mxu1  ;;  %v7508_v16 = vpop.f32.mrf.mxu0  ;;  %7801 = vmatprep.subr.bf16.mxu0 %v9806_v13  ;;  %v9875_v3 = vld [vmem:[%s13469_s3 + $0xf4c] ss:$16 sps:$4 sm:$0xff]   ;;  %v9873_v39 = vld [vmem:[%s13469_s3 + $0xf48] ss:$16 sps:$4 sm:$0xff]  }
 0x3de   : > { %7841 = vmatpush1.bf16.msra.mxu1 %v9801_v53  ;;  %v9878_v38 = vld [vmem:[%s13469_s3 + $0xd2c] ss:$16 sps:$4 sm:$0xff]   ;;  %v9876_v13 = vld [vmem:[%s13469_s3 + $0xd28] ss:$16 sps:$4 sm:$0xff]  }
 0x3df   : > { %v7549_v46 = vpop.f32.mrf.mxu1  ;;  %7842 = vmatprep.subr.bf16.mxu1 %v9809_v56  ;;  %v9881_v53 = vld [vmem:[%s13469_s3 + $0xf2c] ss:$16 sps:$4 sm:$0xff]   ;;  %v9879_v54 = vld [vmem:[%s13469_s3 + $0xf28] ss:$16 sps:$4 sm:$0xff]  }
 0x3e0   : > { %7802 = vmatpush1.bf16.msra.mxu0 %v9804_v7  ;;  %v9884_v42 = vld [vmem:[%s13469_s3 + $0xd0c] ss:$16 sps:$4 sm:$0xff]   ;;  %v9882_v5 = vld [vmem:[%s13469_s3 + $0xd08] ss:$16 sps:$4 sm:$0xff]   ;;  %v9892_v7 = vld [vmem:[%s13470_s4] sm:$0xf] }
 0x3e1   : > { %7803 = vmatprep.subr.bf16.mxu0 %v9812_v4  ;;  %v9887_v56 = vld [vmem:[%s13469_s3 + $0xf0c] ss:$16 sps:$4 sm:$0xff]   ;;  %v9885_v1 = vld [vmem:[%s13469_s3 + $0xf08] ss:$16 sps:$4 sm:$0xff]   ;;  %v4654_v16 = vrot.slane %v9892_v7, %v11079_v14 }
 0x3e2   : > { %7843 = vmatpush1.bf16.msra.mxu1 %v9807_v26  ;;  %v4658_v26 = vrot.slane %v9892_v7, %v11091_v23  ;;  %v9896_v7 = vld [vmem:[%s10131_s8 + $0x18] sm:$0xff] }
 0x3e3   : > { %7844 = vmatprep.subr.bf16.mxu1 %v9815_v50 }
 0x3e4   : > { %7804 = vmatpush1.bf16.msra.mxu0 %v9810_v18 }
 0x3e5   : > { %7805 = vmatprep.subr.bf16.mxu0 %v9818_v51 }
 0x3e6   : > { %7845 = vmatpush1.bf16.msra.mxu1 %v9813_v15 }
 0x3e7   : > { %7846 = vmatprep.subr.bf16.mxu1 %v9821_v11 }
 0x3e8   : > { %7806 = vmatpush1.bf16.msra.mxu0 %v9816_v10 }
 0x3e9   : > { %7807 = vmatprep.subr.bf16.mxu0 %v9824_v31 }
 0x3ea   : > { %7847 = vmatpush1.bf16.msra.mxu1 %v9819_v52 }
 0x3eb   : > { %7848 = vmatprep.subr.bf16.mxu1 %v9827_v58 }
 0x3ec   : > { %7808 = vmatpush1.bf16.msra.mxu0 %v9822_v22 }
 0x3ed   : > { %7809 = vmatprep.subr.bf16.mxu0 %v9830_v33 }
 0x3ee   : > { %7849 = vmatpush1.bf16.msra.mxu1 %v9825_v55 }
 0x3ef   : > { %7850 = vmatprep.subr.bf16.mxu1 %v9833_v8 }
 0x3f0   : > { %7810 = vmatpush1.bf16.msra.mxu0 %v9828_v6 }
 0x3f1   : > { %7811 = vmatprep.subr.bf16.mxu0 %v9836_v61 }
 0x3f2   : > { %7851 = vmatpush1.bf16.msra.mxu1 %v9831_v36 }
 0x3f3   : > { %7852 = vmatprep.subr.bf16.mxu1 %v9839_v0 }
 0x3f4   : > { %7812 = vmatpush1.bf16.msra.mxu0 %v9834_v44 }
 0x3f5   : > { %7813 = vmatprep.subr.bf16.mxu0 %v9842_v43 }
 0x3f6   : > { %7853 = vmatpush1.bf16.msra.mxu1 %v9837_v21 }
 0x3f7   : > { %7854 = vmatprep.subr.bf16.mxu1 %v9845_v12 }
 0x3f8   : > { %7814 = vmatpush2.bf16.msra.mxu0 %v9840_v20 }
 0x3f9   : > { %7815 = vmatprep.subr.bf16.mxu0 %v9848_v45 }
 0x3fa   : > { %7855 = vmatpush2.bf16.msra.mxu1 %v9843_v60 }
 0x3fb   : > { %7856 = vmatprep.subr.bf16.mxu1 %v9851_v59 }
 0x3fc   : > { %7816 = vmatpush2.bf16.msra.mxu0 %v9846_v25 }
 0x3fd   : > { %7817 = vmatprep.subr.bf16.mxu0 %v9854_v24 }
 0x3fe   : > { %7857 = vmatpush2.bf16.msra.mxu1 %v9849_v63 }
 0x3ff   : > { %7858 = vmatprep.subr.bf16.mxu1 %v9857_v27 }
 0x400   : > { %7818 = vmatpush2.bf16.msra.mxu0 %v9852_v28 }
 0x401   : > { %7819 = vmatprep.subr.bf16.mxu0 %v9860_v48 }
 0x402   : > { %7859 = vmatpush2.bf16.msra.mxu1 %v9855_v62  ;;  %v9893_v62 = vld [vmem:[%s10131_s8 + $0x8] sm:$0xff] }
 0x403   : > { %7860 = vmatprep.subr.bf16.mxu1 %v9863_v9  ;;  %v7880_v48 = vadd.f32 %v9893_v62, %v13225_v37 }
 0x404   : > { %7820 = vmatpush2.bf16.msra.mxu0 %v9858_v29 }
 0x405   : > { %7821 = vmatprep.subr.bf16.mxu0 %v9866_v32 }
 0x406   : > { %7861 = vmatpush2.bf16.msra.mxu1 %v9861_v19  ;;  %v9894_v19 = vld [vmem:[%s10131_s8] sm:$0xff] }
 0x407   : > { %7862 = vmatprep.subr.bf16.mxu1 %v9869_v30  ;;  %v7879_v32 = vadd.f32 %v9894_v19, %v13218_v41 }
 0x408   : > { %7822 = vmatpush2.bf16.msra.mxu0 %v9864_v2 }
 0x409   : > { %7823 = vmatprep.subr.bf16.mxu0 %v9872_v35 }
 0x40a   : > { %7863 = vmatpush2.bf16.msra.mxu1 %v9867_v34 }
 0x40b   : > { %7864 = vmatprep.subr.bf16.mxu1 %v9875_v3  ;;  %v7891_v3 = vmul.f32 %v7880_v48, %v7880_v48 }
 0x40c   : > { %7824 = vmatpush2.bf16.msra.mxu0 %v9870_v57 }
 0x40d   : > { %7825 = vmatprep.subr.bf16.mxu0 %v9878_v38 }
 0x40e   : > { %7865 = vmatpush2.bf16.msra.mxu1 %v9873_v39 }
 0x40f   : > { %7866 = vmatprep.subr.bf16.mxu1 %v9881_v53 }
 0x410   : > { %7826 = vmatpush2.bf16.msra.mxu0 %v9876_v13  ;;  %v7890_v13 = vmul.f32 %v7879_v32, %v7879_v32 }
 0x411   : > { %7827 = vmatprep.subr.bf16.mxu0 %v9884_v42 }
 0x412   : > { %7867 = vmatpush2.bf16.msra.mxu1 %v9879_v54  ;;  %v9895_v54 = vld [vmem:[%s10131_s8 + $0x10] sm:$0xff]  ;;  %s269_s8 = sand.u32 1, %s9949_s25  }
 0x413   : > { %7868 = vmatprep.subr.bf16.mxu1 %v9887_v56  ;;  %s8047_s22 = sshll.u32 %s269_s8, 5  ;;  %s7970_s28 = scalar_lea.sflag [#allocation3], %s269_s8 }
 0x414   : > { %7828 = vmatpush2.bf16.msra.mxu0 %v9882_v5  ;;  %v7883_v5 = vadd.f32 %v7880_v48, %v7879_v32  ;;  %s271_s13 = scalar_lea.vmem [#allocation2], %s8047_s22 }
 0x415   : > { %s7984_s14 = sshll.u32 %s271_s13, 4  ;;  %s13425_s14 = int_to_ptr.vmem [resolvable:$true] %s7984_s14 }
 0x416   : > { %7869 = vmatpush2.bf16.msra.mxu1 %v9885_v1  ;;  %s9897_s18 = scalar_lea.vmem %s13425_s14, 512  ;;  %p9904_p0 = scmp.lt.s32.totalorder %s13425_s14, %s9902_s20 }
 0x417   : > { %v7585_v4 = vpop.f32.mrf.mxu0  ;;  %7830 = vmatmul.mubr.bf16.vlgmr.msra.gmra.mxu0 %v12587_v49  ;;  %p9898_p11 = scmp.ne.s32.totalorder %s13425_s14, %s9897_s18  ;;  %p9905_p1 = scmp.lt.s32.totalorder %s9903_s21, %s9897_s18 }
 0x418   : > { %v7586_v46 = vadd.f32 %v7585_v4, %v4654_v16 }
 0x419   : > { %v7626_v50 = vpop.f32.mrf.mxu1  ;;  %7871 = vmatmul.mubr.bf16.vlgmr.msra.gmra.mxu1 %v12592_v17  ;;  %v7587_v18 = vpop.f32.mrf.mxu0  ;;  %p9899_p12 = pnand %p9898_p11, %p10038_p5  ;;  %p9906_p2 = por %p9905_p1, %p9904_p0 }
 0x41a   : > { %v7627_v15 = vadd.f32 %v7626_v50, %v7586_v46  ;;  %v7588_v51 = vadd.f32 %v7587_v18, %v4658_v26  ;;  %v7894_v46 = vadd.f32 %v7891_v3, %v7890_v13 }
 0x41b   : > { %v7628_v11 = vpop.f32.mrf.mxu1  ;;  %v7589_v10 = vpop.f32.mrf.mxu0  ;;  %p9900_p13 = pneg %p9899_p12 }
 0x41c   : > { %v7629_v52 = vadd.f32 %v7628_v11, %v7588_v51 }
 0x41d   : > { %v7630_v31 = vpop.f32.mrf.mxu1  ;;  %v7590_v58 = vpop.f32.mrf.mxu0  ;;  %p9907_p3 = pnand %p9906_p2, %p9900_p13 }
 0x41f   : > { %v7631_v22 = vpop.f32.mrf.mxu1 }
 0x457   : > { %v7667_v55 = vpop.f32.mrf.mxu0 }
 0x458   : > { %v7668_v33 = vadd.f32 %v7667_v55, %v7627_v15 }
 0x459   : > { %v7708_v8 = vpop.f32.mrf.mxu1  ;;  %v7669_v6 = vpop.f32.mrf.mxu0 }
 0x45a   : > { %v7709_v36 = vadd.f32 %v7708_v8, %v7668_v33  ;;  %v7670_v61 = vadd.f32 %v7669_v6, %v7629_v52  ;;  %v7913_v8 = vld [vmem:[%s13471_s5] sm:$0xf] }
 0x45b   : > { %v7710_v49 = vpop.f32.mrf.mxu1  ;;  %v7671_v0 = vpop.f32.mrf.mxu0  ;;  %v7939_v6 = vld [vmem:[%s13472_s6] sm:$0xf] }
 0x45c   : > { %v7711_v44 = vadd.f32 %v7710_v49, %v7670_v61  ;;  %v7922_v61 = vrot.slane %v7913_v8, %v10881_v47  ;;  %v7926_v49 = vrot.slane %v7913_v8, %v11079_v14  ;;  %v7930_v0 = vrot.slane %v7913_v8, %v11091_v23 }
 0x45d   : > { %v7712_v17 = vpop.f32.mrf.mxu1  ;;  %v7672_v21 = vpop.f32.mrf.mxu0 }
 0x45f   : > { %v7713_v43 = vpop.f32.mrf.mxu1 }
 0x497   : > { %v7749_v12 = vpop.f32.mrf.mxu0 }
 0x498   : > { %v7750_v27 = vadd.f32 %v7749_v12, %v7709_v36  ;;  %v7918_v36 = vrot.slane %v7913_v8, %v10869_v40 }
 0x499   : > { %v7790_v20 = vpop.f32.mrf.mxu1  ;;  %v7751_v60 = vpop.f32.mrf.mxu0 }
 0x49a   : > { %v7752_v28 = vadd.f32 %v7751_v60, %v7711_v44  ;;  %v7791_v9 = vadd.f32 %v7790_v20, %v7750_v27  ;;  %v7944_v20 = vrot.slane %v7939_v6, %v10869_v40  ;;  %v7948_v60 = vrot.slane %v7939_v6, %v10881_v47 }
 0x49b   : > { %v7792_v45 = vpop.f32.mrf.mxu1  ;;  %v7753_v59 = vpop.f32.mrf.mxu0 }
 0x49c   : > { %v7793_v30 = vadd.f32 %v7792_v45, %v7752_v28  ;;  %v7952_v45 = vrot.slane %v7939_v6, %v11079_v14  ;;  %v7956_v59 = vrot.slane %v7939_v6, %v11091_v23 }
 0x49d   : > { %v7794_v25 = vpop.f32.mrf.mxu1  ;;  %v7754_v63 = vpop.f32.mrf.mxu0 }
 0x49f   : > { %v7795_v24 = vpop.f32.mrf.mxu1 }
 0x4d7   : > { %v7831_v29 = vpop.f32.mrf.mxu0 }
 0x4d8   : > { %v7832_v2 = vadd.f32 %v7831_v29, %v7791_v9 }
 0x4d9   : > { %v7872_v34 = vpop.f32.mrf.mxu1  ;;  %v7833_v35 = vpop.f32.mrf.mxu0 }
 0x4da   : > { %v7873_v57 = vadd.f32 %v7872_v34, %v7832_v2  ;;  %v7834_v39 = vadd.f32 %v7833_v35, %v7793_v30 }
 0x4db   : > { %v7874_v38 = vpop.f32.mrf.mxu1  ;;  %v7835_v53 = vpop.f32.mrf.mxu0 }
 0x4dc   : > { %v7881_v42 = vadd.f32 %v9895_v54, %v7873_v57  ;;  %v7875_v56 = vadd.f32 %v7874_v38, %v7834_v39 }
 0x4dd   : > { %v7876_v37 = vpop.f32.mrf.mxu1  ;;  %v7836_v1 = vpop.f32.mrf.mxu0 }
 0x4de   : > { %v7882_v16 = vadd.f32 %v9896_v7, %v7875_v56  ;;  %v7884_v26 = vadd.f32 %v7883_v5, %v7881_v42  ;;  %v7892_v4 = vmul.f32 %v7881_v42, %v7881_v42 }
 0x4df   : > { %v7877_v41 = vpop.f32.mrf.mxu1 }
 0x4e0   : > { %v7885_v50 = vadd.f32 %v7884_v26, %v7882_v16  ;;  %v7893_v18 = vmul.f32 %v7882_v16, %v7882_v16  ;;  %v7895_v15 = vadd.f32 %v7894_v46, %v7892_v4 }
 0x4e2   : > { %7886 = vadd.xlane.f32.xlu0 %v7885_v50  ;;  %v7896_v51 = vadd.f32 %v7895_v15, %v7893_v18 }
 0x4e6   : > { %7897 = vadd.xlane.f32.xlu0 %v7896_v51 }
 0x56b   : > { %v7887_v11 = vpop.xlane.xlu0 %7886 }
 0x56c   : > { %v7889_v10 = vmul.f32 0.001953125, %v7887_v11 }
 0x56e   : > { %v7900_v31 = vmul.f32 %v7889_v10, %v7889_v10  ;;  %v7903_v44 = vsub.f32 %v7879_v32, %v7889_v10  ;;  %v7904_v17 = vsub.f32 %v7880_v48, %v7889_v10  ;;  %v7905_v21 = vsub.f32 %v7881_v42, %v7889_v10 }
 0x56f   : > { %v7898_v52 = vpop.xlane.xlu0 %7897  ;;  %v7906_v43 = vsub.f32 %v7882_v16, %v7889_v10 }
 0x570   : > { %v7899_v58 = vmul.f32 0.001953125, %v7898_v52 }
 0x572   : > { %v7901_v22 = vsub.f32 %v7899_v58, %v7900_v31 }
 0x574   : > { %v7902_v55 = vmax.f32 %v7901_v22, 0.0 }
 0x576   : > { %v7907_v33 = vadd.f32 1e-05, %v7902_v55 }
 0x578   : > { %9888 = vrsqrt.f32 %v7907_v33 }
 0x585   : > { %v9889_v12 = vpop.eup %9888 }
 0x586   : > { %v7909_v25 = vmul.f32 %v9889_v12, %v7903_v44  ;;  %v7910_v63 = vmul.f32 %v9889_v12, %v7904_v17  ;;  %v7911_v24 = vmul.f32 %v9889_v12, %v7905_v21  ;;  %v7912_v27 = vmul.f32 %v9889_v12, %v7906_v43 }
 0x588   : > { %v7935_v28 = vmul.f32 %v7918_v36, %v7909_v25  ;;  %v7936_v62 = vmul.f32 %v7922_v61, %v7910_v63  ;;  %v7937_v48 = vmul.f32 %v7926_v49, %v7911_v24  ;;  %v7938_v9 = vmul.f32 %v7930_v0, %v7912_v27 }
 0x58a   : > { %v7961_v40 = vadd.f32 %v7944_v20, %v7935_v28  ;;  %v7962_v29 = vadd.f32 %v7948_v60, %v7936_v62  ;;  %v7963_v47 = vadd.f32 %v7952_v45, %v7937_v48  ;;  %v7964_v19 = vadd.f32 %v7956_v59, %v7938_v9 }
 0x58c   : > { %7965 = vst [vmem:[%s271_s13] sm:$0xff] %v7961_v40  ;;  %7966 = vst [vmem:[%s271_s13 + $0x8] sm:$0xff] %v7962_v29 }
 0x58d   : > { %7967 = vst [vmem:[%s271_s13 + $0x10] sm:$0xff] %v7963_v47  ;;  %7968 = vst [vmem:[%s271_s13 + $0x18] sm:$0xff] %v7964_v19 }
 0x58e   : > { %9910 = shalt.err (!%p9907_p3)
}
 0x58f   : > { %s9911_s22 = scalar_lea.hbm %s13423_s17, 512  ;;  %s9915_s29 = scalar_lea.hbm %s13473_s7, 1024 }
 0x590   : > { %p9912_p4 = scmp.ne.s32.totalorder %s13423_s17, %s9911_s22  ;;  %p9916_p9 = scmp.lt.s32.totalorder %s13423_s17, %s13473_s7 }
 0x591   : > { %p9917_p10 = scmp.lt.s32.totalorder %s9915_s29, %s9911_s22 }
 0x592   : > { %p9913_p7 = pnand %p9912_p4, %p10038_p5 }
 0x593   : > { %p9918_p11 = por %p9917_p10, %p9916_p9 }
 0x594   : > { %p9914_p8 = pneg %p9913_p7 }
 0x596   : > { %p9919_p12 = pnand %p9918_p11, %p9914_p8 }
 0x598   : > { %9922 = shalt.err (!%p9919_p12)
}
 0x599   : > { %9081 = dma.vmem_to_hbm [thread:$0]  (%p10038_p5), %s13425_s14, 512, %s13423_s17, %s7970_s28  }
 0x59a PF: > { %p9087_p13 = scmp.ge.s32.totalorder %s9957_s27, 2  ;;  %s7996_s15 = sand.u32 1, %s9945_s24  }
 0x59b   : > { %s7997_s16 = scalar_lea.sflag [#allocation3], %s7996_s15 }
 0x59c   : > { %p9084_p0 = pnand %p9087_p13, %p10042_p6 }
 0x59e   : > { %p9085_p1 = pneg %p9084_p0 }
 0x5a0   : > { %9940 = dma.done.wait (%p9085_p1), %s7997_s16, 512  }
 0x5a1   : > { %9942 = vsyncadd (%p9085_p1), %s7997_s16, 4294966784  ;;  %p17_p2 = scmp.ge.s32.totalorder %s10025_s30, 4   ;;  %s13476_s24 = smov %s9949_s25 }
 0x5a2   : > { %s13477_s25 = smov %s9953_s26  ;;  %s13478_s26 = smov %s10036_s10 }
 0x5a3   : > { %s13479_s27 = smov %s10025_s30  ;;  %19 = sbr.rel (!%p17_p2) target bundleno = 3 (0x3), region = 83 }
 0x5a8   :  { %8002 = vsyncpa [#allocation3], 1 }
 0x5a9   :  { %8004 = vsyncpa [#allocation3 + $0x1], 1 }

</bundles_post_ra>
